<compile_context>
chip_gen: v5e
topology: v5e:2x2
jax: 0.10.0
libtpu: 0.0.40
codegen_flags: <defaults>
</compile_context>

<pallas_src>
import math

import numpy as np

import jax
import jax.numpy as jnp
from jax import lax
from jax.experimental import pallas as pl
from jax.experimental.pallas import tpu as pltpu

_EPS = 1e-5
_TM_MAX = 1024          # max rows (B*Ho*Wo) per tile
_TM_MIN = 256           # min rows per tile once we split (>= 2 steps)
_FUSE_ROWS = 512        # single-tile (fused-BN) threshold
_VMEM_LIMIT = 32 * 1024 * 1024
_BF16 = jnp.bfloat16    # MXU operand / inter-layer activation dtype


def _round_up(x, m):
    return ((x + m - 1) // m) * m


def _cdiv(a, b):
    return -(-a // b)


def _tile_m(M):
    """Row tiling over M = B*Ho*Wo.

    Small maps stay in a single tile (enables in-kernel fused BatchNorm);
    larger maps get >= 2 grid steps so the "parallel" axis can shard across
    the two v7x TensorCores, capped at _TM_MAX rows.
    """
    M8 = _round_up(max(M, 1), 8)
    if M8 <= _FUSE_ROWS:
        return M8, 1
    tm = min(_TM_MAX, max(_TM_MIN, _round_up(_cdiv(M8, 2), 8)))
    gm = _cdiv(M, tm)
    return tm, gm


def _compiler_params():
    return pltpu.CompilerParams(
        dimension_semantics=("parallel",),
        vmem_limit_bytes=_VMEM_LIMIT,
    )


# ----------------------------------------------------------------------------
# In-kernel helpers: BN partial statistics / fused BN+ReLU epilogues
# ----------------------------------------------------------------------------
def _emit_tile_stats(acc, stats_ref, TM, M):
    """Per-tile partial stats: row0 = sum, row1 = sum((x - sum/TM)^2).

    Rows beyond M are exact zeros except possibly on the ragged last im2col
    tile, which is masked here; interior tiles skip the mask (review item)."""
    def write(a):
        s = jnp.sum(a, axis=0, keepdims=True)                    # (1, C)
        d = a - s * (1.0 / TM)
        stats_ref[0, 0:1, :] = s
        stats_ref[0, 1:2, :] = jnp.sum(d * d, axis=0, keepdims=True)

    if M % TM == 0:
        write(acc)
    else:
        i = pl.program_id(0)
        last = pl.num_programs(0) - 1

        @pl.when(i < last)
        def _():
            write(acc)

        @pl.when(i == last)
        def _():
            row = i * TM + lax.broadcasted_iota(jnp.int32, (TM, 1), 0)
            write(jnp.where(row < M, acc, 0.0))


def _fused_bn_relu(acc, TM, M, mask_rows):
    """Exact single-tile training BatchNorm + ReLU (gm == 1 only).

    Rows >= M must be exact zeros (mask_rows forces it for ragged im2col)."""
    if mask_rows and M % TM != 0:
        row = lax.broadcasted_iota(jnp.int32, (TM, 1), 0)
        acc = jnp.where(row < M, acc, 0.0)
    s = jnp.sum(acc, axis=0, keepdims=True)
    mean = s * (1.0 / M)
    d = acc - mean
    m2 = jnp.sum(d * d, axis=0, keepdims=True) - float(TM - M) * mean * mean
    var = jnp.maximum(m2 * (1.0 / M), 0.0)
    scale = lax.rsqrt(var + _EPS)                       # gamma = 1, beta = 0
    return jnp.maximum(d * scale, 0.0)


# ----------------------------------------------------------------------------
# Kernel A2: plain matmul conv (im2col / 1x1 features)  [+bias | +stats | +BN]
# ----------------------------------------------------------------------------
def _make_matmul_kernel(TM, M, mode, with_bias):
    def kernel(*refs):
        idx = 0
        p_ref = refs[idx]; idx += 1
        w_ref = refs[idx]; idx += 1
        b_ref = None
        if with_bias:
            b_ref = refs[idx]; idx += 1
        y_ref = refs[idx]; idx += 1
        stats_ref = refs[idx] if mode == "stats" else None

        acc = jnp.dot(p_ref[...], w_ref[...], preferred_element_type=jnp.float32)
        if b_ref is not None:
            acc = acc + b_ref[...]

        if mode == "fused":
            y_ref[...] = _fused_bn_relu(acc, TM, M, mask_rows=True).astype(y_ref.dtype)
        else:
            y_ref[...] = acc.astype(y_ref.dtype)
            if mode == "stats":
                _emit_tile_stats(acc, stats_ref, TM, M)

    return kernel


def _matmul_conv(feats, wmat, *, mode, bias=None, out_dtype=_BF16):
    """feats: (M, K) bf16, wmat: (K, Cout) bf16."""
    M, K = feats.shape
    Cout = wmat.shape[1]
    TM, gm = _tile_m(M)
    if mode == "fused":
        assert gm == 1

    inputs = [feats, wmat]
    in_specs = [pl.BlockSpec((TM, K), lambda i: (i, 0)),
                pl.BlockSpec((K, Cout), lambda i: (0, 0))]
    if bias is not None:
        inputs.append(bias.reshape(1, Cout).astype(jnp.float32))
        in_specs.append(pl.BlockSpec((1, Cout), lambda i: (0, 0)))

    if mode == "stats":
        out_shape = (jax.ShapeDtypeStruct((M, Cout), out_dtype),
                     jax.ShapeDtypeStruct((gm, 2, Cout), jnp.float32))
        out_specs = (pl.BlockSpec((TM, Cout), lambda i: (i, 0)),
                     pl.BlockSpec((1, 2, Cout), lambda i: (i, 0, 0)))
    else:
        out_shape = jax.ShapeDtypeStruct((M, Cout), out_dtype)
        out_specs = pl.BlockSpec((TM, Cout), lambda i: (i, 0))

    kernel = _make_matmul_kernel(TM, M, mode, bias is not None)
    out = pl.pallas_call(
        kernel,
        grid=(gm,),
        in_specs=in_specs,
        out_specs=out_specs,
        out_shape=out_shape,
        compiler_params=_compiler_params(),
    )(*inputs)
    if mode == "stats":
        return out[0], out[1], TM
    return out, None, TM


# ----------------------------------------------------------------------------
# Kernel A1: 3x3 / stride-1 conv without im2col (manual halo DMA + 9 tap dots)
# ----------------------------------------------------------------------------
def _tap_masks_3x3(B, H, W, rows):
    """(rows, 9) bf16 {0,1} tap validity for the flattened output rows."""
    idx = np.arange(rows)
    valid = idx < B * H * W
    h = (idx // W) % H
    w = idx % W
    m = np.zeros((rows, 9), np.float32)
    for kh in range(3):
        for kw in range(3):
            ok = (valid
                  & (h + kh - 1 >= 0) & (h + kh - 1 < H)
                  & (w + kw - 1 >= 0) & (w + kw - 1 < W))
            m[:, kh * 3 + kw] = ok
    return jnp.asarray(m, dtype=_BF16)


def _make_conv3x3_kernel(TM, TMH, M, W, mode, with_bias):
    def kernel(*refs):
        idx = 0
        mask_ref = refs[idx]; idx += 1
        w_ref = refs[idx]; idx += 1
        b_ref = None
        if with_bias:
            b_ref = refs[idx]; idx += 1
        x_hbm = refs[idx]; idx += 1
        y_ref = refs[idx]; idx += 1
        stats_ref = None
        if mode == "stats":
            stats_ref = refs[idx]; idx += 1
        xbuf = refs[idx]; idx += 1
        sem = refs[idx]

        # Fetch the halo window of flattened rows for this tile (sync so the
        # grid axis stays safely "parallel").
        row0 = pl.multiple_of(pl.program_id(0) * TM, 8)
        cp = pltpu.make_async_copy(x_hbm.at[pl.ds(row0, TMH)], xbuf, sem)
        cp.start()
        cp.wait()

        Cout = y_ref.shape[-1]
        acc = jnp.zeros((TM, Cout), jnp.float32)
        for kh in range(3):
            for kw in range(3):
                t = kh * 3 + kw
                off = kh * W + kw                      # shift inside the halo
                slab = xbuf[off:off + TM, :] * mask_ref[:, t:t + 1]
                acc = acc + jnp.dot(slab, w_ref[t],
                                    preferred_element_type=jnp.float32)
        if b_ref is not None:
            acc = acc + b_ref[...]

        if mode == "fused":
            y_ref[...] = _fused_bn_relu(acc, TM, M, mask_rows=False).astype(y_ref.dtype)
        else:
            y_ref[...] = acc.astype(y_ref.dtype)
            if mode == "stats":
                _emit_tile_stats(acc, stats_ref, TM, M)

    return kernel


def _conv3x3_s1(x_nhwc, w, *, mode, bias=None, out_dtype=_BF16):
    B, H, W, Cin = x_nhwc.shape
    Cout = w.shape[-1]
    M = B * H * W
    TM, gm = _tile_m(M)
    if mode == "fused":
        assert gm == 1
    TMH = _round_up(TM + 2 * W + 2, 8)                 # halo window rows
    rows_pad = (gm - 1) * TM + TMH
    top = W + 1
    bot = rows_pad - top - M

    x_flat = x_nhwc.reshape(M, Cin).astype(_BF16)
    xpad = jnp.concatenate(
        [jnp.zeros((top, Cin), _BF16), x_flat, jnp.zeros((bot, Cin), _BF16)],
        axis=0)
    mask9 = _tap_masks_3x3(B, H, W, gm * TM)
    wt = w.reshape(9, Cin, Cout).astype(_BF16)

    inputs = [mask9, wt]
    in_specs = [pl.BlockSpec((TM, 9), lambda i: (i, 0)),
                pl.BlockSpec((9, Cin, Cout), lambda i: (0, 0, 0))]
    if bias is not None:
        inputs.append(bias.reshape(1, Cout).astype(jnp.float32))
        in_specs.append(pl.BlockSpec((1, Cout), lambda i: (0, 0)))
    inputs.append(xpad)
    in_specs.append(pl.BlockSpec(memory_space=pl.ANY))

    if mode == "stats":
        out_shape = (jax.ShapeDtypeStruct((M, Cout), out_dtype),
                     jax.ShapeDtypeStruct((gm, 2, Cout), jnp.float32))
        out_specs = (pl.BlockSpec((TM, Cout), lambda i: (i, 0)),
                     pl.BlockSpec((1, 2, Cout), lambda i: (i, 0, 0)))
    else:
        out_shape = jax.ShapeDtypeStruct((M, Cout), out_dtype)
        out_specs = pl.BlockSpec((TM, Cout), lambda i: (i, 0))

    kernel = _make_conv3x3_kernel(TM, TMH, M, W, mode, bias is not None)
    out = pl.pallas_call(
        kernel,
        grid=(gm,),
        in_specs=in_specs,
        out_specs=out_specs,
        out_shape=out_shape,
        scratch_shapes=[pltpu.VMEM((TMH, Cin), _BF16),
                        pltpu.SemaphoreType.DMA],
        compiler_params=_compiler_params(),
    )(*inputs)
    if mode == "stats":
        return out[0], out[1], TM
    return out, None, TM


# ----------------------------------------------------------------------------
# Kernel B: fused  y*scale+shift -> ReLU [-> + residual(-affine) -> ReLU]
# ----------------------------------------------------------------------------
def _make_affine_kernel(with_res, with_res_affine):
    def kernel(*refs):
        idx = 0
        y_ref = refs[idx]; idx += 1
        a_ref = refs[idx]; idx += 1
        r_ref = ra_ref = None
        if with_res:
            r_ref = refs[idx]; idx += 1
            if with_res_affine:
                ra_ref = refs[idx]; idx += 1
        o_ref = refs[idx]

        y = y_ref[...].astype(jnp.float32)
        out = jnp.maximum(y * a_ref[0:1, :] + a_ref[1:2, :], 0.0)
        if with_res:
            r = r_ref[...].astype(jnp.float32)
            if with_res_affine:
                r = r * ra_ref[0:1, :] + ra_ref[1:2, :]
            out = jnp.maximum(out + r, 0.0)
        o_ref[...] = out.astype(o_ref.dtype)

    return kernel


def _affine_act(y, affine, residual=None, res_affine=None, out_dtype=_BF16):
    M, Cout = y.shape
    TM, gm = _tile_m(M)

    inputs = [y, affine]
    in_specs = [pl.BlockSpec((TM, Cout), lambda i: (i, 0)),
                pl.BlockSpec((2, Cout), lambda i: (0, 0))]
    if residual is not None:
        inputs.append(residual)
        in_specs.append(pl.BlockSpec((TM, Cout), lambda i: (i, 0)))
        if res_affine is not None:
            inputs.append(res_affine)
            in_specs.append(pl.BlockSpec((2, Cout), lambda i: (0, 0)))

    kernel = _make_affine_kernel(residual is not None, res_affine is not None)
    return pl.pallas_call(
        kernel,
        grid=(gm,),
        in_specs=in_specs,
        out_specs=pl.BlockSpec((TM, Cout), lambda i: (i, 0)),
        out_shape=jax.ShapeDtypeStruct((M, Cout), out_dtype),
        compiler_params=_compiler_params(),
    )(*inputs)


# ----------------------------------------------------------------------------
# JAX glue: im2col (strided / 7x7 convs only) + BN-stat combine
# ----------------------------------------------------------------------------
def _im2col(x, KH, KW, stride):
    B, H, W, Cin = x.shape
    ph, pw = KH // 2, KW // 2
    Ho = (H + 2 * ph - KH) // stride + 1
    Wo = (W + 2 * pw - KW) // stride + 1
    xp = jnp.pad(x.astype(_BF16), ((0, 0), (ph, ph), (pw, pw), (0, 0)))
    slabs = []
    for kh in range(KH):
        for kw in range(KW):
            slabs.append(xp[:, kh:kh + (Ho - 1) * stride + 1:stride,
                            kw:kw + (Wo - 1) * stride + 1:stride, :])
    patches = jnp.stack(slabs, axis=3).reshape(B * Ho * Wo, KH * KW * Cin)
    return patches, (B, Ho, Wo)


def _bn_affine_from_stats(stats, M, TM):
    """stats: (gm, 2, C) per-tile [sum, sum((x - sum/TM)^2)], pad rows == 0.

    Chan-style combine (with a cross term because the per-tile centre uses /TM)
    to avoid the catastrophic E[x^2] - E[x]^2 cancellation."""
    gm = stats.shape[0]
    n_t = np.minimum(TM, M - TM * np.arange(gm)).astype(np.float32)[:, None]
    sum_t = stats[:, 0, :]
    m2c_t = stats[:, 1, :]
    c_t = sum_t * (1.0 / TM)
    mean = jnp.sum(sum_t, axis=0) * (1.0 / M)
    ssr_t = m2c_t - (TM - n_t) * c_t * c_t             # sum_real (x - c_t)^2
    cross_t = 2.0 * (c_t - mean) * (sum_t - n_t * c_t)
    m2 = jnp.sum(ssr_t + n_t * (c_t - mean) ** 2 + cross_t, axis=0)
    var = jnp.maximum(m2 * (1.0 / M), 0.0)
    scale = lax.rsqrt(var + _EPS)                      # gamma = 1
    shift = -mean * scale                              # beta = 0
    return jnp.stack([scale, shift], axis=0)           # (2, C)


# ----------------------------------------------------------------------------
# Conv layer helpers
# ----------------------------------------------------------------------------
def _out_hw(H, W, K, stride):
    p = K // 2
    return (H + 2 * p - K) // stride + 1, (W + 2 * p - K) // stride + 1


def _conv_dispatch(x, w, *, stride, mode, bias=None, out_dtype=_BF16):
    """3x3/s1 -> in-kernel-patch path; 1x1 -> plain matmul; else XLA im2col."""
    KH, KW, Cin, Cout = w.shape
    B, H, W_, _ = x.shape
    if KH == 3 and KW == 3 and stride == 1:
        y, stats, TM = _conv3x3_s1(x, w, mode=mode, bias=bias, out_dtype=out_dtype)
        return y, stats, TM, (B, H, W_)
    if KH == 1 and KW == 1:
        xs = x[:, ::stride, ::stride, :] if stride > 1 else x
        Bo, Ho, Wo, _ = xs.shape
        feats = xs.reshape(Bo * Ho * Wo, Cin).astype(_BF16)
        y, stats, TM = _matmul_conv(feats, w.reshape(Cin, Cout).astype(_BF16),
                                    mode=mode, bias=bias, out_dtype=out_dtype)
        return y, stats, TM, (Bo, Ho, Wo)
    # TODO(synk): strided 3x3 / 7x7 convs still use an XLA-materialized im2col.
    patches, sp = _im2col(x, KH, KW, stride)
    y, stats, TM = _matmul_conv(
        patches, w.reshape(KH * KW * Cin, Cout).astype(_BF16),
        mode=mode, bias=bias, out_dtype=out_dtype)
    return y, stats, TM, sp


def conv_bn_relu(x, w, *, stride):
    """Conv (bias dropped: cancelled by train-mode BN) + BN + ReLU."""
    KH = w.shape[0]
    Cout = w.shape[-1]
    B, H, W_, _ = x.shape
    Ho, Wo = _out_hw(H, W_, KH, stride)
    _, gm = _tile_m(B * Ho * Wo)
    if gm == 1:          # single tile: BN + ReLU fused into the conv kernel
        y, _, _, sp = _conv_dispatch(x, w, stride=stride, mode="fused")
    else:
        y, stats, TM, sp = _conv_dispatch(x, w, stride=stride, mode="stats")
        affine = _bn_affine_from_stats(stats, y.shape[0], TM)
        y = _affine_act(y, affine)
    return y.reshape(sp[0], sp[1], sp[2], Cout)


def conv_bn_raw(x, w, *, stride):
    """Raw conv output (M, Cout) bf16 + per-channel BN affine (2, Cout)."""
    y, stats, TM, sp = _conv_dispatch(x, w, stride=stride, mode="stats")
    affine = _bn_affine_from_stats(stats, y.shape[0], TM)
    return y, affine, sp


def conv_plain(x, w, b, *, stride=1):
    """Conv + bias, no norm / activation (output heads)."""
    y, _, _, sp = _conv_dispatch(x, w, stride=stride, mode="plain",
                                 bias=b, out_dtype=jnp.float32)
    return y.reshape(sp[0], sp[1], sp[2], w.shape[-1])


def residual_block(x, p):
    s = p["stride"]
    w1, _b1 = p["conv1"]      # conv biases unused: cancelled by train-mode BN
    w2, _b2 = p["conv2"]
    Cout = w2.shape[-1]

    h = conv_bn_relu(x, w1, stride=s)
    y2, aff2, (B, Ho, Wo) = conv_bn_raw(h, w2, stride=1)

    if "down" in p:
        wd, _bd = p["down"]
        yd, affd, _ = conv_bn_raw(x, wd, stride=s)      # 1x1, no im2col
        out = _affine_act(y2, aff2, residual=yd, res_affine=affd)
    else:
        res = x.astype(_BF16).reshape(B * Ho * Wo, Cout)
        out = _affine_act(y2, aff2, residual=res)
    return out.reshape(B, Ho, Wo, Cout)


# ----------------------------------------------------------------------------
# Parameters (shapes match the PyTorch module; layer2 zero-padded to 128 ch)
# ----------------------------------------------------------------------------
class _Init:
    def __init__(self, seed=0):
        self.key = jax.random.PRNGKey(seed)

    def _next(self):
        self.key, sub = jax.random.split(self.key)
        return sub

    def conv(self, kh, kw, cin, cout):
        fan_out = cout * kh * kw
        std = math.sqrt(2.0 / fan_out)   # kaiming_normal_, fan_out, relu
        w = std * jax.random.normal(self._next(), (kh, kw, cin, cout), jnp.float32)
        bound = 1.0 / math.sqrt(cin * kh * kw)
        b = jax.random.uniform(self._next(), (cout,), jnp.float32, -bound, bound)
        return w, b


def _pad_conv(wb, cin_to=None, cout_to=None):
    w, b = wb
    _, _, cin, cout = w.shape
    cin_to = cin if cin_to is None else cin_to
    cout_to = cout if cout_to is None else cout_to
    w = jnp.pad(w, ((0, 0), (0, 0), (0, cin_to - cin), (0, cout_to - cout)))
    b = jnp.pad(b, ((0, cout_to - cout),))
    return w, b


def _pad_block_channels(p, cin_to, cout_to):
    """Zero-pad a residual block's channels (exact: zero channels stay zero)."""
    q = dict(p)
    q["conv1"] = _pad_conv(p["conv1"], cin_to=cin_to, cout_to=cout_to)
    q["conv2"] = _pad_conv(p["conv2"], cin_to=cout_to, cout_to=cout_to)
    if "down" in p:
        q["down"] = _pad_conv(p["down"], cin_to=cin_to, cout_to=cout_to)
    return q


def _residual_block_params(init, in_planes, planes, stride):
    p = {"stride": stride,
         "conv1": init.conv(3, 3, in_planes, planes),
         "conv2": init.conv(3, 3, planes, planes)}
    if not (stride == 1 and in_planes == planes):
        p["down"] = init.conv(1, 1, in_planes, planes)
    return p


def make_multi_basic_encoder_params(output_dim=((32, 48, 64),), downsample=3, seed=0):
    init = _Init(seed)
    P = {"conv1": init.conv(7, 7, 3, 64),
         "conv1_stride": 1 + (downsample > 2)}
    in_planes = 64

    def make_layer(dim, stride):
        nonlocal in_planes
        layer = [_residual_block_params(init, in_planes, dim, stride),
                 _residual_block_params(init, dim, dim, 1)]
        in_planes = dim
        return layer

    P["layer1"] = make_layer(64, 1)
    P["layer2"] = make_layer(96, 1 + (downsample > 1))
    P["layer3"] = make_layer(128, 1 + (downsample > 0))
    P["layer4"] = make_layer(128, 2)
    P["layer5"] = make_layer(128, 2)
    P["outputs08"] = [{"rb": _residual_block_params(init, 128, 128, 1),
                       "conv": init.conv(3, 3, 128, d[2])} for d in output_dim]
    P["outputs16"] = [{"rb": _residual_block_params(init, 128, 128, 1),
                       "conv": init.conv(3, 3, 128, d[1])} for d in output_dim]
    P["outputs32"] = [init.conv(3, 3, 128, d[0]) for d in output_dim]

    # Lane-dense padding of the 96-channel layer2 to 128 channels: zero
    # channels are exactly preserved through conv / train-mode BN / ReLU /
    # residual, so the real 96 channels are unchanged while every layer2 store
    # is lane-dense and the MXU N dimension is filled.
    P["layer2"][0] = _pad_block_channels(P["layer2"][0], cin_to=64, cout_to=128)
    P["layer2"][1] = _pad_block_channels(P["layer2"][1], cin_to=128, cout_to=128)
    P["layer3"][0] = _pad_block_channels(P["layer3"][0], cin_to=128, cout_to=128)
    return P


# ----------------------------------------------------------------------------
# Forward pass (mirrors MultiBasicEncoder.forward, norm_fn='batch')
# ----------------------------------------------------------------------------
def multi_basic_encoder_forward(params, x_nchw, dual_inp=False, num_layers=3):
    to_nchw = lambda t: jnp.transpose(t.astype(jnp.float32), (0, 3, 1, 2))
    x = jnp.transpose(x_nchw, (0, 2, 3, 1)).astype(jnp.float32)   # NCHW -> NHWC

    w, _ = params["conv1"]
    x = conv_bn_relu(x, w, stride=params["conv1_stride"])
    for blk in params["layer1"]:
        x = residual_block(x, blk)
    for blk in params["layer2"]:
        x = residual_block(x, blk)
    for blk in params["layer3"]:
        x = residual_block(x, blk)

    v = None
    if dual_inp:
        v = x
        x = x[: x.shape[0] // 2]

    def head_rb_conv(h, head):
        h2 = residual_block(h, head["rb"])
        wc, bc = head["conv"]
        return conv_plain(h2, wc, bc)

    outputs08 = [to_nchw(head_rb_conv(x, h)) for h in params["outputs08"]]
    if num_layers == 1:
        return (outputs08, to_nchw(v)) if dual_inp else (outputs08,)

    y = x
    for blk in params["layer4"]:
        y = residual_block(y, blk)
    outputs16 = [to_nchw(head_rb_conv(y, h)) for h in params["outputs16"]]
    if num_layers == 2:
        return (outputs08, outputs16, to_nchw(v)) if dual_inp else (outputs08, outputs16)

    z = y
    for blk in params["layer5"]:
        z = residual_block(z, blk)
    outputs32 = [to_nchw(conv_plain(z, wc, bc)) for (wc, bc) in params["outputs32"]]
    if dual_inp:
        return (outputs08, outputs16, outputs32, to_nchw(v))
    return (outputs08, outputs16, outputs32)


if __name__ == "__main__":
    key = jax.random.PRNGKey(0)
    # Small input consistent with the module: NCHW, 3 channels.
    x = jax.random.normal(key, (2, 3, 64, 64), jnp.float32)

    params = make_multi_basic_encoder_params(output_dim=((32, 48, 64),),
                                             downsample=3, seed=0)
    outputs08, outputs16, outputs32 = multi_basic_encoder_forward(params, x)

    for arrs in (outputs08, outputs16, outputs32):
        for a in arrs:
            jax.block_until_ready(a)

    assert outputs08[0].shape == (2, 64, 8, 8), outputs08[0].shape
    assert outputs16[0].shape == (2, 48, 4, 4), outputs16[0].shape
    assert outputs32[0].shape == (2, 32, 2, 2), outputs32[0].shape
    for arrs in (outputs08, outputs16, outputs32):
        for a in arrs:
            assert bool(jnp.all(jnp.isfinite(a))), "non-finite output"
    print("KERNEL_OK")
</pallas_src>

<mosaic_0001>
module attributes {stable_mosaic.version = 11 : i64} {
  func.func @kernel(%arg0: i32, %arg1: memref<1024x147xbf16, #tpu.memory_space<vmem>>, %arg2: memref<147x64xbf16, #tpu.memory_space<vmem>>, %arg3: memref<1024x64xbf16, #tpu.memory_space<vmem>>, %arg4: memref<1x2x64xf32, #tpu.memory_space<vmem>>) attributes {dimension_semantics = [#tpu.dimension_semantics<parallel>], iteration_bounds = array<i64: 2>, scalar_prefetch = 0 : i64, scratch_operands = 0 : i64, tpu.core_type = #tpu.core_type<tc>, window_params = [{transform_indices = @transform_0, window_bounds = array<i64: 1024, 147>}, {pipeline_mode = #tpu.pipeline_mode<synchronous>, transform_indices = @transform_1, window_bounds = array<i64: 147, 64>}, {transform_indices = @transform_2, window_bounds = array<i64: 1024, 64>}, {transform_indices = @transform_3, window_bounds = array<i64: 1, 2, 64>}]} {
    %c0 = arith.constant 0 : index
    %c0_0 = arith.constant 0 : index
    %0 = vector.load %arg1[%c0, %c0_0] : memref<1024x147xbf16, #tpu.memory_space<vmem>>, vector<1024x147xbf16>
    %c0_1 = arith.constant 0 : index
    %c0_2 = arith.constant 0 : index
    %1 = vector.load %arg2[%c0_1, %c0_2] : memref<147x64xbf16, #tpu.memory_space<vmem>>, vector<147x64xbf16>
    %cst = arith.constant dense<0.000000e+00> : vector<1024x64xf32>
    %2 = tpu.matmul %0, %1, %cst {dimension_numbers = #tpu.dot_dimension_numbers<[1], [0], [0], [1], [0, 0, 1, 1], [], []>} : vector<1024x147xbf16>, vector<147x64xbf16>, vector<1024x64xf32> -> vector<1024x64xf32>
    %3 = arith.truncf %2 : vector<1024x64xf32> to vector<1024x64xbf16>
    %c0_3 = arith.constant 0 : index
    %c0_4 = arith.constant 0 : index
    %4 = vector.load %arg3[%c0_3, %c0_4] : memref<1024x64xbf16, #tpu.memory_space<vmem>>, vector<1024x64xbf16>
    tpu.vector_store %arg3[%c0_3, %c0_4], %3 {strides = array<i32>} : memref<1024x64xbf16, #tpu.memory_space<vmem>>, vector<1024x64xbf16>,
    %cst_5 = arith.constant dense<0.000000e+00> : vector<64xf32>
    %5 = vector.multi_reduction <add>, %2, %cst_5 [0] : vector<1024x64xf32> to vector<64xf32>
    %6 = vector.shape_cast %5 : vector<64xf32> to vector<1x64xf32>
    %cst_6 = arith.constant 9.765625E-4 : f32
    %7 = vector.broadcast %cst_6 : f32 to vector<1x64xf32>
    %8 = arith.mulf %6, %7 : vector<1x64xf32>
    %9 = vector.broadcast %8 : vector<1x64xf32> to vector<1024x64xf32>
    %10 = arith.subf %2, %9 : vector<1024x64xf32>
    %c0_7 = arith.constant 0 : index
    %c0_8 = arith.constant 0 : index
    %c0_9 = arith.constant 0 : index
    %11 = vector.load %arg4[%c0_7, %c0_8, %c0_9] : memref<1x2x64xf32, #tpu.memory_space<vmem>>, vector<1x1x64xf32>
    %12 = vector.shape_cast %11 : vector<1x1x64xf32> to vector<1x64xf32>
    %13 = vector.shape_cast %6 : vector<1x64xf32> to vector<1x1x64xf32>
    tpu.vector_store %arg4[%c0_7, %c0_8, %c0_9], %13 {strides = array<i32>} : memref<1x2x64xf32, #tpu.memory_space<vmem>>, vector<1x1x64xf32>,
    %14 = arith.mulf %10, %10 : vector<1024x64xf32>
    %cst_10 = arith.constant dense<0.000000e+00> : vector<64xf32>
    %15 = vector.multi_reduction <add>, %14, %cst_10 [0] : vector<1024x64xf32> to vector<64xf32>
    %16 = vector.shape_cast %15 : vector<64xf32> to vector<1x64xf32>
    %c0_11 = arith.constant 0 : index
    %c1 = arith.constant 1 : index
    %c0_12 = arith.constant 0 : index
    %17 = vector.load %arg4[%c0_11, %c1, %c0_12] : memref<1x2x64xf32, #tpu.memory_space<vmem>>, vector<1x1x64xf32>
    %18 = vector.shape_cast %17 : vector<1x1x64xf32> to vector<1x64xf32>
    %19 = vector.shape_cast %16 : vector<1x64xf32> to vector<1x1x64xf32>
    tpu.vector_store %arg4[%c0_11, %c1, %c0_12], %19 {strides = array<i32>} : memref<1x2x64xf32, #tpu.memory_space<vmem>>, vector<1x1x64xf32>,
    return
  }
  func.func @transform_0(%arg0: i32) -> (i32, i32) {
    %c0_i32 = arith.constant 0 : i32
    %c0_i32_0 = arith.constant 0 : i32
    return %arg0, %c0_i32 : i32, i32
  }
  func.func @transform_1(%arg0: i32) -> (i32, i32) {
    %c0_i32 = arith.constant 0 : i32
    %c0_i32_0 = arith.constant 0 : i32
    %c0_i32_1 = arith.constant 0 : i32
    return %c0_i32, %c0_i32_0 : i32, i32
  }
  func.func @transform_2(%arg0: i32) -> (i32, i32) {
    %c0_i32 = arith.constant 0 : i32
    %c0_i32_0 = arith.constant 0 : i32
    return %arg0, %c0_i32 : i32, i32
  }
  func.func @transform_3(%arg0: i32) -> (i32, i32, i32) {
    %c0_i32 = arith.constant 0 : i32
    %c0_i32_0 = arith.constant 0 : i32
    %c0_i32_1 = arith.constant 0 : i32
    return %arg0, %c0_i32, %c0_i32_0 : i32, i32, i32
  }
}

</mosaic_0001>

<bundles_post_ra>
// kernel: tpu_custom_call.1
= control target key start
LH: loop header
LB: loop body
LE: loop exit
PB: predicated region body
PF: predicated region fallthrough
CT: control target
= control target key end

     0   :  { %9 = vsyncpa [#allocation3], 0  ;;  %s5751_s0 = inlined_call_operand.vmem [shape: bf16[2048,147], index: 0, kind: input, shape index: {}]   ;;  %s5752_s1 = inlined_call_operand.vmem [shape: bf16[147,64], index: 1, kind: input, shape index: {}]   ;;  %s5753_s2 = inlined_call_operand.vmem [shape: bf16[2048,64], index: 2, kind: output, shape index: {0}]   ;;  %s5754_s3 = inlined_call_operand.hbm [shape: f32[2,2,64], index: 3, kind: output, shape index: {1}]  }
   0x1   :  { %11 = vsyncpa [#allocation3 + $0x1], 0  ;;  %s3875_s12 = smov 0   ;;  %s3877_s13 = smov 0  }
   0x2   :  { %s3879_s14 = smov 0   ;;  %s3881_s15 = smov 0  }
   0x3 LB: > { %s3896_s16 = sadd.s32 4294967295, %s3852_s15   ;;  %s2976_s17 = sadd.s32 4294967294, %s3852_s15   ;;  %s3852_s15 = sphi %s3881_s15, %s6089_s15   ;;  %s3848_s14 = sphi %s3879_s14, %s6088_s14   ;;  %s3844_s13 = sphi %s3877_s13, %s6087_s13   ;;  %s3840_s12 = sphi %s3875_s12, %s6086_s12  }
   0x4   : > { %s3900_s18 = sadd.s32 1, %s3852_s15   ;;  %s97_s19 = sadd.s32 1, %s3848_s14 }
   0x5   : > { %s94_s20 = ssub.s32 %s3852_s15, %s3900_s18  ;;  %p107_p0 = scmp.ne.s32.totalorder %s3848_s14, %s3844_s13 }
   0x6   : > { %p95_p1 = scmp.eq.s32.totalorder %s94_s20, 0  ;;  %p108_p2 = scmp.eq.s32.totalorder %s3896_s16, 1 }
   0x7   : > { %p113_p3 = scmp.ne.s32.totalorder %s3844_s13, %s3840_s12  ;;  %p114_p4 = scmp.eq.s32.totalorder %s2976_s17, 1 }
   0x8   : > { %s3911_s21 = scalar_select %p95_p1, %s3848_s14, %s97_s19  }
   0x9   : > { %p3913_p5 = por %p108_p2, %p107_p0  ;;  %p3917_p6 = por %p114_p4, %p113_p3 }
   0xa   : > { %p2979_p7 = scmp.ge.s32.totalorder %s3852_s15, 1  ;;  %p145_p8 = scmp.lt.s32.totalorder %s3852_s15, 3 }
   0xc   : > { %p146_p9 = pnand %p2979_p7, %p145_p8 }
   0xe   : > { %149 = sbr.rel (%p146_p9) target bundleno = 1102 (0x44e), region = 28 }
  0x13   : > { %v3738_v0 = vld [vmem:[%s5752_s1 + $0x38] sm:$0xff]  ;;  %v335_v1 = vld [vmem:[%s5752_s1 + $0x48] sm:$0x3]  ;;  %vm1162_vm0 = vcmask 1040384   ;;  %vm1163_vm1 = vcmask 1041408   ;;  %s2981_s28 = sshll.u32 %s3896_s16, 7 }
  0x14   : > { %v949_v2 = vunpack.c.l.b16 %v335_v1  ;;  %1169 = vmatpush.bf16.msra.mxu0 %v3738_v0  ;;  %v3737_v3 = vld [vmem:[%s5752_s1 + $0x30] sm:$0xff]  ;;  %v3854_v4 = vmov 65535   ;;  %p176_p10 = scmp.lt.s32.totalorder %s2981_s28, 255  ;;  %3740 = vmatpush.bf16.msra.mxu2 %v3738_v0  ;;  %v3736_v9 = vld [vmem:[%s5752_s1 + $0x28] sm:$0xff]  ;;  %v3739_v10 = vld [vmem:[%s5752_s1 + $0x40] sm:$0xff]  ;;  %vm969_vm2 = vcmask 154624  }
  0x15   : > { %v1164_v5 = vsel %vm1162_vm0, 4294967295, %v3854_v4  ;;  %v3735_v14 = vld [vmem:[%s5752_s1 + $0x20] sm:$0xff]  ;;  %v3734_v15 = vld [vmem:[%s5752_s1 + $0x18] sm:$0xff]  ;;  %v3733_v16 = vld [vmem:[%s5752_s1 + $0x10] sm:$0xff]  ;;  %vm1955_vm3 = vcmask 519168   ;;  %vm2084_vm4 = vcmask 523264  }
  0x16   : > { %v959_v6 = vpack.c.b16 %v949_v2, %v949_v2  ;;  %v1165_v7 = vsel %vm1163_vm1, %v1164_v5, 0  ;;  %s6091_s28 = smov (!%p176_p10, %s2981_s28), 255  ;;  %v3732_v17 = vld [vmem:[%s5752_s1 + $0x8] sm:$0xff]  ;;  %v3731_v21 = vld [vmem:[%s5752_s1] sm:$0xff]  ;;  %vm2475_vm5 = vcmask 516096   ;;  %s3810_s4 = scalar_lea.hbm %s5754_s3, 4 }
  0x17   : > { %s3602_s6 = sshll.u32 %s6091_s28, 3  ;;  %s2985_s5 = sshll.u32 %s6091_s28, 2 }
  0x18   : > { %v1167_v8 = vand.u32 %v1165_v7, %v959_v6  ;;  %1170 = vmatpush.bf16.msra.mxu0 %v3737_v3  ;;  %3741 = vmatpush.bf16.msra.mxu2 %v3737_v3  ;;  %s3945_s11 = scalar_lea.vmem %s5751_s0, %s3602_s6  ;;  %s4028_s8 = scalar_lea.vmem %s5753_s2, %s2985_s5 }
  0x19   : > { %v3603_v11 = vld [vmem:[%s3945_s11 + $0x4] sm:$0xf]  ;;  %v2990_v12 = vld [vmem:[%s3945_s11 + $0x8] sm:$0xf0]  ;;  %v3605_v18 = vld [vmem:[%s3945_s11 + $0x14] sm:$0xf] }
  0x1a   : > { %1504 = vmatpush.bf16.msra.mxu1 %v1167_v8  ;;  %3748 = vmatpush.bf16.msra.mxu3 %v1167_v8  ;;  %v2993_v13 = vor.u32 %v3603_v11, %v2990_v12  ;;  %v2998_v19 = vld [vmem:[%s3945_s11 + $0x18] sm:$0xf0]  ;;  %v2988_v22 = vld [vmem:[%s3945_s11] sm:$0xf]  ;;  %v3604_v23 = vld [vmem:[%s3945_s11 + $0x4] sm:$0xf0] }
  0x1b   : > { %v3001_v20 = vor.u32 %v3605_v18, %v2998_v19  ;;  %v2989_v24 = vor.u32 %v3604_v23, %v2988_v22  ;;  %v3607_v25 = vld [vmem:[%s3945_s11 + $0x24] sm:$0xf]  ;;  %v3006_v26 = vld [vmem:[%s3945_s11 + $0x28] sm:$0xf0]  ;;  %v2996_v28 = vld [vmem:[%s3945_s11 + $0x10] sm:$0xf] }
  0x1c   : > { %1171 = vmatpush.bf16.msra.mxu0 %v3736_v9  ;;  %3742 = vmatpush.bf16.msra.mxu2 %v3736_v9  ;;  %v3009_v27 = vor.u32 %v3607_v25, %v3006_v26  ;;  %v3606_v29 = vld [vmem:[%s3945_s11 + $0x14] sm:$0xf0]  ;;  %v3609_v31 = vld [vmem:[%s3945_s11 + $0x34] sm:$0xf]  ;;  %v3014_v32 = vld [vmem:[%s3945_s11 + $0x38] sm:$0xf0] }
  0x1d   : > { %v2997_v30 = vor.u32 %v3606_v29, %v2996_v28  ;;  %v3017_v33 = vor.u32 %v3609_v31, %v3014_v32  ;;  %v3004_v34 = vld [vmem:[%s3945_s11 + $0x20] sm:$0xf]  ;;  %v3608_v35 = vld [vmem:[%s3945_s11 + $0x24] sm:$0xf0]  ;;  %v3611_v37 = vld [vmem:[%s3945_s11 + $0x44] sm:$0xf] }
  0x1e   : > { %1505 = vmatpush.bf16.msra.mxu1 %v3739_v10  ;;  %3749 = vmatpush.bf16.msra.mxu3 %v3739_v10  ;;  %v3005_v36 = vor.u32 %v3608_v35, %v3004_v34  ;;  %v3022_v38 = vld [vmem:[%s3945_s11 + $0x48] sm:$0xf0]  ;;  %v3012_v40 = vld [vmem:[%s3945_s11 + $0x30] sm:$0xf]  ;;  %v3610_v41 = vld [vmem:[%s3945_s11 + $0x34] sm:$0xf0] }
  0x1f   : > { %v3025_v39 = vor.u32 %v3611_v37, %v3022_v38  ;;  %v3013_v42 = vor.u32 %v3610_v41, %v3012_v40  ;;  %v3613_v43 = vld [vmem:[%s3945_s11 + $0x54] sm:$0xf]  ;;  %v3030_v44 = vld [vmem:[%s3945_s11 + $0x58] sm:$0xf0]  ;;  %v3020_v46 = vld [vmem:[%s3945_s11 + $0x40] sm:$0xf] }
  0x20   : > { %1172 = vmatpush.bf16.msra.mxu0 %v3735_v14  ;;  %3743 = vmatpush.bf16.msra.mxu2 %v3735_v14  ;;  %v3033_v45 = vor.u32 %v3613_v43, %v3030_v44  ;;  %v3612_v47 = vld [vmem:[%s3945_s11 + $0x44] sm:$0xf0]  ;;  %v3615_v49 = vld [vmem:[%s3945_s11 + $0x64] sm:$0xf]  ;;  %v3038_v50 = vld [vmem:[%s3945_s11 + $0x68] sm:$0xf0] }
  0x21   : > { %3534 = vmatmul.msk.bf16.vlgmr.msra.gmra.mxu1 %vm969_vm2, %v2993_v13  ;;  %v3021_v48 = vor.u32 %v3612_v47, %v3020_v46  ;;  %v3041_v51 = vor.u32 %v3615_v49, %v3038_v50  ;;  %v3028_v52 = vld [vmem:[%s3945_s11 + $0x50] sm:$0xf]  ;;  %v3614_v53 = vld [vmem:[%s3945_s11 + $0x54] sm:$0xf0]  ;;  %v3244_v55 = vld [vmem:[%s3945_s11 + $0x200] sm:$0xf] }
  0x22   : > { %v3029_v54 = vor.u32 %v3614_v53, %v3028_v52  ;;  %v3668_v56 = vld [vmem:[%s3945_s11 + $0x204] sm:$0xf0]  ;;  %v3617_v58 = vld [vmem:[%s3945_s11 + $0x74] sm:$0xf]  ;;  %v3046_v59 = vld [vmem:[%s3945_s11 + $0x78] sm:$0xf0] }
  0x23   : > { %v3245_v57 = vor.u32 %v3668_v56, %v3244_v55  ;;  %v3049_v60 = vor.u32 %v3617_v58, %v3046_v59  ;;  %v3036_v61 = vld [vmem:[%s3945_s11 + $0x60] sm:$0xf]  ;;  %v3616_v62 = vld [vmem:[%s3945_s11 + $0x64] sm:$0xf0]  ;;  %v3252_v0 = vld [vmem:[%s3945_s11 + $0x210] sm:$0xf] }
  0x24   : > { %1173 = vmatpush.bf16.msra.mxu0 %v3734_v15  ;;  %3744 = vmatpush.bf16.msra.mxu2 %v3734_v15  ;;  %v3037_v63 = vor.u32 %v3616_v62, %v3036_v61  ;;  %v3670_v1 = vld [vmem:[%s3945_s11 + $0x214] sm:$0xf0]  ;;  %v3669_v3 = vld [vmem:[%s3945_s11 + $0x214] sm:$0xf]  ;;  %v3254_v4 = vld [vmem:[%s3945_s11 + $0x218] sm:$0xf0] }
  0x25   : > { %v3253_v2 = vor.u32 %v3670_v1, %v3252_v0  ;;  %v3257_v5 = vor.u32 %v3669_v3, %v3254_v4  ;;  %v3619_v6 = vld [vmem:[%s3945_s11 + $0x84] sm:$0xf]  ;;  %v3054_v7 = vld [vmem:[%s3945_s11 + $0x88] sm:$0xf0]  ;;  %v3044_v9 = vld [vmem:[%s3945_s11 + $0x70] sm:$0xf] }
  0x26   : > { %v3057_v8 = vor.u32 %v3619_v6, %v3054_v7  ;;  %v3618_v10 = vld [vmem:[%s3945_s11 + $0x74] sm:$0xf0]  ;;  %v3260_v13 = vld [vmem:[%s3945_s11 + $0x220] sm:$0xf]  ;;  %v3672_v14 = vld [vmem:[%s3945_s11 + $0x224] sm:$0xf0] }
  0x27   : > { %3567 = vmatmul.msk.bf16.vlgmr.msra.gmra.mxu3 %vm969_vm2, %v3257_v5  ;;  %v3045_v12 = vor.u32 %v3618_v10, %v3044_v9  ;;  %v3671_v15 = vld [vmem:[%s3945_s11 + $0x224] sm:$0xf]  ;;  %v3052_v23 = vld [vmem:[%s3945_s11 + $0x80] sm:$0xf]  ;;  %v3268_v29 = vld [vmem:[%s3945_s11 + $0x230] sm:$0xf] }
  0x28   : > { %1174 = vmatpush.bf16.msra.mxu0 %v3733_v16  ;;  %3745 = vmatpush.bf16.msra.mxu2 %v3733_v16  ;;  %v3261_v16 = vor.u32 %v3672_v14, %v3260_v13  ;;  %v3673_v31 = vld [vmem:[%s3945_s11 + $0x234] sm:$0xf]  ;;  %v3270_v34 = vld [vmem:[%s3945_s11 + $0x238] sm:$0xf0]  ;;  %v3070_v40 = vld [vmem:[%s3945_s11 + $0xa8] sm:$0xf0] }
  0x29   : > { %v3273_v35 = vor.u32 %v3673_v31, %v3270_v34  ;;  %v3060_v43 = vld [vmem:[%s3945_s11 + $0x90] sm:$0xf]  ;;  %v3622_v44 = vld [vmem:[%s3945_s11 + $0x94] sm:$0xf0]  ;;  %v3276_v49 = vld [vmem:[%s3945_s11 + $0x240] sm:$0xf] }
  0x2a   : > { %v3061_v46 = vor.u32 %v3622_v44, %v3060_v43  ;;  %v3676_v50 = vld [vmem:[%s3945_s11 + $0x244] sm:$0xf0]  ;;  %v3625_v59 = vld [vmem:[%s3945_s11 + $0xb4] sm:$0xf]  ;;  %v3284_v5 = vld [vmem:[%s3945_s11 + $0x250] sm:$0xf] }
  0x2b   : > { %v3277_v53 = vor.u32 %v3676_v50, %v3276_v49  ;;  %v3624_v0 = vld [vmem:[%s3945_s11 + $0xa4] sm:$0xf0]  ;;  %v3678_v6 = vld [vmem:[%s3945_s11 + $0x254] sm:$0xf0]  ;;  %v3677_v7 = vld [vmem:[%s3945_s11 + $0x254] sm:$0xf] }
  0x2c   : > { %1175 = vmatpush.bf16.msra.mxu0 %v3732_v17  ;;  %3746 = vmatpush.bf16.msra.mxu2 %v3732_v17  ;;  %v3262_v17 = vld [vmem:[%s3945_s11 + $0x228] sm:$0xf0]  ;;  %v3285_v9 = vor.u32 %v3678_v6, %v3284_v5  ;;  %v3286_v10 = vld [vmem:[%s3945_s11 + $0x258] sm:$0xf0]  ;;  %v3682_v49 = vld [vmem:[%s3945_s11 + $0x274] sm:$0xf0] }
  0x2d   : > { %v3265_v18 = vor.u32 %v3671_v15, %v3262_v17  ;;  %v3627_v15 = vld [vmem:[%s3945_s11 + $0xc4] sm:$0xf]  ;;  %v3294_v31 = vld [vmem:[%s3945_s11 + $0x268] sm:$0xf0]  ;;  %v3681_v50 = vld [vmem:[%s3945_s11 + $0x274] sm:$0xf] }
  0x2e   : > { %v3308_v6 = vld [vmem:[%s3945_s11 + $0x280] sm:$0xf]  ;;  %s172_s28 = sand.u32 1, %s3844_s13  }
  0x2f   : > { %s2980_s9 = sshll.u32 %s172_s28, 1  ;;  %s2873_s26 = scalar_lea.sflag [#allocation3], %s172_s28 }
  0x30   : > { %1176 = vmatpush.bf16.msra.mxu0 %v3731_v21  ;;  %3747 = vmatpush.bf16.msra.mxu2 %v3731_v21  ;;  %v3062_v21 = vld [vmem:[%s3945_s11 + $0x98] sm:$0xf0]  ;;  %s5394_s10 = scalar_lea.vmem [#allocation2], %s2980_s9 }
  0x31   : > { %3535 = vmatmul.msk.bf16.gmra.mxu1 %vm969_vm2, %v3001_v20  ;;  %v3621_v20 = vld [vmem:[%s3945_s11 + $0x94] sm:$0xf]  ;;  %s2889_s24 = sshll.u32 %s5394_s10, 4  ;;  %s2890_s24 = int_to_ptr.vmem [resolvable:$true] %s2889_s24 }
  0x32   : > { %v3065_v22 = vor.u32 %v3621_v20, %v3062_v21  ;;  %v3626_v20 = vld [vmem:[%s3945_s11 + $0xb4] sm:$0xf0] }
  0x33   : > { %1177 = vmatmul.bf16.vlgmr.msra.gmra.mxu0 %v2989_v24  ;;  %1337 = vmatmul.bf16.vlgmr.msra.gmra.mxu2 %v3245_v57  ;;  %v3620_v24 = vld [vmem:[%s3945_s11 + $0x84] sm:$0xf0] }
  0x34   : > { %v3053_v26 = vor.u32 %v3620_v24, %v3052_v23 }
  0x37   : > { %3568 = vmatmul.msk.bf16.gmra.mxu3 %vm969_vm2, %v3265_v18 }
  0x41   : > { %3536 = vmatmul.msk.bf16.gmra.mxu1 %vm969_vm2, %v3009_v27 }
  0x43   : > { %1182 = vmatmul.bf16.gmra.mxu0 %v2997_v30  ;;  %1342 = vmatmul.bf16.gmra.mxu2 %v3253_v2  ;;  %v3674_v30 = vld [vmem:[%s3945_s11 + $0x234] sm:$0xf0] }
  0x47   : > { %3569 = vmatmul.msk.bf16.gmra.mxu3 %vm969_vm2, %v3273_v35 }
  0x51   : > { %3537 = vmatmul.msk.bf16.gmra.mxu1 %vm969_vm2, %v3017_v33  ;;  %v3269_v33 = vor.u32 %v3674_v30, %v3268_v29 }
  0x53   : > { %1187 = vmatmul.bf16.gmra.mxu0 %v3005_v36  ;;  %1347 = vmatmul.bf16.gmra.mxu2 %v3261_v16  ;;  %v3086_v16 = vld [vmem:[%s3945_s11 + $0xc8] sm:$0xf0] }
  0x54   : > { %v3089_v18 = vor.u32 %v3627_v15, %v3086_v16 }
  0x61   : > { %3538 = vmatmul.msk.bf16.gmra.mxu1 %vm969_vm2, %v3025_v39  ;;  %v3623_v39 = vld [vmem:[%s3945_s11 + $0xa4] sm:$0xf] }
  0x63   : > { %1192 = vmatmul.bf16.gmra.mxu0 %v3013_v42  ;;  %1352 = vmatmul.bf16.gmra.mxu2 %v3269_v33  ;;  %v3073_v42 = vor.u32 %v3623_v39, %v3070_v40 }
  0x71   : > { %3539 = vmatmul.msk.bf16.gmra.mxu1 %vm969_vm2, %v3033_v45 }
  0x73   : > { %1197 = vmatmul.bf16.gmra.mxu0 %v3021_v48  ;;  %1357 = vmatmul.bf16.gmra.mxu2 %v3277_v53  ;;  %v3302_v53 = vld [vmem:[%s3945_s11 + $0x278] sm:$0xf0] }
  0x81   : > { %3540 = vmatmul.msk.bf16.gmra.mxu1 %vm969_vm2, %v3041_v51  ;;  %v3675_v51 = vld [vmem:[%s3945_s11 + $0x244] sm:$0xf] }
  0x83   : > { %1202 = vmatmul.bf16.gmra.mxu0 %v3029_v54  ;;  %v3278_v54 = vld [vmem:[%s3945_s11 + $0x248] sm:$0xf0]  ;;  %1362 = vmatmul.bf16.gmra.mxu2 %v3285_v9 }
  0x84   : > { %v3281_v55 = vor.u32 %v3675_v51, %v3278_v54  ;;  %v3305_v54 = vor.u32 %v3681_v50, %v3302_v53 }
  0x86   : > { %3570 = vmatmul.msk.bf16.gmra.mxu3 %vm969_vm2, %v3281_v55 }
  0x91   : > { %3541 = vmatmul.msk.bf16.gmra.mxu1 %vm969_vm2, %v3049_v60  ;;  %v3078_v60 = vld [vmem:[%s3945_s11 + $0xb8] sm:$0xf0] }
  0x92   : > { %v3081_v62 = vor.u32 %v3625_v59, %v3078_v60  ;;  %v3631_v59 = vld [vmem:[%s3945_s11 + $0xe4] sm:$0xf]  ;;  %v3102_v60 = vld [vmem:[%s3945_s11 + $0xe8] sm:$0xf0] }
  0x93   : > { %1207 = vmatmul.bf16.gmra.mxu0 %v3037_v63  ;;  %v3068_v63 = vld [vmem:[%s3945_s11 + $0xa0] sm:$0xf] }
  0x94   : > { %v3069_v2 = vor.u32 %v3624_v0, %v3068_v63  ;;  %v3092_v63 = vld [vmem:[%s3945_s11 + $0xd0] sm:$0xf]  ;;  %v3630_v0 = vld [vmem:[%s3945_s11 + $0xd4] sm:$0xf0] }
  0x9e   : > { %v1507_v11 = vpop.f32.mrf.mxu1 }
  0xa1   : > { %3542 = vmatmul.msk.bf16.gmra.mxu1 %vm969_vm2, %v3057_v8 }
  0xa3   : > { %1212 = vmatmul.bf16.gmra.mxu0 %v3045_v12 }
  0xa6   : > { %v1509_v19 = vpop.f32.mrf.mxu1 }
  0xae   : > { %v1512_v25 = vpop.f32.mrf.mxu1 }
  0xb0   : > { %v1178_v27 = vpop.f32.mrf.mxu0 }
  0xb1   : > { %3543 = vmatmul.msk.bf16.gmra.mxu1 %vm969_vm2, %v3065_v22  ;;  %v4023_v28 = vadd.f32 %v1507_v11, %v1178_v27  ;;  %v3289_v11 = vor.u32 %v3677_v7, %v3286_v10  ;;  %v3679_v27 = vld [vmem:[%s3945_s11 + $0x264] sm:$0xf]  ;;  %v3684_v7 = vld [vmem:[%s3945_s11 + $0x284] sm:$0xf0] }
  0xb2   : > { %v3309_v10 = vor.u32 %v3684_v7, %v3308_v6  ;;  %v3326_v7 = vld [vmem:[%s3945_s11 + $0x2a8] sm:$0xf0] }
  0xb3   : > { %5878 = vst [vmem:[#allocation5_spill] sm:$0xff] %v4023_v28  ;;  %v1827_v32 = vpack.c.bf16 %v4023_v28, %v4023_v28  ;;  %1217 = vmatmul.bf16.gmra.mxu0 %v3053_v26  ;;  %3571 = vmatmul.msk.bf16.gmra.mxu3 %vm969_vm2, %v3289_v11  ;;  %v3680_v26 = vld [vmem:[%s3945_s11 + $0x264] sm:$0xf0]  ;;  %v3310_v11 = vld [vmem:[%s3945_s11 + $0x288] sm:$0xf0] }
  0xb5   : > { %1956 = vst.msk [vmem:[%s4028_s8] sm:$0xf] %vm1955_vm3, %v1827_v32  ;;  %v3297_v32 = vor.u32 %v3679_v27, %v3294_v31  ;;  %v3316_v31 = vld [vmem:[%s3945_s11 + $0x290] sm:$0xf] }
  0xb6   : > { %v1514_v36 = vpop.f32.mrf.mxu1  ;;  %v4149_v16 = vpop.f32.mrf.mxu2 }
  0xb7   : > { %5885 = vst [vmem:[#allocation12_spill] sm:$0xff] %v4149_v16 }
  0xb8   : > { %v1180_v37 = vpop.f32.mrf.mxu0 }
  0xb9   : > { %v4039_v38 = vadd.f32 %v1509_v19, %v1180_v37  ;;  %v3076_v19 = vld [vmem:[%s3945_s11 + $0xb0] sm:$0xf]  ;;  %v3094_v37 = vld [vmem:[%s3945_s11 + $0xd8] sm:$0xf0] }
  0xba   : > { %v3077_v22 = vor.u32 %v3626_v20, %v3076_v19  ;;  %v3110_v19 = vld [vmem:[%s3945_s11 + $0xf8] sm:$0xf0] }
  0xbb   : > { %5879 = vst [vmem:[#allocation6_spill] sm:$0xff] %v4039_v38  ;;  %v1828_v41 = vpack.c.bf16 %v4039_v38, %v4039_v38 }
  0xbd   : > { %1957 = vst.msk [vmem:[%s4028_s8 + $0x4] sm:$0xf] %vm1955_vm3, %v1828_v41  ;;  %v3084_v41 = vld [vmem:[%s3945_s11 + $0xc0] sm:$0xf] }
  0xbe   : > { %v1517_v45 = vpop.f32.mrf.mxu1 }
  0xc0   : > { %v1183_v47 = vpop.f32.mrf.mxu0 }
  0xc1   : > { %3544 = vmatmul.msk.bf16.gmra.mxu1 %vm969_vm2, %v3073_v42  ;;  %v4050_v48 = vadd.f32 %v1512_v25, %v1183_v47  ;;  %v3292_v25 = vld [vmem:[%s3945_s11 + $0x260] sm:$0xf]  ;;  %v3628_v42 = vld [vmem:[%s3945_s11 + $0xc4] sm:$0xf0]  ;;  %v3300_v47 = vld [vmem:[%s3945_s11 + $0x270] sm:$0xf] }
  0xc2   : > { %v3293_v30 = vor.u32 %v3680_v26, %v3292_v25  ;;  %v3085_v44 = vor.u32 %v3628_v42, %v3084_v41 }
  0xc3   : > { %5880 = vst [vmem:[#allocation7_spill] sm:$0xff] %v4050_v48  ;;  %v1829_v52 = vpack.c.bf16 %v4050_v48, %v4050_v48  ;;  %1222 = vmatmul.bf16.gmra.mxu0 %v3061_v46  ;;  %3572 = vmatmul.msk.bf16.gmra.mxu3 %vm969_vm2, %v3297_v32  ;;  %v3686_v32 = vld [vmem:[%s3945_s11 + $0x294] sm:$0xf0] }
  0xc4   : > { %1367 = vmatmul.bf16.gmra.mxu2 %v3293_v30 }
  0xc5   : > { %1958 = vst.msk [vmem:[%s4028_s8 + $0x8] sm:$0xf] %vm1955_vm3, %v1829_v52  ;;  %v3301_v52 = vor.u32 %v3682_v49, %v3300_v47  ;;  %v1672_v47 = vpop.f32.mrf.mxu3 }
  0xc6   : > { %v1519_v56 = vpop.f32.mrf.mxu1 }
  0xc8   : > { %v1185_v57 = vpop.f32.mrf.mxu0 }
  0xc9   : > { %v4061_v58 = vadd.f32 %v1514_v36, %v1185_v57  ;;  %v3629_v36 = vld [vmem:[%s3945_s11 + $0xd4] sm:$0xf] }
  0xca   : > { %v3097_v40 = vor.u32 %v3629_v36, %v3094_v37  ;;  %v3317_v36 = vor.u32 %v3686_v32, %v3316_v31  ;;  %v3318_v37 = vld [vmem:[%s3945_s11 + $0x298] sm:$0xf0] }
  0xcb   : > { %5881 = vst [vmem:[#allocation8_spill] sm:$0xff] %v4061_v58  ;;  %v1830_v61 = vpack.c.bf16 %v4061_v58, %v4061_v58 }
  0xcd   : > { %1959 = vst.msk [vmem:[%s4028_s8 + $0xc] sm:$0xf] %vm1955_vm3, %v1830_v61 }
  0xce   : > { %v1522_v1 = vpop.f32.mrf.mxu1 }
  0xd0   : > { %v1188_v3 = vpop.f32.mrf.mxu0 }
  0xd1   : > { %3545 = vmatmul.msk.bf16.gmra.mxu1 %vm969_vm2, %v3081_v62  ;;  %v4072_v4 = vadd.f32 %v1517_v45, %v1188_v3  ;;  %v3105_v62 = vor.u32 %v3631_v59, %v3102_v60 }
  0xd3   : > { %v1831_v8 = vpack.c.bf16 %v4072_v4, %v4072_v4  ;;  %1227 = vmatmul.bf16.gmra.mxu0 %v3069_v2  ;;  %3573 = vmatmul.msk.bf16.gmra.mxu3 %vm969_vm2, %v3305_v54  ;;  %v3093_v2 = vor.u32 %v3630_v0, %v3092_v63  ;;  %v3324_v0 = vld [vmem:[%s3945_s11 + $0x2a0] sm:$0xf] }
  0xd4   : > { %1372 = vmatmul.bf16.gmra.mxu2 %v3301_v52  ;;  %v3634_v52 = vld [vmem:[%s3945_s11 + $0xf4] sm:$0xf0] }
  0xd5   : > { %1960 = vst.msk [vmem:[%s4028_s8 + $0x10] sm:$0xf] %vm1955_vm3, %v1831_v8  ;;  %v3683_v8 = vld [vmem:[%s3945_s11 + $0x284] sm:$0xf] }
  0xd6   : > { %v1524_v12 = vpop.f32.mrf.mxu1 }
  0xd8   : > { %v1190_v13 = vpop.f32.mrf.mxu0 }
  0xd9   : > { %v4083_v14 = vadd.f32 %v1519_v56, %v1190_v13 }
  0xdb   : > { %v1832_v17 = vpack.c.bf16 %v4083_v14, %v4083_v14 }
  0xdd   : > { %1961 = vst.msk [vmem:[%s4028_s8 + $0x14] sm:$0xf] %vm1955_vm3, %v1832_v17 }
  0xde   : > { %v1527_v21 = vpop.f32.mrf.mxu1 }
  0xe0   : > { %v1193_v23 = vpop.f32.mrf.mxu0 }
  0xe1   : > { %3546 = vmatmul.msk.bf16.gmra.mxu1 %vm969_vm2, %v3089_v18  ;;  %v4094_v24 = vadd.f32 %v1522_v1, %v1193_v23  ;;  %v3633_v18 = vld [vmem:[%s3945_s11 + $0xf4] sm:$0xf]  ;;  %v3632_v23 = vld [vmem:[%s3945_s11 + $0xe4] sm:$0xf0] }
  0xe3   : > { %v1833_v29 = vpack.c.bf16 %v4094_v24, %v4094_v24  ;;  %1232 = vmatmul.bf16.gmra.mxu0 %v3077_v22  ;;  %v3100_v22 = vld [vmem:[%s3945_s11 + $0xe0] sm:$0xf] }
  0xe4   : > { %1377 = vmatmul.bf16.gmra.mxu2 %v3309_v10  ;;  %v3101_v26 = vor.u32 %v3632_v23, %v3100_v22  ;;  %v3116_v22 = vld [vmem:[%s3945_s11 + $0x100] sm:$0xf]  ;;  %v3636_v23 = vld [vmem:[%s3945_s11 + $0x104] sm:$0xf0] }
  0xe5   : > { %1962 = vst.msk [vmem:[%s4028_s8 + $0x18] sm:$0xf] %vm1955_vm3, %v1833_v29  ;;  %v4162_v29 = vpop.f32.mrf.mxu2 }
  0xe6   : > { %v1529_v33 = vpop.f32.mrf.mxu1  ;;  %5887 = vst [vmem:[#allocation14_spill] sm:$0xff] %v4162_v29  ;;  %v3719_v29 = vld [vmem:[%s3945_s11 + $0x3a4] sm:$0xf] }
  0xe8   : > { %v1195_v34 = vpop.f32.mrf.mxu0 }
  0xe9   : > { %v4105_v35 = vadd.f32 %v1524_v12, %v1195_v34  ;;  %v3313_v12 = vor.u32 %v3683_v8, %v3310_v11 }
  0xeb   : > { %v1834_v39 = vpack.c.bf16 %v4105_v35, %v4105_v35  ;;  %3574 = vmatmul.msk.bf16.gmra.mxu3 %vm969_vm2, %v3313_v12 }
  0xed   : > { %1963 = vst.msk [vmem:[%s4028_s8 + $0x1c] sm:$0xf] %vm1955_vm3, %v1834_v39  ;;  %v1343_v42 = vpop.f32.mrf.mxu2 }
  0xee   : > { %v1532_v43 = vpop.f32.mrf.mxu1  ;;  %v4185_v54 = vadd.f32 %v1672_v47, %v1343_v42 }
  0xf0   : > { %v1198_v45 = vpop.f32.mrf.mxu0  ;;  %5888 = vst [vmem:[#allocation15_spill] sm:$0xff] %v4185_v54 }
  0xf1   : > { %3547 = vmatmul.msk.bf16.gmra.mxu1 %vm969_vm2, %v3097_v40  ;;  %v4116_v46 = vadd.f32 %v1527_v21, %v1198_v45  ;;  %v3113_v21 = vor.u32 %v3633_v18, %v3110_v19  ;;  %v3118_v45 = vld [vmem:[%s3945_s11 + $0x108] sm:$0xf0]  ;;  %v3126_v18 = vld [vmem:[%s3945_s11 + $0x118] sm:$0xf0] }
  0xf3   : > { %5882 = vst [vmem:[#allocation9_spill] sm:$0xff] %v4116_v46  ;;  %v1835_v51 = vpack.c.bf16 %v4116_v46, %v4116_v46  ;;  %1237 = vmatmul.bf16.gmra.mxu0 %v3085_v44  ;;  %v3635_v44 = vld [vmem:[%s3945_s11 + $0x104] sm:$0xf] }
  0xf4   : > { %1382 = vmatmul.bf16.gmra.mxu2 %v3317_v36  ;;  %v3121_v50 = vor.u32 %v3635_v44, %v3118_v45  ;;  %v3334_v45 = vld [vmem:[%s3945_s11 + $0x2b8] sm:$0xf0] }
  0xf5   : > { %1964 = vst.msk [vmem:[%s4028_s8 + $0x20] sm:$0xf] %vm1955_vm3, %v1835_v51  ;;  %v3108_v51 = vld [vmem:[%s3945_s11 + $0xf0] sm:$0xf]  ;;  %v1345_v60 = vpop.f32.mrf.mxu2 }
  0xf6   : > { %v1534_v55 = vpop.f32.mrf.mxu1 }
  0xf8   : > { %v1200_v56 = vpop.f32.mrf.mxu0 }
  0xf9   : > { %v4127_v57 = vadd.f32 %v1529_v33, %v1200_v56  ;;  %v3685_v33 = vld [vmem:[%s3945_s11 + $0x294] sm:$0xf]  ;;  %v1893_v56 = vpack.c.bf16 %v4185_v54, %v4185_v54 }
  0xfa   : > { %v3321_v39 = vor.u32 %v3685_v33, %v3318_v37 }
  0xfb   : > { %5883 = vst [vmem:[#allocation10_spill] sm:$0xff] %v4127_v57  ;;  %v1836_v61 = vpack.c.bf16 %v4127_v57, %v4127_v57 }
  0xfc   : > { %3575 = vmatmul.msk.bf16.gmra.mxu3 %vm969_vm2, %v3321_v39  ;;  %2022 = vst.msk [vmem:[%s4028_s8 + $0x108] sm:$0xf] %vm1955_vm3, %v1893_v56  ;;  %v3332_v39 = vld [vmem:[%s3945_s11 + $0x2b0] sm:$0xf]  ;;  %v3134_v56 = vld [vmem:[%s3945_s11 + $0x128] sm:$0xf0] }
  0xfd   : > { %1965 = vst.msk [vmem:[%s4028_s8 + $0x24] sm:$0xf] %vm1955_vm3, %v1836_v61  ;;  %v1348_v12 = vpop.f32.mrf.mxu2 }
  0xfe   : > { %v1537_v1 = vpop.f32.mrf.mxu1 }
 0x100   : > { %v1203_v3 = vpop.f32.mrf.mxu0 }
 0x101   : > { %3548 = vmatmul.msk.bf16.gmra.mxu1 %vm969_vm2, %v3105_v62  ;;  %v4138_v5 = vadd.f32 %v1532_v43, %v1203_v3  ;;  %v1674_v62 = vpop.f32.mrf.mxu3 }
 0x102   : > { %v4194_v63 = vadd.f32 %v1674_v62, %v1345_v60 }
 0x103   : > { %5884 = vst [vmem:[#allocation11_spill] sm:$0xff] %v4138_v5  ;;  %v1837_v9 = vpack.c.bf16 %v4138_v5, %v4138_v5  ;;  %1242 = vmatmul.bf16.gmra.mxu0 %v3093_v2  ;;  %v3687_v2 = vld [vmem:[%s3945_s11 + $0x2a4] sm:$0xf] }
 0x104   : > { %5889 = vst [vmem:[#allocation16_spill] sm:$0xff] %v4194_v63  ;;  %v1894_v8 = vpack.c.bf16 %v4194_v63, %v4194_v63 }
 0x105   : > { %1966 = vst.msk [vmem:[%s4028_s8 + $0x28] sm:$0xf] %vm1955_vm3, %v1837_v9  ;;  %v3329_v9 = vor.u32 %v3687_v2, %v3326_v7  ;;  %v1350_v33 = vpop.f32.mrf.mxu2 }
 0x106   : > { %v1539_v13 = vpop.f32.mrf.mxu1  ;;  %2023 = vst.msk [vmem:[%s4028_s8 + $0x10c] sm:$0xf] %vm1955_vm3, %v1894_v8 }
 0x108   : > { %v1205_v15 = vpop.f32.mrf.mxu0 }
 0x109   : > { %v4151_v17 = vadd.f32 %v1534_v55, %v1205_v15  ;;  %v3109_v55 = vor.u32 %v3634_v52, %v3108_v51  ;;  %v3637_v15 = vld [vmem:[%s3945_s11 + $0x114] sm:$0xf]  ;;  %v1677_v19 = vpop.f32.mrf.mxu3 }
 0x10b   : > { %5886 = vst [vmem:[#allocation13_spill] sm:$0xff] %v4151_v17  ;;  %v1838_v20 = vpack.c.bf16 %v4151_v17, %v4151_v17 }
 0x10c   : > { %3576 = vmatmul.msk.bf16.gmra.mxu3 %vm969_vm2, %v3329_v9 }
 0x10d   : > { %1967 = vst.msk [vmem:[%s4028_s8 + $0x2c] sm:$0xf] %vm1955_vm3, %v1838_v20  ;;  %v1353_v52 = vpop.f32.mrf.mxu2 }
 0x10e   : > { %v1542_v25 = vpop.f32.mrf.mxu1 }
 0x110   : > { %v1208_v27 = vpop.f32.mrf.mxu0 }
 0x111   : > { %3549 = vmatmul.msk.bf16.gmra.mxu1 %vm969_vm2, %v3113_v21  ;;  %v4164_v30 = vadd.f32 %v1537_v1, %v1208_v27  ;;  %v3688_v1 = vld [vmem:[%s3945_s11 + $0x2a4] sm:$0xf0]  ;;  %v3129_v21 = vor.u32 %v3637_v15, %v3126_v18  ;;  %v3117_v27 = vor.u32 %v3636_v23, %v3116_v22  ;;  %v1679_v36 = vpop.f32.mrf.mxu3  ;;  %v3340_v15 = vld [vmem:[%s3945_s11 + $0x2c0] sm:$0xf]  ;;  %v3342_v22 = vld [vmem:[%s3945_s11 + $0x2c8] sm:$0xf0] }
 0x112   : > { %v3325_v6 = vor.u32 %v3688_v1, %v3324_v0  ;;  %v4228_v37 = vadd.f32 %v1679_v36, %v1350_v33  ;;  %v3124_v0 = vld [vmem:[%s3945_s11 + $0x110] sm:$0xf]  ;;  %v3638_v1 = vld [vmem:[%s3945_s11 + $0x114] sm:$0xf0]  ;;  %v3692_v18 = vld [vmem:[%s3945_s11 + $0x2c4] sm:$0xf0] }
 0x113   : > { %v1839_v34 = vpack.c.bf16 %v4164_v30, %v4164_v30  ;;  %1247 = vmatmul.bf16.gmra.mxu0 %v3101_v26  ;;  %v4219_v26 = vadd.f32 %v1677_v19, %v1348_v12  ;;  %v3691_v19 = vld [vmem:[%s3945_s11 + $0x2c4] sm:$0xf]  ;;  %v3641_v36 = vld [vmem:[%s3945_s11 + $0x134] sm:$0xf] }
 0x114   : > { %1387 = vmatmul.bf16.gmra.mxu2 %v3325_v6  ;;  %5892 = vst [vmem:[#allocation19_spill] sm:$0xff] %v4228_v37  ;;  %v1896_v47 = vpack.c.bf16 %v4228_v37, %v4228_v37  ;;  %v3125_v6 = vor.u32 %v3638_v1, %v3124_v0  ;;  %v3694_v0 = vld [vmem:[%s3945_s11 + $0x2d4] sm:$0xf0]  ;;  %v3693_v1 = vld [vmem:[%s3945_s11 + $0x2d4] sm:$0xf] }
 0x115   : > { %1968 = vst.msk [vmem:[%s4028_s8 + $0x30] sm:$0xf] %vm1955_vm3, %v1839_v34  ;;  %v1895_v31 = vpack.c.bf16 %v4219_v26, %v4219_v26  ;;  %v1355_v9 = vpop.f32.mrf.mxu2 }
 0x116   : > { %v1544_v40 = vpop.f32.mrf.mxu1  ;;  %5890 = vst [vmem:[#allocation17_spill] sm:$0xff] %v4219_v26 }
 0x117   : > { %2024 = vst.msk [vmem:[%s4028_s8 + $0x110] sm:$0xf] %vm1955_vm3, %v1895_v31 }
 0x118   : > { %v1210_v41 = vpop.f32.mrf.mxu0  ;;  %2025 = vst.msk [vmem:[%s4028_s8 + $0x114] sm:$0xf] %vm1955_vm3, %v1896_v47 }
 0x119   : > { %v4175_v43 = vadd.f32 %v1539_v13, %v1210_v41  ;;  %v3689_v41 = vld [vmem:[%s3945_s11 + $0x2b4] sm:$0xf] }
 0x11b   : > { %v1840_v49 = vpack.c.bf16 %v4175_v43, %v4175_v43 }
 0x11d   : > { %1969 = vst.msk [vmem:[%s4028_s8 + $0x34] sm:$0xf] %vm1955_vm3, %v1840_v49  ;;  %v3337_v49 = vor.u32 %v3689_v41, %v3334_v45  ;;  %v3640_v45 = vld [vmem:[%s3945_s11 + $0x124] sm:$0xf0] }
 0x11e   : > { %v1547_v53 = vpop.f32.mrf.mxu1 }
 0x11f   : > { %3577 = vmatmul.msk.bf16.gmra.mxu3 %vm969_vm2, %v3337_v49 }
 0x120   : > { %v1213_v59 = vpop.f32.mrf.mxu0 }
 0x121   : > { %3550 = vmatmul.msk.bf16.gmra.mxu1 %vm969_vm2, %v3121_v50  ;;  %v4190_v61 = vadd.f32 %v1542_v25, %v1213_v59  ;;  %v1682_v59 = vpop.f32.mrf.mxu3 }
 0x123   : > { %v1841_v3 = vpack.c.bf16 %v4190_v61, %v4190_v61  ;;  %1252 = vmatmul.bf16.gmra.mxu0 %v3109_v55  ;;  %v3639_v55 = vld [vmem:[%s3945_s11 + $0x124] sm:$0xf] }
 0x124   : > { %v3137_v62 = vor.u32 %v3639_v55, %v3134_v56 }
 0x125   : > { %1970 = vst.msk [vmem:[%s4028_s8 + $0x38] sm:$0xf] %vm1955_vm3, %v1841_v3  ;;  %v4253_v3 = vadd.f32 %v1682_v59, %v1353_v52 }
 0x126   : > { %v1549_v10 = vpop.f32.mrf.mxu1 }
 0x127   : > { %5894 = vst [vmem:[#allocation21_spill] sm:$0xff] %v4253_v3  ;;  %v1897_v7 = vpack.c.bf16 %v4253_v3, %v4253_v3 }
 0x128   : > { %v1215_v11 = vpop.f32.mrf.mxu0 }
 0x129   : > { %v4209_v13 = vadd.f32 %v1544_v40, %v1215_v11  ;;  %v3690_v40 = vld [vmem:[%s3945_s11 + $0x2b4] sm:$0xf0]  ;;  %2026 = vst.msk [vmem:[%s4028_s8 + $0x118] sm:$0xf] %vm1955_vm3, %v1897_v7  ;;  %v1684_v11 = vpop.f32.mrf.mxu3 }
 0x12a   : > { %v3333_v44 = vor.u32 %v3690_v40, %v3332_v39  ;;  %v4262_v12 = vadd.f32 %v1684_v11, %v1355_v9  ;;  %v3142_v39 = vld [vmem:[%s3945_s11 + $0x138] sm:$0xf0] }
 0x12b   : > { %v1842_v20 = vpack.c.bf16 %v4209_v13, %v4209_v13 }
 0x12c   : > { %1392 = vmatmul.bf16.gmra.mxu2 %v3333_v44  ;;  %5896 = vst [vmem:[#allocation23_spill] sm:$0xff] %v4262_v12  ;;  %v1898_v23 = vpack.c.bf16 %v4262_v12, %v4262_v12  ;;  %v3132_v44 = vld [vmem:[%s3945_s11 + $0x120] sm:$0xf] }
 0x12d   : > { %1971 = vst.msk [vmem:[%s4028_s8 + $0x3c] sm:$0xf] %vm1955_vm3, %v1842_v20 }
 0x12e   : > { %v1552_v25 = vpop.f32.mrf.mxu1  ;;  %2027 = vst.msk [vmem:[%s4028_s8 + $0x11c] sm:$0xf] %vm1955_vm3, %v1898_v23 }
 0x130   : > { %v1218_v32 = vpop.f32.mrf.mxu0 }
 0x131   : > { %3551 = vmatmul.msk.bf16.gmra.mxu1 %vm969_vm2, %v3129_v21  ;;  %v4224_v34 = vadd.f32 %v1547_v53, %v1218_v32  ;;  %v3341_v21 = vor.u32 %v3692_v18, %v3340_v15  ;;  %v1358_v32 = vpop.f32.mrf.mxu2  ;;  %v1687_v40 = vpop.f32.mrf.mxu3 }
 0x132   : > { %v4287_v49 = vadd.f32 %v1687_v40, %v1358_v32  ;;  %v3642_v32 = vld [vmem:[%s3945_s11 + $0x134] sm:$0xf0] }
 0x133   : > { %5891 = vst [vmem:[#allocation18_spill] sm:$0xff] %v4224_v34  ;;  %v1843_v42 = vpack.c.bf16 %v4224_v34, %v4224_v34  ;;  %1257 = vmatmul.bf16.gmra.mxu0 %v3117_v27 }
 0x134   : > { %5898 = vst [vmem:[#allocation25_spill] sm:$0xff] %v4287_v49 }
 0x135   : > { %1972 = vst.msk [vmem:[%s4028_s8 + $0x40] sm:$0xf] %vm1955_vm3, %v1843_v42  ;;  %v3145_v42 = vor.u32 %v3641_v36, %v3142_v39 }
 0x136   : > { %v1554_v50 = vpop.f32.mrf.mxu1 }
 0x138   : > { %v1220_v51 = vpop.f32.mrf.mxu0 }
 0x139   : > { %v4243_v53 = vadd.f32 %v1549_v10, %v1220_v51  ;;  %v1899_v51 = vpack.c.bf16 %v4287_v49, %v4287_v49  ;;  %v1360_v55 = vpop.f32.mrf.mxu2  ;;  %v1689_v59 = vpop.f32.mrf.mxu3 }
 0x13b   : > { %5893 = vst [vmem:[#allocation20_spill] sm:$0xff] %v4243_v53  ;;  %v1844_v60 = vpack.c.bf16 %v4243_v53, %v4243_v53 }
 0x13c   : > { %1397 = vmatmul.bf16.gmra.mxu2 %v3341_v21  ;;  %2028 = vst.msk [vmem:[%s4028_s8 + $0x120] sm:$0xf] %vm1955_vm3, %v1899_v51  ;;  %v3150_v21 = vld [vmem:[%s3945_s11 + $0x148] sm:$0xf0]  ;;  %v3356_v51 = vld [vmem:[%s3945_s11 + $0x2e0] sm:$0xf] }
 0x13d   : > { %1973 = vst.msk [vmem:[%s4028_s8 + $0x44] sm:$0xf] %vm1955_vm3, %v1844_v60  ;;  %v4296_v60 = vadd.f32 %v1689_v59, %v1360_v55  ;;  %v3695_v55 = vld [vmem:[%s3945_s11 + $0x2e4] sm:$0xf] }
 0x13e   : > { %v1557_v2 = vpop.f32.mrf.mxu1 }
 0x13f   : > { %5899 = vst [vmem:[#allocation26_spill] sm:$0xff] %v4296_v60 }
 0x140   : > { %v1223_v8 = vpop.f32.mrf.mxu0 }
 0x141   : > { %3552 = vmatmul.msk.bf16.gmra.mxu1 %vm969_vm2, %v3137_v62  ;;  %v4258_v10 = vadd.f32 %v1552_v25, %v1223_v8  ;;  %v3345_v25 = vor.u32 %v3691_v19, %v3342_v22  ;;  %v3348_v62 = vld [vmem:[%s3945_s11 + $0x2d0] sm:$0xf]  ;;  %v3350_v8 = vld [vmem:[%s3945_s11 + $0x2d8] sm:$0xf0]  ;;  %v1363_v18 = vpop.f32.mrf.mxu2  ;;  %v1692_v22 = vpop.f32.mrf.mxu3 }
 0x142   : > { %v3349_v7 = vor.u32 %v3694_v0, %v3348_v62  ;;  %v3353_v9 = vor.u32 %v3693_v1, %v3350_v8  ;;  %v4321_v39 = vadd.f32 %v1692_v22, %v1363_v18  ;;  %v3358_v0 = vld [vmem:[%s3945_s11 + $0x2e8] sm:$0xf0]  ;;  %v3148_v22 = vld [vmem:[%s3945_s11 + $0x140] sm:$0xf] }
 0x143   : > { %5895 = vst [vmem:[#allocation22_spill] sm:$0xff] %v4258_v10  ;;  %v1845_v20 = vpack.c.bf16 %v4258_v10, %v4258_v10  ;;  %1262 = vmatmul.bf16.gmra.mxu0 %v3125_v6  ;;  %3578 = vmatmul.msk.bf16.gmra.mxu3 %vm969_vm2, %v3345_v25  ;;  %v3361_v1 = vor.u32 %v3695_v55, %v3358_v0  ;;  %v3697_v55 = vld [vmem:[%s3945_s11 + $0x2f4] sm:$0xf]  ;;  %v3366_v0 = vld [vmem:[%s3945_s11 + $0x2f8] sm:$0xf0] }
 0x144   : > { %5900 = vst [vmem:[#allocation27_spill] sm:$0xff] %v4321_v39  ;;  %v1901_v40 = vpack.c.bf16 %v4321_v39, %v4321_v39 }
 0x145   : > { %1974 = vst.msk [vmem:[%s4028_s8 + $0x48] sm:$0xf] %vm1955_vm3, %v1845_v20  ;;  %v3643_v20 = vld [vmem:[%s3945_s11 + $0x144] sm:$0xf] }
 0x146   : > { %v1559_v27 = vpop.f32.mrf.mxu1  ;;  %v3153_v25 = vor.u32 %v3643_v20, %v3150_v21  ;;  %2030 = vst.msk [vmem:[%s4028_s8 + $0x128] sm:$0xf] %vm1955_vm3, %v1901_v40 }
 0x148   : > { %v1225_v31 = vpop.f32.mrf.mxu0 }
 0x149   : > { %v4277_v33 = vadd.f32 %v1554_v50, %v1225_v31  ;;  %v3133_v50 = vor.u32 %v3640_v45, %v3132_v44  ;;  %v3140_v31 = vld [vmem:[%s3945_s11 + $0x130] sm:$0xf]  ;;  %v1694_v45 = vpop.f32.mrf.mxu3 }
 0x14b   : > { %5897 = vst [vmem:[#allocation24_spill] sm:$0xff] %v4277_v33  ;;  %v1846_v41 = vpack.c.bf16 %v4277_v33, %v4277_v33 }
 0x14c   : > { %1402 = vmatmul.bf16.gmra.mxu2 %v3349_v7 }
 0x14d   : > { %1975 = vst.msk [vmem:[%s4028_s8 + $0x4c] sm:$0xf] %vm1955_vm3, %v1846_v41 }
 0x14e   : > { %v1562_v47 = vpop.f32.mrf.mxu1 }
 0x150   : > { %v1228_v52 = vpop.f32.mrf.mxu0 }
 0x151   : > { %3553 = vmatmul.msk.bf16.gmra.mxu1 %vm969_vm2, %v3145_v42  ;;  %v4292_v56 = vadd.f32 %v1557_v2, %v1228_v52  ;;  %v1900_v2 = vpack.c.bf16 %v4296_v60, %v4296_v60  ;;  %v1365_v42 = vpop.f32.mrf.mxu2  ;;  %v3696_v52 = vld [vmem:[%s3945_s11 + $0x2e4] sm:$0xf0]  ;;  %v1697_v18 = vpop.f32.mrf.mxu3 }
 0x152   : > { %v3357_v62 = vor.u32 %v3696_v52, %v3356_v51  ;;  %v3364_v51 = vld [vmem:[%s3945_s11 + $0x2f0] sm:$0xf]  ;;  %v3698_v52 = vld [vmem:[%s3945_s11 + $0x2f4] sm:$0xf0] }
 0x153   : > { %v1847_v6 = vpack.c.bf16 %v4292_v56, %v4292_v56  ;;  %1267 = vmatmul.bf16.gmra.mxu0 %v3133_v50  ;;  %2029 = vst.msk [vmem:[%s4028_s8 + $0x124] sm:$0xf] %vm1955_vm3, %v1900_v2  ;;  %3579 = vmatmul.msk.bf16.gmra.mxu3 %vm969_vm2, %v3353_v9  ;;  %v4330_v50 = vadd.f32 %v1694_v45, %v1365_v42  ;;  %v3645_v9 = vld [vmem:[%s3945_s11 + $0x154] sm:$0xf] }
 0x155   : > { %1976 = vst.msk [vmem:[%s4028_s8 + $0x50] sm:$0xf] %vm1955_vm3, %v1847_v6 }
 0x156   : > { %v1564_v11 = vpop.f32.mrf.mxu1  ;;  %5901 = vst [vmem:[#allocation28_spill] sm:$0xff] %v4330_v50 }
 0x158   : > { %v1230_v15 = vpop.f32.mrf.mxu0 }
 0x159   : > { %v4311_v19 = vadd.f32 %v1559_v27, %v1230_v15  ;;  %v3141_v27 = vor.u32 %v3642_v32, %v3140_v31  ;;  %v1368_v8 = vpop.f32.mrf.mxu2  ;;  %v3158_v15 = vld [vmem:[%s3945_s11 + $0x158] sm:$0xf0]  ;;  %v1699_v42 = vpop.f32.mrf.mxu3 }
 0x15a   : > { %v3161_v21 = vor.u32 %v3645_v9, %v3158_v15  ;;  %v4355_v31 = vadd.f32 %v1697_v18, %v1368_v8  ;;  %v3647_v15 = vld [vmem:[%s3945_s11 + $0x164] sm:$0xf]  ;;  %v3166_v18 = vld [vmem:[%s3945_s11 + $0x168] sm:$0xf0] }
 0x15b   : > { %v1848_v23 = vpack.c.bf16 %v4311_v19, %v4311_v19 }
 0x15c   : > { %1407 = vmatmul.bf16.gmra.mxu2 %v3357_v62  ;;  %5902 = vst [vmem:[#allocation29_spill] sm:$0xff] %v4355_v31  ;;  %v1903_v32 = vpack.c.bf16 %v4355_v31, %v4355_v31  ;;  %v3365_v62 = vor.u32 %v3698_v52, %v3364_v51 }
 0x15d   : > { %1977 = vst.msk [vmem:[%s4028_s8 + $0x54] sm:$0xf] %vm1955_vm3, %v1848_v23  ;;  %v3644_v23 = vld [vmem:[%s3945_s11 + $0x144] sm:$0xf0] }
 0x15e   : > { %v1567_v36 = vpop.f32.mrf.mxu1  ;;  %2032 = vst.msk [vmem:[%s4028_s8 + $0x130] sm:$0xf] %vm1955_vm3, %v1903_v32 }
 0x160   : > { %v1233_v41 = vpop.f32.mrf.mxu0 }
 0x161   : > { %3554 = vmatmul.msk.bf16.gmra.mxu1 %vm969_vm2, %v3153_v25  ;;  %v4326_v44 = vadd.f32 %v1562_v47, %v1233_v41  ;;  %v1902_v47 = vpack.c.bf16 %v4330_v50, %v4330_v50  ;;  %v1370_v40 = vpop.f32.mrf.mxu2 }
 0x162   : > { %v4364_v45 = vadd.f32 %v1699_v42, %v1370_v40 }
 0x163   : > { %v1849_v59 = vpack.c.bf16 %v4326_v44, %v4326_v44  ;;  %1272 = vmatmul.bf16.gmra.mxu0 %v3141_v27  ;;  %2031 = vst.msk [vmem:[%s4028_s8 + $0x12c] sm:$0xf] %vm1955_vm3, %v1902_v47  ;;  %3580 = vmatmul.msk.bf16.gmra.mxu3 %vm969_vm2, %v3361_v1  ;;  %v3369_v47 = vor.u32 %v3697_v55, %v3366_v0  ;;  %v3700_v0 = vld [vmem:[%s3945_s11 + $0x304] sm:$0xf0] }
 0x164   : > { %5904 = vst [vmem:[#allocation31_spill] sm:$0xff] %v4364_v45 }
 0x165   : > { %1978 = vst.msk [vmem:[%s4028_s8 + $0x58] sm:$0xf] %vm1955_vm3, %v1849_v59 }
 0x166   : > { %v1569_v6 = vpop.f32.mrf.mxu1 }
 0x168   : > { %v1235_v7 = vpop.f32.mrf.mxu0 }
 0x169   : > { %v4345_v2 = vadd.f32 %v1564_v11, %v1235_v7  ;;  %v3149_v11 = vor.u32 %v3644_v23, %v3148_v22  ;;  %v1373_v8 = vpop.f32.mrf.mxu2  ;;  %v3169_v22 = vor.u32 %v3647_v15, %v3166_v18  ;;  %v3156_v23 = vld [vmem:[%s3945_s11 + $0x150] sm:$0xf] }
 0x16b   : > { %v1850_v20 = vpack.c.bf16 %v4345_v2, %v4345_v2 }
 0x16c   : > { %1412 = vmatmul.bf16.gmra.mxu2 %v3365_v62  ;;  %v3372_v62 = vld [vmem:[%s3945_s11 + $0x300] sm:$0xf] }
 0x16d   : > { %1979 = vst.msk [vmem:[%s4028_s8 + $0x5c] sm:$0xf] %vm1955_vm3, %v1850_v20  ;;  %v1702_v20 = vpop.f32.mrf.mxu3 }
 0x16e   : > { %v1572_v25 = vpop.f32.mrf.mxu1 }
 0x170   : > { %v1238_v27 = vpop.f32.mrf.mxu0 }
 0x171   : > { %3555 = vmatmul.msk.bf16.gmra.mxu1 %vm969_vm2, %v3161_v21  ;;  %v4360_v41 = vadd.f32 %v1567_v36, %v1238_v27  ;;  %v1904_v36 = vpack.c.bf16 %v4364_v45, %v4364_v45  ;;  %v4389_v27 = vadd.f32 %v1702_v20, %v1373_v8  ;;  %v1375_v51 = vpop.f32.mrf.mxu2  ;;  %v3374_v8 = vld [vmem:[%s3945_s11 + $0x308] sm:$0xf0] }
 0x173   : > { %5903 = vst [vmem:[#allocation30_spill] sm:$0xff] %v4360_v41  ;;  %v1851_v59 = vpack.c.bf16 %v4360_v41, %v4360_v41  ;;  %1277 = vmatmul.bf16.gmra.mxu0 %v3149_v11  ;;  %3581 = vmatmul.msk.bf16.gmra.mxu3 %vm969_vm2, %v3369_v47  ;;  %v3646_v11 = vld [vmem:[%s3945_s11 + $0x154] sm:$0xf0]  ;;  %v1905_v40 = vpack.c.bf16 %v4389_v27, %v4389_v27 }
 0x174   : > { %2033 = vst.msk [vmem:[%s4028_s8 + $0x134] sm:$0xf] %vm1955_vm3, %v1904_v36  ;;  %v3699_v36 = vld [vmem:[%s3945_s11 + $0x304] sm:$0xf] }
 0x175   : > { %1980 = vst.msk [vmem:[%s4028_s8 + $0x60] sm:$0xf] %vm1955_vm3, %v1851_v59  ;;  %v1704_v55 = vpop.f32.mrf.mxu3  ;;  %v3377_v15 = vor.u32 %v3699_v36, %v3374_v8 }
 0x176   : > { %v1574_v1 = vpop.f32.mrf.mxu1  ;;  %5906 = vst [vmem:[#allocation33_spill] sm:$0xff] %v4389_v27  ;;  %v4398_v59 = vadd.f32 %v1704_v55, %v1375_v51  ;;  %v3164_v51 = vld [vmem:[%s3945_s11 + $0x160] sm:$0xf]  ;;  %v3648_v55 = vld [vmem:[%s3945_s11 + $0x164] sm:$0xf0] }
 0x177   : > { %2034 = vst.msk [vmem:[%s4028_s8 + $0x138] sm:$0xf] %vm1955_vm3, %v1905_v40 }
 0x178   : > { %v1240_v7 = vpop.f32.mrf.mxu0  ;;  %5908 = vst [vmem:[#allocation35_spill] sm:$0xff] %v4398_v59 }
 0x179   : > { %v4379_v9 = vadd.f32 %v1569_v6, %v1240_v7  ;;  %v3157_v6 = vor.u32 %v3646_v11, %v3156_v23  ;;  %v3373_v7 = vor.u32 %v3700_v0, %v3372_v62  ;;  %v3649_v23 = vld [vmem:[%s3945_s11 + $0x174] sm:$0xf]  ;;  %v3174_v11 = vld [vmem:[%s3945_s11 + $0x178] sm:$0xf0] }
 0x17b   : > { %5905 = vst [vmem:[#allocation32_spill] sm:$0xff] %v4379_v9  ;;  %v1852_v21 = vpack.c.bf16 %v4379_v9, %v4379_v9 }
 0x17c   : > { %1417 = vmatmul.bf16.gmra.mxu2 %v3373_v7 }
 0x17d   : > { %1981 = vst.msk [vmem:[%s4028_s8 + $0x64] sm:$0xf] %vm1955_vm3, %v1852_v21  ;;  %v1378_v21 = vpop.f32.mrf.mxu2 }
 0x17e   : > { %v1577_v32 = vpop.f32.mrf.mxu1 }
 0x180   : > { %v1243_v42 = vpop.f32.mrf.mxu0 }
 0x181   : > { %3556 = vmatmul.msk.bf16.gmra.mxu1 %vm969_vm2, %v3169_v22  ;;  %v4394_v52 = vadd.f32 %v1572_v25, %v1243_v42  ;;  %v1906_v25 = vpack.c.bf16 %v4398_v59, %v4398_v59  ;;  %v3177_v42 = vor.u32 %v3649_v23, %v3174_v11  ;;  %v3701_v23 = vld [vmem:[%s3945_s11 + $0x314] sm:$0xf] }
 0x183   : > { %5907 = vst [vmem:[#allocation34_spill] sm:$0xff] %v4394_v52  ;;  %v1853_v47 = vpack.c.bf16 %v4394_v52, %v4394_v52  ;;  %1282 = vmatmul.bf16.gmra.mxu0 %v3157_v6  ;;  %3582 = vmatmul.msk.bf16.gmra.mxu3 %vm969_vm2, %v3377_v15  ;;  %v1707_v6 = vpop.f32.mrf.mxu3 }
 0x184   : > { %2035 = vst.msk [vmem:[%s4028_s8 + $0x13c] sm:$0xf] %vm1955_vm3, %v1906_v25  ;;  %v4423_v0 = vadd.f32 %v1707_v6, %v1378_v21  ;;  %v3702_v21 = vld [vmem:[%s3945_s11 + $0x314] sm:$0xf0] }
 0x185   : > { %1982 = vst.msk [vmem:[%s4028_s8 + $0x68] sm:$0xf] %vm1955_vm3, %v1853_v47  ;;  %v1380_v7 = vpop.f32.mrf.mxu2 }
 0x186   : > { %v1579_v18 = vpop.f32.mrf.mxu1  ;;  %5910 = vst [vmem:[#allocation37_spill] sm:$0xff] %v4423_v0  ;;  %v1907_v36 = vpack.c.bf16 %v4423_v0, %v4423_v0 }
 0x188   : > { %v1245_v20 = vpop.f32.mrf.mxu0  ;;  %2036 = vst.msk [vmem:[%s4028_s8 + $0x140] sm:$0xf] %vm1955_vm3, %v1907_v36 }
 0x189   : > { %v4413_v22 = vadd.f32 %v1574_v1, %v1245_v20  ;;  %v3165_v1 = vor.u32 %v3648_v55, %v3164_v51  ;;  %v3380_v20 = vld [vmem:[%s3945_s11 + $0x310] sm:$0xf] }
 0x18a   : > { %v3381_v6 = vor.u32 %v3702_v21, %v3380_v20 }
 0x18b   : > { %5909 = vst [vmem:[#allocation36_spill] sm:$0xff] %v4413_v22  ;;  %v1854_v40 = vpack.c.bf16 %v4413_v22, %v4413_v22  ;;  %v1709_v25 = vpop.f32.mrf.mxu3 }
 0x18c   : > { %v4432_v15 = vadd.f32 %v1709_v25, %v1380_v7  ;;  %1422 = vmatmul.bf16.gmra.mxu2 %v3381_v6  ;;  %v3182_v7 = vld [vmem:[%s3945_s11 + $0x188] sm:$0xf0] }
 0x18d   : > { %1983 = vst.msk [vmem:[%s4028_s8 + $0x6c] sm:$0xf] %vm1955_vm3, %v1854_v40  ;;  %v3382_v40 = vld [vmem:[%s3945_s11 + $0x318] sm:$0xf0]  ;;  %v1383_v36 = vpop.f32.mrf.mxu2 }
 0x18e   : > { %v1582_v62 = vpop.f32.mrf.mxu1  ;;  %5911 = vst [vmem:[#allocation38_spill] sm:$0xff] %v4432_v15 }
 0x190   : > { %v1248_v47 = vpop.f32.mrf.mxu0 }
 0x191   : > { %3557 = vmatmul.msk.bf16.gmra.mxu1 %vm969_vm2, %v3177_v42  ;;  %v4428_v8 = vadd.f32 %v1577_v32, %v1248_v47  ;;  %v1908_v32 = vpack.c.bf16 %v4432_v15, %v4432_v15  ;;  %v3385_v42 = vor.u32 %v3701_v23, %v3382_v40  ;;  %v3651_v47 = vld [vmem:[%s3945_s11 + $0x184] sm:$0xf]  ;;  %v3172_v23 = vld [vmem:[%s3945_s11 + $0x170] sm:$0xf] }
 0x192   : > { %v3185_v21 = vor.u32 %v3651_v47, %v3182_v7 }
 0x193   : > { %v1855_v11 = vpack.c.bf16 %v4428_v8, %v4428_v8  ;;  %1287 = vmatmul.bf16.gmra.mxu0 %v3165_v1  ;;  %2037 = vst.msk [vmem:[%s4028_s8 + $0x144] sm:$0xf] %vm1955_vm3, %v1908_v32  ;;  %3583 = vmatmul.msk.bf16.gmra.mxu3 %vm969_vm2, %v3385_v42  ;;  %v1712_v25 = vpop.f32.mrf.mxu3 }
 0x194   : > { %v4457_v40 = vadd.f32 %v1712_v25, %v1383_v36  ;;  %v3388_v36 = vld [vmem:[%s3945_s11 + $0x320] sm:$0xf]  ;;  %v3704_v25 = vld [vmem:[%s3945_s11 + $0x324] sm:$0xf0] }
 0x195   : > { %1984 = vst.msk [vmem:[%s4028_s8 + $0x70] sm:$0xf] %vm1955_vm3, %v1855_v11  ;;  %v3650_v11 = vld [vmem:[%s3945_s11 + $0x174] sm:$0xf0] }
 0x196   : > { %v1584_v51 = vpop.f32.mrf.mxu1  ;;  %5912 = vst [vmem:[#allocation39_spill] sm:$0xff] %v4457_v40  ;;  %v1909_v32 = vpack.c.bf16 %v4457_v40, %v4457_v40  ;;  %v3390_v40 = vld [vmem:[%s3945_s11 + $0x328] sm:$0xf0] }
 0x198   : > { %v1250_v55 = vpop.f32.mrf.mxu0  ;;  %2038 = vst.msk [vmem:[%s4028_s8 + $0x148] sm:$0xf] %vm1955_vm3, %v1909_v32 }
 0x199   : > { %v4447_v1 = vadd.f32 %v1579_v18, %v1250_v55  ;;  %v3173_v18 = vor.u32 %v3650_v11, %v3172_v23  ;;  %v1385_v55 = vpop.f32.mrf.mxu2  ;;  %v3703_v23 = vld [vmem:[%s3945_s11 + $0x324] sm:$0xf] }
 0x19a   : > { %v3393_v32 = vor.u32 %v3703_v23, %v3390_v40 }
 0x19b   : > { %v1856_v20 = vpack.c.bf16 %v4447_v1, %v4447_v1  ;;  %v1714_v7 = vpop.f32.mrf.mxu3 }
 0x19d   : > { %1985 = vst.msk [vmem:[%s4028_s8 + $0x74] sm:$0xf] %vm1955_vm3, %v1856_v20  ;;  %v4466_v20 = vadd.f32 %v1714_v7, %v1385_v55 }
 0x19e   : > { %v1587_v6 = vpop.f32.mrf.mxu1 }
 0x19f   : > { %5913 = vst [vmem:[#allocation40_spill] sm:$0xff] %v4466_v20 }
 0x1a0   : > { %v1253_v42 = vpop.f32.mrf.mxu0 }
 0x1a1   : > { %3558 = vmatmul.msk.bf16.gmra.mxu1 %vm969_vm2, %v3185_v21  ;;  %v4462_v47 = vadd.f32 %v1582_v62, %v1253_v42  ;;  %v3389_v21 = vor.u32 %v3704_v25, %v3388_v36  ;;  %v1910_v62 = vpack.c.bf16 %v4466_v20, %v4466_v20  ;;  %v1388_v7 = vpop.f32.mrf.mxu2  ;;  %v3653_v36 = vld [vmem:[%s3945_s11 + $0x194] sm:$0xf]  ;;  %v3190_v25 = vld [vmem:[%s3945_s11 + $0x198] sm:$0xf0] }
 0x1a2   : > { %v3193_v23 = vor.u32 %v3653_v36, %v3190_v25 }
 0x1a3   : > { %v1857_v11 = vpack.c.bf16 %v4462_v47, %v4462_v47  ;;  %1292 = vmatmul.bf16.gmra.mxu0 %v3173_v18  ;;  %1427 = vmatmul.bf16.gmra.mxu2 %v3389_v21  ;;  %2039 = vst.msk [vmem:[%s4028_s8 + $0x14c] sm:$0xf] %vm1955_vm3, %v1910_v62  ;;  %v1717_v15 = vpop.f32.mrf.mxu3  ;;  %v3652_v21 = vld [vmem:[%s3945_s11 + $0x184] sm:$0xf0] }
 0x1a4   : > { %3584 = vmatmul.msk.bf16.gmra.mxu3 %vm969_vm2, %v3393_v32  ;;  %v4491_v32 = vadd.f32 %v1717_v15, %v1388_v7  ;;  %v3396_v15 = vld [vmem:[%s3945_s11 + $0x330] sm:$0xf]  ;;  %v3706_v7 = vld [vmem:[%s3945_s11 + $0x334] sm:$0xf0] }
 0x1a5   : > { %1986 = vst.msk [vmem:[%s4028_s8 + $0x78] sm:$0xf] %vm1955_vm3, %v1857_v11  ;;  %v3180_v11 = vld [vmem:[%s3945_s11 + $0x180] sm:$0xf] }
 0x1a6   : > { %v1589_v42 = vpop.f32.mrf.mxu1  ;;  %5914 = vst [vmem:[#allocation41_spill] sm:$0xff] %v4491_v32 }
 0x1a8   : > { %v1255_v55 = vpop.f32.mrf.mxu0 }
 0x1a9   : > { %v4481_v18 = vadd.f32 %v1584_v51, %v1255_v55  ;;  %v3181_v51 = vor.u32 %v3652_v21, %v3180_v11  ;;  %v1911_v55 = vpack.c.bf16 %v4491_v32, %v4491_v32  ;;  %v1390_v0 = vpop.f32.mrf.mxu2  ;;  %v3705_v11 = vld [vmem:[%s3945_s11 + $0x334] sm:$0xf]  ;;  %v3398_v32 = vld [vmem:[%s3945_s11 + $0x338] sm:$0xf0] }
 0x1ab   : > { %v1858_v40 = vpack.c.bf16 %v4481_v18, %v4481_v18  ;;  %2040 = vst.msk [vmem:[%s4028_s8 + $0x150] sm:$0xf] %vm1955_vm3, %v1911_v55  ;;  %v1719_v25 = vpop.f32.mrf.mxu3 }
 0x1ad   : > { %1987 = vst.msk [vmem:[%s4028_s8 + $0x7c] sm:$0xf] %vm1955_vm3, %v1858_v40  ;;  %v4500_v40 = vadd.f32 %v1719_v25, %v1390_v0 }
 0x1ae   : > { %v1592_v62 = vpop.f32.mrf.mxu1 }
 0x1af   : > { %5916 = vst [vmem:[#allocation43_spill] sm:$0xff] %v4500_v40 }
 0x1b0   : > { %v1258_v20 = vpop.f32.mrf.mxu0 }
 0x1b1   : > { %3559 = vmatmul.msk.bf16.gmra.mxu1 %vm969_vm2, %v3193_v23  ;;  %v4496_v36 = vadd.f32 %v1587_v6, %v1258_v20  ;;  %v3397_v23 = vor.u32 %v3706_v7, %v3396_v15  ;;  %v1912_v6 = vpack.c.bf16 %v4500_v40, %v4500_v40  ;;  %v3401_v20 = vor.u32 %v3705_v11, %v3398_v32  ;;  %v1393_v25 = vpop.f32.mrf.mxu2  ;;  %v3655_v15 = vld [vmem:[%s3945_s11 + $0x1a4] sm:$0xf]  ;;  %v3198_v7 = vld [vmem:[%s3945_s11 + $0x1a8] sm:$0xf0] }
 0x1b2   : > { %v3201_v11 = vor.u32 %v3655_v15, %v3198_v7 }
 0x1b3   : > { %5915 = vst [vmem:[#allocation42_spill] sm:$0xff] %v4496_v36  ;;  %v1859_v21 = vpack.c.bf16 %v4496_v36, %v4496_v36  ;;  %1297 = vmatmul.bf16.gmra.mxu0 %v3181_v51  ;;  %1432 = vmatmul.bf16.gmra.mxu2 %v3397_v23  ;;  %v1722_v59 = vpop.f32.mrf.mxu3  ;;  %v3654_v23 = vld [vmem:[%s3945_s11 + $0x194] sm:$0xf0] }
 0x1b4   : > { %2041 = vst.msk [vmem:[%s4028_s8 + $0x154] sm:$0xf] %vm1955_vm3, %v1912_v6  ;;  %3585 = vmatmul.msk.bf16.gmra.mxu3 %vm969_vm2, %v3401_v20  ;;  %v4525_v20 = vadd.f32 %v1722_v59, %v1393_v25  ;;  %v3404_v59 = vld [vmem:[%s3945_s11 + $0x340] sm:$0xf]  ;;  %v3708_v25 = vld [vmem:[%s3945_s11 + $0x344] sm:$0xf0] }
 0x1b5   : > { %1988 = vst.msk [vmem:[%s4028_s8 + $0x80] sm:$0xf] %vm1955_vm3, %v1859_v21  ;;  %v3188_v21 = vld [vmem:[%s3945_s11 + $0x190] sm:$0xf] }
 0x1b6   : > { %v1594_v0 = vpop.f32.mrf.mxu1  ;;  %5918 = vst [vmem:[#allocation45_spill] sm:$0xff] %v4525_v20 }
 0x1b8   : > { %v1260_v55 = vpop.f32.mrf.mxu0 }
 0x1b9   : > { %v4515_v51 = vadd.f32 %v1589_v42, %v1260_v55  ;;  %v3189_v42 = vor.u32 %v3654_v23, %v3188_v21  ;;  %v1913_v55 = vpack.c.bf16 %v4525_v20, %v4525_v20  ;;  %v1395_v27 = vpop.f32.mrf.mxu2  ;;  %v3707_v21 = vld [vmem:[%s3945_s11 + $0x344] sm:$0xf]  ;;  %v3406_v20 = vld [vmem:[%s3945_s11 + $0x348] sm:$0xf0] }
 0x1bb   : > { %5917 = vst [vmem:[#allocation44_spill] sm:$0xff] %v4515_v51  ;;  %v1860_v32 = vpack.c.bf16 %v4515_v51, %v4515_v51  ;;  %v1724_v7 = vpop.f32.mrf.mxu3 }
 0x1bc   : > { %2042 = vst.msk [vmem:[%s4028_s8 + $0x158] sm:$0xf] %vm1955_vm3, %v1913_v55 }
 0x1bd   : > { %1989 = vst.msk [vmem:[%s4028_s8 + $0x84] sm:$0xf] %vm1955_vm3, %v1860_v32  ;;  %v4534_v32 = vadd.f32 %v1724_v7, %v1395_v27 }
 0x1be   : > { %v1597_v6 = vpop.f32.mrf.mxu1 }
 0x1bf   : > { %5920 = vst [vmem:[#allocation47_spill] sm:$0xff] %v4534_v32 }
 0x1c0   : > { %v1263_v40 = vpop.f32.mrf.mxu0 }
 0x1c1   : > { %3560 = vmatmul.msk.bf16.gmra.mxu1 %vm969_vm2, %v3201_v11  ;;  %v4530_v15 = vadd.f32 %v1592_v62, %v1263_v40  ;;  %v3405_v11 = vor.u32 %v3708_v25, %v3404_v59  ;;  %v1914_v62 = vpack.c.bf16 %v4534_v32, %v4534_v32  ;;  %v3409_v40 = vor.u32 %v3707_v21, %v3406_v20  ;;  %v1398_v7 = vpop.f32.mrf.mxu2  ;;  %v3657_v59 = vld [vmem:[%s3945_s11 + $0x1b4] sm:$0xf]  ;;  %v3206_v25 = vld [vmem:[%s3945_s11 + $0x1b8] sm:$0xf0] }
 0x1c2   : > { %v3209_v21 = vor.u32 %v3657_v59, %v3206_v25 }
 0x1c3   : > { %5919 = vst [vmem:[#allocation46_spill] sm:$0xff] %v4530_v15  ;;  %v1861_v23 = vpack.c.bf16 %v4530_v15, %v4530_v15  ;;  %1302 = vmatmul.bf16.gmra.mxu0 %v3189_v42  ;;  %1437 = vmatmul.bf16.gmra.mxu2 %v3405_v11  ;;  %v3656_v11 = vld [vmem:[%s3945_s11 + $0x1a4] sm:$0xf0] }
 0x1c4   : > { %2043 = vst.msk [vmem:[%s4028_s8 + $0x15c] sm:$0xf] %vm1955_vm3, %v1914_v62  ;;  %3586 = vmatmul.msk.bf16.gmra.mxu3 %vm969_vm2, %v3409_v40 }
 0x1c5   : > { %1990 = vst.msk [vmem:[%s4028_s8 + $0x88] sm:$0xf] %vm1955_vm3, %v1861_v23  ;;  %v3196_v23 = vld [vmem:[%s3945_s11 + $0x1a0] sm:$0xf] }
 0x1c6   : > { %v1599_v27 = vpop.f32.mrf.mxu1  ;;  %v1727_v45 = vpop.f32.mrf.mxu3 }
 0x1c7   : > { %v4559_v40 = vadd.f32 %v1727_v45, %v1398_v7  ;;  %v3412_v45 = vld [vmem:[%s3945_s11 + $0x350] sm:$0xf]  ;;  %v3710_v7 = vld [vmem:[%s3945_s11 + $0x354] sm:$0xf0] }
 0x1c8   : > { %v1265_v55 = vpop.f32.mrf.mxu0 }
 0x1c9   : > { %v4549_v42 = vadd.f32 %v1594_v0, %v1265_v55  ;;  %5922 = vst [vmem:[#allocation49_spill] sm:$0xff] %v4559_v40  ;;  %v3197_v0 = vor.u32 %v3656_v11, %v3196_v23  ;;  %v1915_v55 = vpack.c.bf16 %v4559_v40, %v4559_v40  ;;  %v1400_v31 = vpop.f32.mrf.mxu2  ;;  %v3709_v23 = vld [vmem:[%s3945_s11 + $0x354] sm:$0xf]  ;;  %v3414_v40 = vld [vmem:[%s3945_s11 + $0x358] sm:$0xf0] }
 0x1cb   : > { %5921 = vst [vmem:[#allocation48_spill] sm:$0xff] %v4549_v42  ;;  %v1862_v20 = vpack.c.bf16 %v4549_v42, %v4549_v42 }
 0x1cc   : > { %2044 = vst.msk [vmem:[%s4028_s8 + $0x160] sm:$0xf] %vm1955_vm3, %v1915_v55 }
 0x1cd   : > { %1991 = vst.msk [vmem:[%s4028_s8 + $0x8c] sm:$0xf] %vm1955_vm3, %v1862_v20 }
 0x1ce   : > { %v1602_v62 = vpop.f32.mrf.mxu1  ;;  %v1729_v25 = vpop.f32.mrf.mxu3 }
 0x1cf   : > { %v4568_v20 = vadd.f32 %v1729_v25, %v1400_v31 }
 0x1d0   : > { %v1268_v32 = vpop.f32.mrf.mxu0 }
 0x1d1   : > { %3561 = vmatmul.msk.bf16.gmra.mxu1 %vm969_vm2, %v3209_v21  ;;  %v4564_v59 = vadd.f32 %v1597_v6, %v1268_v32  ;;  %5923 = vst [vmem:[#allocation50_spill] sm:$0xff] %v4568_v20  ;;  %v3413_v21 = vor.u32 %v3710_v7, %v3412_v45  ;;  %v1916_v6 = vpack.c.bf16 %v4568_v20, %v4568_v20  ;;  %v1403_v25 = vpop.f32.mrf.mxu2  ;;  %v3659_v45 = vld [vmem:[%s3945_s11 + $0x1c4] sm:$0xf]  ;;  %v3214_v7 = vld [vmem:[%s3945_s11 + $0x1c8] sm:$0xf0] }
 0x1d2   : > { %v3417_v32 = vor.u32 %v3709_v23, %v3414_v40  ;;  %v3217_v23 = vor.u32 %v3659_v45, %v3214_v7 }
 0x1d3   : > { %v1863_v11 = vpack.c.bf16 %v4564_v59, %v4564_v59  ;;  %1307 = vmatmul.bf16.gmra.mxu0 %v3197_v0  ;;  %1442 = vmatmul.bf16.gmra.mxu2 %v3413_v21  ;;  %2045 = vst.msk [vmem:[%s4028_s8 + $0x164] sm:$0xf] %vm1955_vm3, %v1916_v6  ;;  %v3658_v21 = vld [vmem:[%s3945_s11 + $0x1b4] sm:$0xf0] }
 0x1d4   : > { %3587 = vmatmul.msk.bf16.gmra.mxu3 %vm969_vm2, %v3417_v32 }
 0x1d5   : > { %1992 = vst.msk [vmem:[%s4028_s8 + $0x90] sm:$0xf] %vm1955_vm3, %v1863_v11  ;;  %v3204_v11 = vld [vmem:[%s3945_s11 + $0x1b0] sm:$0xf] }
 0x1d6   : > { %v1604_v31 = vpop.f32.mrf.mxu1  ;;  %v1732_v50 = vpop.f32.mrf.mxu3 }
 0x1d7   : > { %v4593_v32 = vadd.f32 %v1732_v50, %v1403_v25  ;;  %v3420_v50 = vld [vmem:[%s3945_s11 + $0x360] sm:$0xf]  ;;  %v3712_v25 = vld [vmem:[%s3945_s11 + $0x364] sm:$0xf0] }
 0x1d8   : > { %v1270_v55 = vpop.f32.mrf.mxu0 }
 0x1d9   : > { %v4583_v0 = vadd.f32 %v1599_v27, %v1270_v55  ;;  %5924 = vst [vmem:[#allocation51_spill] sm:$0xff] %v4593_v32  ;;  %v3205_v27 = vor.u32 %v3658_v21, %v3204_v11  ;;  %v1917_v55 = vpack.c.bf16 %v4593_v32, %v4593_v32  ;;  %v1405_v39 = vpop.f32.mrf.mxu2  ;;  %v3711_v11 = vld [vmem:[%s3945_s11 + $0x364] sm:$0xf]  ;;  %v3422_v32 = vld [vmem:[%s3945_s11 + $0x368] sm:$0xf0] }
 0x1db   : > { %v1864_v40 = vpack.c.bf16 %v4583_v0, %v4583_v0  ;;  %2046 = vst.msk [vmem:[%s4028_s8 + $0x168] sm:$0xf] %vm1955_vm3, %v1917_v55 }
 0x1dd   : > { %1993 = vst.msk [vmem:[%s4028_s8 + $0x94] sm:$0xf] %vm1955_vm3, %v1864_v40 }
 0x1de   : > { %v1607_v6 = vpop.f32.mrf.mxu1  ;;  %v1734_v7 = vpop.f32.mrf.mxu3 }
 0x1df   : > { %v4602_v40 = vadd.f32 %v1734_v7, %v1405_v39 }
 0x1e0   : > { %v1273_v20 = vpop.f32.mrf.mxu0 }
 0x1e1   : > { %3562 = vmatmul.msk.bf16.gmra.mxu1 %vm969_vm2, %v3217_v23  ;;  %v4598_v45 = vadd.f32 %v1602_v62, %v1273_v20  ;;  %5925 = vst [vmem:[#allocation52_spill] sm:$0xff] %v4602_v40  ;;  %v3421_v23 = vor.u32 %v3712_v25, %v3420_v50  ;;  %v1918_v62 = vpack.c.bf16 %v4602_v40, %v4602_v40  ;;  %v1408_v7 = vpop.f32.mrf.mxu2  ;;  %v3661_v50 = vld [vmem:[%s3945_s11 + $0x1d4] sm:$0xf]  ;;  %v3222_v25 = vld [vmem:[%s3945_s11 + $0x1d8] sm:$0xf0] }
 0x1e2   : > { %v3425_v20 = vor.u32 %v3711_v11, %v3422_v32  ;;  %v3225_v11 = vor.u32 %v3661_v50, %v3222_v25 }
 0x1e3   : > { %v1865_v21 = vpack.c.bf16 %v4598_v45, %v4598_v45  ;;  %1312 = vmatmul.bf16.gmra.mxu0 %v3205_v27  ;;  %1447 = vmatmul.bf16.gmra.mxu2 %v3421_v23  ;;  %2047 = vst.msk [vmem:[%s4028_s8 + $0x16c] sm:$0xf] %vm1955_vm3, %v1918_v62  ;;  %v3660_v23 = vld [vmem:[%s3945_s11 + $0x1c4] sm:$0xf0] }
 0x1e4   : > { %3588 = vmatmul.msk.bf16.gmra.mxu3 %vm969_vm2, %v3425_v20 }
 0x1e5   : > { %1994 = vst.msk [vmem:[%s4028_s8 + $0x98] sm:$0xf] %vm1955_vm3, %v1865_v21  ;;  %v3212_v21 = vld [vmem:[%s3945_s11 + $0x1c0] sm:$0xf] }
 0x1e6   : > { %v1609_v39 = vpop.f32.mrf.mxu1  ;;  %v1737_v60 = vpop.f32.mrf.mxu3 }
 0x1e7   : > { %v4627_v20 = vadd.f32 %v1737_v60, %v1408_v7  ;;  %v3428_v60 = vld [vmem:[%s3945_s11 + $0x370] sm:$0xf]  ;;  %v3714_v7 = vld [vmem:[%s3945_s11 + $0x374] sm:$0xf0] }
 0x1e8   : > { %v1275_v55 = vpop.f32.mrf.mxu0 }
 0x1e9   : > { %v4617_v27 = vadd.f32 %v1604_v31, %v1275_v55  ;;  %5926 = vst [vmem:[#allocation53_spill] sm:$0xff] %v4627_v20  ;;  %v3213_v31 = vor.u32 %v3660_v23, %v3212_v21  ;;  %v1919_v55 = vpack.c.bf16 %v4627_v20, %v4627_v20  ;;  %v1410_v49 = vpop.f32.mrf.mxu2  ;;  %v3713_v21 = vld [vmem:[%s3945_s11 + $0x374] sm:$0xf]  ;;  %v3430_v20 = vld [vmem:[%s3945_s11 + $0x378] sm:$0xf0] }
 0x1eb   : > { %v1866_v32 = vpack.c.bf16 %v4617_v27, %v4617_v27  ;;  %2048 = vst.msk [vmem:[%s4028_s8 + $0x170] sm:$0xf] %vm1955_vm3, %v1919_v55 }
 0x1ed   : > { %1995 = vst.msk [vmem:[%s4028_s8 + $0x9c] sm:$0xf] %vm1955_vm3, %v1866_v32 }
 0x1ee   : > { %v1612_v62 = vpop.f32.mrf.mxu1  ;;  %v1739_v25 = vpop.f32.mrf.mxu3 }
 0x1ef   : > { %v4636_v32 = vadd.f32 %v1739_v25, %v1410_v49 }
 0x1f0   : > { %v1278_v40 = vpop.f32.mrf.mxu0 }
 0x1f1   : > { %3563 = vmatmul.msk.bf16.gmra.mxu1 %vm969_vm2, %v3225_v11  ;;  %v4632_v50 = vadd.f32 %v1607_v6, %v1278_v40  ;;  %5927 = vst [vmem:[#allocation54_spill] sm:$0xff] %v4636_v32  ;;  %v3429_v11 = vor.u32 %v3714_v7, %v3428_v60  ;;  %v1920_v6 = vpack.c.bf16 %v4636_v32, %v4636_v32  ;;  %v1413_v25 = vpop.f32.mrf.mxu2  ;;  %v3663_v60 = vld [vmem:[%s3945_s11 + $0x1e4] sm:$0xf]  ;;  %v3230_v7 = vld [vmem:[%s3945_s11 + $0x1e8] sm:$0xf0] }
 0x1f2   : > { %v3433_v40 = vor.u32 %v3713_v21, %v3430_v20  ;;  %v3233_v21 = vor.u32 %v3663_v60, %v3230_v7 }
 0x1f3   : > { %v1867_v23 = vpack.c.bf16 %v4632_v50, %v4632_v50  ;;  %1317 = vmatmul.bf16.gmra.mxu0 %v3213_v31  ;;  %1452 = vmatmul.bf16.gmra.mxu2 %v3429_v11  ;;  %2049 = vst.msk [vmem:[%s4028_s8 + $0x174] sm:$0xf] %vm1955_vm3, %v1920_v6  ;;  %v3662_v11 = vld [vmem:[%s3945_s11 + $0x1d4] sm:$0xf0] }
 0x1f4   : > { %3589 = vmatmul.msk.bf16.gmra.mxu3 %vm969_vm2, %v3433_v40 }
 0x1f5   : > { %1996 = vst.msk [vmem:[%s4028_s8 + $0xa0] sm:$0xf] %vm1955_vm3, %v1867_v23  ;;  %v3220_v23 = vld [vmem:[%s3945_s11 + $0x1d0] sm:$0xf] }
 0x1f6   : > { %v1614_v49 = vpop.f32.mrf.mxu1  ;;  %v1742_v12 = vpop.f32.mrf.mxu3 }
 0x1f7   : > { %v4661_v40 = vadd.f32 %v1742_v12, %v1413_v25  ;;  %v3436_v12 = vld [vmem:[%s3945_s11 + $0x380] sm:$0xf]  ;;  %v3716_v25 = vld [vmem:[%s3945_s11 + $0x384] sm:$0xf0] }
 0x1f8   : > { %v1280_v55 = vpop.f32.mrf.mxu0 }
 0x1f9   : > { %v4651_v31 = vadd.f32 %v1609_v39, %v1280_v55  ;;  %5929 = vst [vmem:[#allocation56_spill] sm:$0xff] %v4661_v40  ;;  %v3221_v39 = vor.u32 %v3662_v11, %v3220_v23  ;;  %v1921_v55 = vpack.c.bf16 %v4661_v40, %v4661_v40  ;;  %v1415_v3 = vpop.f32.mrf.mxu2  ;;  %v3715_v23 = vld [vmem:[%s3945_s11 + $0x384] sm:$0xf]  ;;  %v3438_v40 = vld [vmem:[%s3945_s11 + $0x388] sm:$0xf0] }
 0x1fb   : > { %5928 = vst [vmem:[#allocation55_spill] sm:$0xff] %v4651_v31  ;;  %v1868_v20 = vpack.c.bf16 %v4651_v31, %v4651_v31 }
 0x1fc   : > { %2050 = vst.msk [vmem:[%s4028_s8 + $0x178] sm:$0xf] %vm1955_vm3, %v1921_v55 }
 0x1fd   : > { %1997 = vst.msk [vmem:[%s4028_s8 + $0xa4] sm:$0xf] %vm1955_vm3, %v1868_v20 }
 0x1fe   : > { %v1617_v6 = vpop.f32.mrf.mxu1  ;;  %v1744_v7 = vpop.f32.mrf.mxu3 }
 0x1ff   : > { %v4670_v20 = vadd.f32 %v1744_v7, %v1415_v3 }
 0x200   : > { %v1283_v32 = vpop.f32.mrf.mxu0 }
 0x201   : > { %3564 = vmatmul.msk.bf16.gmra.mxu1 %vm969_vm2, %v3233_v21  ;;  %v4666_v60 = vadd.f32 %v1612_v62, %v1283_v32  ;;  %5930 = vst [vmem:[#allocation57_spill] sm:$0xff] %v4670_v20  ;;  %v3437_v21 = vor.u32 %v3716_v25, %v3436_v12  ;;  %v1922_v62 = vpack.c.bf16 %v4670_v20, %v4670_v20  ;;  %v1418_v7 = vpop.f32.mrf.mxu2  ;;  %v3665_v12 = vld [vmem:[%s3945_s11 + $0x1f4] sm:$0xf]  ;;  %v3238_v25 = vld [vmem:[%s3945_s11 + $0x1f8] sm:$0xf0] }
 0x202   : > { %v3441_v32 = vor.u32 %v3715_v23, %v3438_v40  ;;  %v3241_v23 = vor.u32 %v3665_v12, %v3238_v25 }
 0x203   : > { %v1869_v11 = vpack.c.bf16 %v4666_v60, %v4666_v60  ;;  %1322 = vmatmul.bf16.gmra.mxu0 %v3221_v39  ;;  %1457 = vmatmul.bf16.gmra.mxu2 %v3437_v21  ;;  %2051 = vst.msk [vmem:[%s4028_s8 + $0x17c] sm:$0xf] %vm1955_vm3, %v1922_v62  ;;  %v3664_v21 = vld [vmem:[%s3945_s11 + $0x1e4] sm:$0xf0] }
 0x204   : > { %3590 = vmatmul.msk.bf16.gmra.mxu3 %vm969_vm2, %v3441_v32 }
 0x205   : > { %1998 = vst.msk [vmem:[%s4028_s8 + $0xa8] sm:$0xf] %vm1955_vm3, %v1869_v11  ;;  %v3228_v11 = vld [vmem:[%s3945_s11 + $0x1e0] sm:$0xf] }
 0x206   : > { %v1619_v3 = vpop.f32.mrf.mxu1  ;;  %v1747_v37 = vpop.f32.mrf.mxu3 }
 0x207   : > { %v4695_v32 = vadd.f32 %v1747_v37, %v1418_v7  ;;  %v3444_v37 = vld [vmem:[%s3945_s11 + $0x390] sm:$0xf]  ;;  %v3718_v7 = vld [vmem:[%s3945_s11 + $0x394] sm:$0xf0] }
 0x208   : > { %v1285_v55 = vpop.f32.mrf.mxu0 }
 0x209   : > { %v4685_v39 = vadd.f32 %v1614_v49, %v1285_v55  ;;  %5931 = vst [vmem:[#allocation58_spill] sm:$0xff] %v4695_v32  ;;  %v3229_v49 = vor.u32 %v3664_v21, %v3228_v11  ;;  %v1923_v55 = vpack.c.bf16 %v4695_v32, %v4695_v32  ;;  %v1420_v26 = vpop.f32.mrf.mxu2  ;;  %v3717_v11 = vld [vmem:[%s3945_s11 + $0x394] sm:$0xf]  ;;  %v3446_v32 = vld [vmem:[%s3945_s11 + $0x398] sm:$0xf0] }
 0x20b   : > { %v1870_v40 = vpack.c.bf16 %v4685_v39, %v4685_v39  ;;  %2052 = vst.msk [vmem:[%s4028_s8 + $0x180] sm:$0xf] %vm1955_vm3, %v1923_v55 }
 0x20d   : > { %1999 = vst.msk [vmem:[%s4028_s8 + $0xac] sm:$0xf] %vm1955_vm3, %v1870_v40 }
 0x20e   : > { %v1622_v62 = vpop.f32.mrf.mxu1  ;;  %v1749_v25 = vpop.f32.mrf.mxu3 }
 0x20f   : > { %v4704_v40 = vadd.f32 %v1749_v25, %v1420_v26 }
 0x210   : > { %v1288_v20 = vpop.f32.mrf.mxu0 }
 0x211   : > { %3565 = vmatmul.msk.bf16.gmra.mxu1 %vm969_vm2, %v3241_v23  ;;  %v4700_v12 = vadd.f32 %v1617_v6, %v1288_v20  ;;  %5933 = vst [vmem:[#allocation60_spill] sm:$0xff] %v4704_v40  ;;  %v3445_v23 = vor.u32 %v3718_v7, %v3444_v37  ;;  %v1924_v6 = vpack.c.bf16 %v4704_v40, %v4704_v40  ;;  %v1423_v25 = vpop.f32.mrf.mxu2  ;;  %v3667_v37 = vld [vmem:[%s3945_s11 + $0x204] sm:$0xf]  ;;  %v3246_v7 = vld [vmem:[%s3945_s11 + $0x208] sm:$0xf0] }
 0x212   : > { %v3449_v20 = vor.u32 %v3717_v11, %v3446_v32  ;;  %v3249_v11 = vor.u32 %v3667_v37, %v3246_v7 }
 0x213   : > { %5932 = vst [vmem:[#allocation59_spill] sm:$0xff] %v4700_v12  ;;  %v1871_v21 = vpack.c.bf16 %v4700_v12, %v4700_v12  ;;  %1327 = vmatmul.bf16.gmra.mxu0 %v3229_v49  ;;  %1462 = vmatmul.bf16.gmra.mxu2 %v3445_v23  ;;  %v3666_v23 = vld [vmem:[%s3945_s11 + $0x1f4] sm:$0xf0] }
 0x214   : > { %2053 = vst.msk [vmem:[%s4028_s8 + $0x184] sm:$0xf] %vm1955_vm3, %v1924_v6  ;;  %3591 = vmatmul.msk.bf16.gmra.mxu3 %vm969_vm2, %v3449_v20 }
 0x215   : > { %2000 = vst.msk [vmem:[%s4028_s8 + $0xb0] sm:$0xf] %vm1955_vm3, %v1871_v21  ;;  %v3236_v21 = vld [vmem:[%s3945_s11 + $0x1f0] sm:$0xf] }
 0x216   : > { %v1624_v26 = vpop.f32.mrf.mxu1  ;;  %v1752_v63 = vpop.f32.mrf.mxu3 }
 0x217   : > { %v4729_v20 = vadd.f32 %v1752_v63, %v1423_v25  ;;  %v3452_v63 = vld [vmem:[%s3945_s11 + $0x3a0] sm:$0xf]  ;;  %v3720_v25 = vld [vmem:[%s3945_s11 + $0x3a4] sm:$0xf0] }
 0x218   : > { %v1290_v55 = vpop.f32.mrf.mxu0 }
 0x219   : > { %v4719_v49 = vadd.f32 %v1619_v3, %v1290_v55  ;;  %5935 = vst [vmem:[#allocation62_spill] sm:$0xff] %v4729_v20  ;;  %v3237_v3 = vor.u32 %v3666_v23, %v3236_v21  ;;  %v1925_v55 = vpack.c.bf16 %v4729_v20, %v4729_v20  ;;  %v1425_v54 = vpop.f32.mrf.mxu2  ;;  %v3453_v23 = vor.u32 %v3720_v25, %v3452_v63 }
 0x21b   : > { %5934 = vst [vmem:[#allocation61_spill] sm:$0xff] %v4719_v49  ;;  %v1872_v32 = vpack.c.bf16 %v4719_v49, %v4719_v49 }
 0x21c   : > { %2054 = vst.msk [vmem:[%s4028_s8 + $0x188] sm:$0xf] %vm1955_vm3, %v1925_v55 }
 0x21d   : > { %2001 = vst.msk [vmem:[%s4028_s8 + $0xb4] sm:$0xf] %vm1955_vm3, %v1872_v32 }
 0x21e   : > { %v1627_v6 = vpop.f32.mrf.mxu1  ;;  %v1754_v7 = vpop.f32.mrf.mxu3 }
 0x21f   : > { %v4738_v32 = vadd.f32 %v1754_v7, %v1425_v54 }
 0x220   : > { %v1293_v40 = vpop.f32.mrf.mxu0 }
 0x221   : > { %3566 = vmatmul.msk.bf16.gmra.mxu1 %vm969_vm2, %v3249_v11  ;;  %v4734_v37 = vadd.f32 %v1622_v62, %v1293_v40  ;;  %5937 = vst [vmem:[#allocation64_spill] sm:$0xff] %v4738_v32  ;;  %v3454_v11 = vld [vmem:[%s3945_s11 + $0x3a8] sm:$0xf0]  ;;  %v1926_v62 = vpack.c.bf16 %v4738_v32, %v4738_v32  ;;  %v3722_v32 = vld [vmem:[%s3945_s11 + $0x3b4] sm:$0xf0] }
 0x222   : > { %v3457_v40 = vor.u32 %v3719_v29, %v3454_v11  ;;  %v2086_v29 = vsel %vm2084_vm4, %v4039_v38, 0.0 }
 0x223   : > { %5936 = vst [vmem:[#allocation63_spill] sm:$0xff] %v4734_v37  ;;  %v1873_v21 = vpack.c.bf16 %v4734_v37, %v4734_v37  ;;  %1332 = vmatmul.bf16.gmra.mxu0 %v3237_v3  ;;  %1467 = vmatmul.bf16.gmra.mxu2 %v3453_v23  ;;  %v2088_v23 = vsel %vm2084_vm4, %v4050_v48, 0.0  ;;  %v3460_v48 = vld [vmem:[%s3945_s11 + $0x3b0] sm:$0xf] }
 0x224   : > { %2055 = vst.msk [vmem:[%s4028_s8 + $0x18c] sm:$0xf] %vm1955_vm3, %v1926_v62  ;;  %3592 = vmatmul.msk.bf16.gmra.mxu3 %vm969_vm2, %v3457_v40 }
 0x225   : > { %2002 = vst.msk [vmem:[%s4028_s8 + $0xb8] sm:$0xf] %vm1955_vm3, %v1873_v21 }
 0x226   : > { %v1629_v55 = vpop.f32.mrf.mxu1  ;;  %v1428_v7 = vpop.f32.mrf.mxu2 }
 0x227   : > { %v1757_v3 = vpop.f32.mrf.mxu3 }
 0x228   : > { %v1295_v54 = vpop.f32.mrf.mxu0  ;;  %v4761_v21 = vadd.f32 %v1757_v3, %v1428_v7 }
 0x229   : > { %v4753_v20 = vadd.f32 %v1624_v26, %v1295_v54  ;;  %v2085_v26 = vsel %vm2084_vm4, %v4023_v28, 0.0 }
 0x22a   : > { %5939 = vst [vmem:[#allocation66_spill] sm:$0xff] %v4761_v21  ;;  %v1927_v11 = vpack.c.bf16 %v4761_v21, %v4761_v21  ;;  %v2087_v62 = vadd.f32 %v2086_v29, %v2085_v26  ;;  %v3721_v21 = vld [vmem:[%s3945_s11 + $0x3b4] sm:$0xf]  ;;  %v2092_v29 = vsel %vm2084_vm4, %v4072_v4, 0.0 }
 0x22b   : > { %5938 = vst [vmem:[#allocation65_spill] sm:$0xff] %v4753_v20  ;;  %v1874_v63 = vpack.c.bf16 %v4753_v20, %v4753_v20 }
 0x22c   : > { %2056 = vst.msk [vmem:[%s4028_s8 + $0x190] sm:$0xf] %vm1955_vm3, %v1927_v11  ;;  %v2089_v3 = vadd.f32 %v2088_v23, %v2087_v62  ;;  %v2094_v23 = vsel %vm2084_vm4, %v4083_v14, 0.0 }
 0x22d   : > { %2003 = vst.msk [vmem:[%s4028_s8 + $0xbc] sm:$0xf] %vm1955_vm3, %v1874_v63  ;;  %v2090_v63 = vsel %vm2084_vm4, %v4061_v58, 0.0  ;;  %v3461_v58 = vor.u32 %v3722_v32, %v3460_v48  ;;  %v2096_v48 = vsel %vm2084_vm4, %v4094_v24, 0.0 }
 0x22e   : > { %v1632_v25 = vpop.f32.mrf.mxu1  ;;  %v1430_v54 = vpop.f32.mrf.mxu2 }
 0x22f   : > { %v1759_v7 = vpop.f32.mrf.mxu3 }
 0x230   : > { %v1298_v40 = vpop.f32.mrf.mxu0  ;;  %v4775_v28 = vadd.f32 %v1759_v7, %v1430_v54 }
 0x231   : > { %v4771_v38 = vadd.f32 %v1627_v6, %v1298_v40  ;;  %v3462_v6 = vld [vmem:[%s3945_s11 + $0x3b8] sm:$0xf0]  ;;  %v2091_v40 = vadd.f32 %v2090_v63, %v2089_v3 }
 0x232   : > { %v1928_v11 = vpack.c.bf16 %v4775_v28, %v4775_v28  ;;  %v3465_v16 = vor.u32 %v3721_v21, %v3462_v6  ;;  %v2098_v21 = vsel %vm2084_vm4, %v4105_v35, 0.0 }
 0x233   : > { %5940 = vst [vmem:[#allocation67_spill] sm:$0xff] %v4771_v38  ;;  %v1875_v26 = vpack.c.bf16 %v4771_v38, %v4771_v38  ;;  %1472 = vmatmul.bf16.gmra.mxu2 %v3461_v58  ;;  %v2093_v54 = vadd.f32 %v2092_v29, %v2091_v40  ;;  %v2100_v58 = vsel %vm2084_vm4, %v4116_v46, 0.0  ;;  %v2102_v40 = vsel %vm2084_vm4, %v4127_v57, 0.0  ;;  %v3723_v57 = vld [vmem:[%s3945_s11 + $0x3c4] sm:$0xf] }
 0x234   : > { %2057 = vst.msk [vmem:[%s4028_s8 + $0x194] sm:$0xf] %vm1955_vm3, %v1928_v11  ;;  %3593 = vmatmul.msk.bf16.gmra.mxu3 %vm969_vm2, %v3465_v16 }
 0x235   : > { %2004 = vst.msk [vmem:[%s4028_s8 + $0xc0] sm:$0xf] %vm1955_vm3, %v1875_v26  ;;  %v2095_v32 = vadd.f32 %v2094_v23, %v2093_v54  ;;  %v2104_v54 = vsel %vm2084_vm4, %v4138_v5, 0.0  ;;  %v3724_v5 = vld [vmem:[%s3945_s11 + $0x3c4] sm:$0xf0] }
 0x236   : > { %v1634_v62 = vpop.f32.mrf.mxu1  ;;  %v1433_v7 = vpop.f32.mrf.mxu2 }
 0x237   : > { %v1762_v26 = vpop.f32.mrf.mxu3  ;;  %v2097_v6 = vadd.f32 %v2096_v48, %v2095_v32 }
 0x238   : > { %v1300_v63 = vpop.f32.mrf.mxu0 }
 0x239   : > { %v4798_v3 = vadd.f32 %v1629_v55, %v1300_v63  ;;  %v2099_v29 = vadd.f32 %v2098_v21, %v2097_v6  ;;  %v4808_v55 = vadd.f32 %v1762_v26, %v1433_v7  ;;  %v2106_v6 = vsel %vm2084_vm4, %v4151_v17, 0.0 }
 0x23b   : > { %5941 = vst [vmem:[#allocation68_spill] sm:$0xff] %v4798_v3  ;;  %v1876_v16 = vpack.c.bf16 %v4798_v3, %v4798_v3  ;;  %v2101_v23 = vadd.f32 %v2100_v58, %v2099_v29  ;;  %v1929_v48 = vpack.c.bf16 %v4808_v55, %v4808_v55  ;;  %v3468_v29 = vld [vmem:[%s3945_s11 + $0x3c0] sm:$0xf] }
 0x23c   : > { %5942 = vst [vmem:[#allocation69_spill] sm:$0xff] %v4808_v55  ;;  %v3469_v17 = vor.u32 %v3724_v5, %v3468_v29  ;;  %v2112_v5 = vsel %vm2084_vm4, %v4190_v61, 0.0 }
 0x23d   : > { %2005 = vst.msk [vmem:[%s4028_s8 + $0xc4] sm:$0xf] %vm1955_vm3, %v1876_v16  ;;  %v2103_v32 = vadd.f32 %v2102_v40, %v2101_v23  ;;  %v2108_v40 = vsel %vm2084_vm4, %v4164_v30, 0.0 }
 0x23e   : > { %v1637_v11 = vpop.f32.mrf.mxu1  ;;  %v1435_v21 = vpop.f32.mrf.mxu2  ;;  %2058 = vst.msk [vmem:[%s4028_s8 + $0x198] sm:$0xf] %vm1955_vm3, %v1929_v48 }
 0x23f   : > { %v1764_v7 = vpop.f32.mrf.mxu3  ;;  %v2105_v26 = vadd.f32 %v2104_v54, %v2103_v32  ;;  %v2110_v54 = vsel %vm2084_vm4, %v4175_v43, 0.0 }
 0x240   : > { %v1303_v63 = vpop.f32.mrf.mxu0  ;;  %v4820_v58 = vadd.f32 %v1764_v7, %v1435_v21 }
 0x241   : > { %v4816_v16 = vadd.f32 %v1632_v25, %v1303_v63  ;;  %v3470_v25 = vld [vmem:[%s3945_s11 + $0x3c8] sm:$0xf0]  ;;  %v2107_v63 = vadd.f32 %v2106_v6, %v2105_v26 }
 0x242   : > { %5944 = vst [vmem:[#allocation71_spill] sm:$0xff] %v4820_v58  ;;  %v1930_v48 = vpack.c.bf16 %v4820_v58, %v4820_v58  ;;  %v3473_v46 = vor.u32 %v3723_v57, %v3470_v25  ;;  %v2114_v57 = vsel %vm2084_vm4, %v4209_v13, 0.0 }
 0x243   : > { %5943 = vst [vmem:[#allocation70_spill] sm:$0xff] %v4816_v16  ;;  %v1877_v23 = vpack.c.bf16 %v4816_v16, %v4816_v16  ;;  %1477 = vmatmul.bf16.gmra.mxu2 %v3469_v17  ;;  %v2109_v21 = vadd.f32 %v2108_v40, %v2107_v63  ;;  %v2116_v17 = vsel %vm2084_vm4, %v4224_v34, 0.0  ;;  %v2118_v63 = vsel %vm2084_vm4, %v4243_v53, 0.0  ;;  %v3725_v53 = vld [vmem:[%s3945_s11 + $0x3d4] sm:$0xf] }
 0x244   : > { %2059 = vst.msk [vmem:[%s4028_s8 + $0x19c] sm:$0xf] %vm1955_vm3, %v1930_v48  ;;  %3594 = vmatmul.msk.bf16.gmra.mxu3 %vm969_vm2, %v3473_v46 }
 0x245   : > { %2006 = vst.msk [vmem:[%s4028_s8 + $0xc8] sm:$0xf] %vm1955_vm3, %v1877_v23  ;;  %v2111_v6 = vadd.f32 %v2110_v54, %v2109_v21  ;;  %v2120_v21 = vsel %vm2084_vm4, %v4258_v10, 0.0  ;;  %v3726_v10 = vld [vmem:[%s3945_s11 + $0x3d4] sm:$0xf0] }
 0x246   : > { %v1639_v32 = vpop.f32.mrf.mxu1  ;;  %v1438_v26 = vpop.f32.mrf.mxu2 }
 0x247   : > { %v1767_v23 = vpop.f32.mrf.mxu3  ;;  %v2113_v25 = vadd.f32 %v2112_v5, %v2111_v6 }
 0x248   : > { %v1305_v7 = vpop.f32.mrf.mxu0 }
 0x249   : > { %v4843_v29 = vadd.f32 %v1634_v62, %v1305_v7  ;;  %v2115_v40 = vadd.f32 %v2114_v57, %v2113_v25  ;;  %v4853_v62 = vadd.f32 %v1767_v23, %v1438_v26  ;;  %v2122_v25 = vsel %vm2084_vm4, %v4277_v33, 0.0 }
 0x24b   : > { %5945 = vst [vmem:[#allocation72_spill] sm:$0xff] %v4843_v29  ;;  %v1878_v46 = vpack.c.bf16 %v4843_v29, %v4843_v29  ;;  %v2117_v54 = vadd.f32 %v2116_v17, %v2115_v40  ;;  %v1931_v5 = vpack.c.bf16 %v4853_v62, %v4853_v62  ;;  %v3476_v40 = vld [vmem:[%s3945_s11 + $0x3d0] sm:$0xf] }
 0x24c   : > { %v3477_v33 = vor.u32 %v3726_v10, %v3476_v40  ;;  %v2128_v10 = vsel %vm2084_vm4, %v4326_v44, 0.0 }
 0x24d   : > { %2007 = vst.msk [vmem:[%s4028_s8 + $0xcc] sm:$0xf] %vm1955_vm3, %v1878_v46  ;;  %v2119_v6 = vadd.f32 %v2118_v63, %v2117_v54  ;;  %v2124_v63 = vsel %vm2084_vm4, %v4292_v56, 0.0 }
 0x24e   : > { %v1642_v48 = vpop.f32.mrf.mxu1  ;;  %v1440_v57 = vpop.f32.mrf.mxu2  ;;  %2060 = vst.msk [vmem:[%s4028_s8 + $0x1a0] sm:$0xf] %vm1955_vm3, %v1931_v5 }
 0x24f   : > { %v1769_v26 = vpop.f32.mrf.mxu3  ;;  %v2121_v23 = vadd.f32 %v2120_v21, %v2119_v6  ;;  %v2126_v21 = vsel %vm2084_vm4, %v4311_v19, 0.0 }
 0x250   : > { %v1308_v7 = vpop.f32.mrf.mxu0  ;;  %v4865_v17 = vadd.f32 %v1769_v26, %v1440_v57 }
 0x251   : > { %v4861_v46 = vadd.f32 %v1637_v11, %v1308_v7  ;;  %v3478_v11 = vld [vmem:[%s3945_s11 + $0x3d8] sm:$0xf0]  ;;  %v2123_v7 = vadd.f32 %v2122_v25, %v2121_v23 }
 0x252   : > { %v1932_v5 = vpack.c.bf16 %v4865_v17, %v4865_v17  ;;  %v3481_v34 = vor.u32 %v3725_v53, %v3478_v11  ;;  %v2130_v53 = vsel %vm2084_vm4, %v4345_v2, 0.0 }
 0x253   : > { %5946 = vst [vmem:[#allocation73_spill] sm:$0xff] %v4861_v46  ;;  %v1879_v54 = vpack.c.bf16 %v4861_v46, %v4861_v46  ;;  %1482 = vmatmul.bf16.gmra.mxu2 %v3477_v33  ;;  %v2125_v57 = vadd.f32 %v2124_v63, %v2123_v7  ;;  %v2132_v33 = vsel %vm2084_vm4, %v4360_v41, 0.0  ;;  %v2134_v7 = vsel %vm2084_vm4, %v4379_v9, 0.0  ;;  %v3727_v9 = vld [vmem:[%s3945_s11 + $0x3e4] sm:$0xf] }
 0x254   : > { %2061 = vst.msk [vmem:[%s4028_s8 + $0x1a4] sm:$0xf] %vm1955_vm3, %v1932_v5  ;;  %3595 = vmatmul.msk.bf16.gmra.mxu3 %vm969_vm2, %v3481_v34 }
 0x255   : > { %2008 = vst.msk [vmem:[%s4028_s8 + $0xd0] sm:$0xf] %vm1955_vm3, %v1879_v54  ;;  %v2127_v25 = vadd.f32 %v2126_v21, %v2125_v57  ;;  %v2136_v57 = vsel %vm2084_vm4, %v4394_v52, 0.0  ;;  %v3728_v52 = vld [vmem:[%s3945_s11 + $0x3e4] sm:$0xf0] }
 0x256   : > { %v1644_v6 = vpop.f32.mrf.mxu1  ;;  %v1443_v23 = vpop.f32.mrf.mxu2 }
 0x257   : > { %v1772_v54 = vpop.f32.mrf.mxu3  ;;  %v2129_v11 = vadd.f32 %v2128_v10, %v2127_v25 }
 0x258   : > { %v1310_v26 = vpop.f32.mrf.mxu0 }
 0x259   : > { %v4888_v40 = vadd.f32 %v1639_v32, %v1310_v26  ;;  %v2131_v63 = vadd.f32 %v2130_v53, %v2129_v11  ;;  %v4898_v32 = vadd.f32 %v1772_v54, %v1443_v23  ;;  %v2138_v11 = vsel %vm2084_vm4, %v4413_v22, 0.0 }
 0x25b   : > { %5947 = vst [vmem:[#allocation74_spill] sm:$0xff] %v4888_v40  ;;  %v1880_v34 = vpack.c.bf16 %v4888_v40, %v4888_v40  ;;  %v2133_v21 = vadd.f32 %v2132_v33, %v2131_v63  ;;  %v1933_v10 = vpack.c.bf16 %v4898_v32, %v4898_v32  ;;  %v3484_v63 = vld [vmem:[%s3945_s11 + $0x3e0] sm:$0xf] }
 0x25c   : > { %v3485_v22 = vor.u32 %v3728_v52, %v3484_v63  ;;  %v2144_v52 = vsel %vm2084_vm4, %v4462_v47, 0.0 }
 0x25d   : > { %2009 = vst.msk [vmem:[%s4028_s8 + $0xd4] sm:$0xf] %vm1955_vm3, %v1880_v34  ;;  %v2135_v25 = vadd.f32 %v2134_v7, %v2133_v21  ;;  %v2140_v7 = vsel %vm2084_vm4, %v4428_v8, 0.0 }
 0x25e   : > { %v1647_v5 = vpop.f32.mrf.mxu1  ;;  %v1445_v53 = vpop.f32.mrf.mxu2  ;;  %2062 = vst.msk [vmem:[%s4028_s8 + $0x1a8] sm:$0xf] %vm1955_vm3, %v1933_v10 }
 0x25f   : > { %v1774_v23 = vpop.f32.mrf.mxu3  ;;  %v2137_v54 = vadd.f32 %v2136_v57, %v2135_v25  ;;  %v2142_v57 = vsel %vm2084_vm4, %v4447_v1, 0.0 }
 0x260   : > { %v1313_v26 = vpop.f32.mrf.mxu0  ;;  %v4910_v33 = vadd.f32 %v1774_v23, %v1445_v53 }
 0x261   : > { %v4906_v34 = vadd.f32 %v1642_v48, %v1313_v26  ;;  %v3486_v48 = vld [vmem:[%s3945_s11 + $0x3e8] sm:$0xf0]  ;;  %v2139_v26 = vadd.f32 %v2138_v11, %v2137_v54 }
 0x262   : > { %v1934_v10 = vpack.c.bf16 %v4910_v33, %v4910_v33  ;;  %v3489_v41 = vor.u32 %v3727_v9, %v3486_v48  ;;  %v2146_v9 = vsel %vm2084_vm4, %v4481_v18, 0.0 }
 0x263   : > { %5948 = vst [vmem:[#allocation75_spill] sm:$0xff] %v4906_v34  ;;  %v1881_v21 = vpack.c.bf16 %v4906_v34, %v4906_v34  ;;  %1487 = vmatmul.bf16.gmra.mxu2 %v3485_v22  ;;  %v2141_v53 = vadd.f32 %v2140_v7, %v2139_v26  ;;  %v2148_v22 = vsel %vm2084_vm4, %v4496_v36, 0.0  ;;  %v2150_v26 = vsel %vm2084_vm4, %v4515_v51, 0.0  ;;  %v3729_v51 = vld [vmem:[%s3945_s11 + $0x3f4] sm:$0xf] }
 0x264   : > { %2063 = vst.msk [vmem:[%s4028_s8 + $0x1ac] sm:$0xf] %vm1955_vm3, %v1934_v10  ;;  %3596 = vmatmul.msk.bf16.gmra.mxu3 %vm969_vm2, %v3489_v41 }
 0x265   : > { %2010 = vst.msk [vmem:[%s4028_s8 + $0xd8] sm:$0xf] %vm1955_vm3, %v1881_v21  ;;  %v2143_v11 = vadd.f32 %v2142_v57, %v2141_v53  ;;  %v2152_v53 = vsel %vm2084_vm4, %v4530_v15, 0.0  ;;  %v3730_v15 = vld [vmem:[%s3945_s11 + $0x3f4] sm:$0xf0] }
 0x266   : > { %v1649_v25 = vpop.f32.mrf.mxu1  ;;  %v1448_v54 = vpop.f32.mrf.mxu2 }
 0x267   : > { %v1777_v21 = vpop.f32.mrf.mxu3  ;;  %v2145_v48 = vadd.f32 %v2144_v52, %v2143_v11 }
 0x268   : > { %v1315_v23 = vpop.f32.mrf.mxu0 }
 0x269   : > { %v4933_v63 = vadd.f32 %v1644_v6, %v1315_v23  ;;  %v2147_v7 = vadd.f32 %v2146_v9, %v2145_v48  ;;  %v4943_v6 = vadd.f32 %v1777_v21, %v1448_v54  ;;  %v2154_v48 = vsel %vm2084_vm4, %v4549_v42, 0.0 }
 0x26b   : > { %5949 = vst [vmem:[#allocation76_spill] sm:$0xff] %v4933_v63  ;;  %v1882_v41 = vpack.c.bf16 %v4933_v63, %v4933_v63  ;;  %v2149_v57 = vadd.f32 %v2148_v22, %v2147_v7  ;;  %v1935_v52 = vpack.c.bf16 %v4943_v6, %v4943_v6  ;;  %v3492_v7 = vld [vmem:[%s3945_s11 + $0x3f0] sm:$0xf] }
 0x26c   : > { %v3493_v42 = vor.u32 %v3730_v15, %v3492_v7  ;;  %v2160_v15 = vsel %vm2084_vm4, %v4598_v45, 0.0 }
 0x26d   : > { %2011 = vst.msk [vmem:[%s4028_s8 + $0xdc] sm:$0xf] %vm1955_vm3, %v1882_v41  ;;  %v2151_v11 = vadd.f32 %v2150_v26, %v2149_v57  ;;  %v2156_v26 = vsel %vm2084_vm4, %v4564_v59, 0.0 }
 0x26e   : > { %v1652_v10 = vpop.f32.mrf.mxu1  ;;  %v1450_v9 = vpop.f32.mrf.mxu2  ;;  %2064 = vst.msk [vmem:[%s4028_s8 + $0x1b0] sm:$0xf] %vm1955_vm3, %v1935_v52 }
 0x26f   : > { %v1779_v54 = vpop.f32.mrf.mxu3  ;;  %v2153_v21 = vadd.f32 %v2152_v53, %v2151_v11  ;;  %v2158_v53 = vsel %vm2084_vm4, %v4583_v0, 0.0 }
 0x270   : > { %v1318_v23 = vpop.f32.mrf.mxu0  ;;  %v4955_v22 = vadd.f32 %v1779_v54, %v1450_v9 }
 0x271   : > { %v4951_v41 = vadd.f32 %v1647_v5, %v1318_v23  ;;  %v3494_v5 = vld [vmem:[%s3945_s11 + $0x3f8] sm:$0xf0]  ;;  %v2155_v23 = vadd.f32 %v2154_v48, %v2153_v21  ;;  %s3599_s11 = sshll.u32 %s3896_s16, 1 }
 0x272   : > { %v1936_v52 = vpack.c.bf16 %v4955_v22, %v4955_v22  ;;  %v3497_v36 = vor.u32 %v3729_v51, %v3494_v5  ;;  %v2162_v51 = vsel %vm2084_vm4, %v4617_v27, 0.0  ;;  %s2887_s20 = scalar_lea.hbm %s5754_s3, %s3599_s11 }
 0x273   : > { %5950 = vst [vmem:[#allocation77_spill] sm:$0xff] %v4951_v41  ;;  %v1883_v57 = vpack.c.bf16 %v4951_v41, %v4951_v41  ;;  %1492 = vmatmul.bf16.gmra.mxu2 %v3493_v42  ;;  %v2157_v9 = vadd.f32 %v2156_v26, %v2155_v23  ;;  %v2164_v42 = vsel %vm2084_vm4, %v4632_v50, 0.0  ;;  %v2166_v23 = vsel %vm2084_vm4, %v4651_v31, 0.0  ;;  %s2891_s25 = sshll.u32 %s2887_s20, 4  ;;  %s2892_s25 = int_to_ptr.hbm [resolvable:$true] %s2891_s25 }
 0x274   : > { %2065 = vst.msk [vmem:[%s4028_s8 + $0x1b4] sm:$0xf] %vm1955_vm3, %v1936_v52  ;;  %3597 = vmatmul.msk.bf16.gmra.mxu3 %vm969_vm2, %v3497_v36  ;;  %s3804_s27 = sshra.s32 %s2892_s25, 4  ;;  %s3805_s27 = int_to_ptr.hbm [resolvable:$true] %s3804_s27 }
 0x275   : > { %2012 = vst.msk [vmem:[%s4028_s8 + $0xe0] sm:$0xf] %vm1955_vm3, %v1883_v57  ;;  %v2159_v48 = vadd.f32 %v2158_v53, %v2157_v9  ;;  %v2168_v9 = vsel %vm2084_vm4, %v4666_v60, 0.0  ;;  %s3806_s16 = scalar_lea.hbm %s3805_s27, 2  ;;  %p3811_p0 = scmp.lt.s32.totalorder %s3805_s27, %s5754_s3 }
 0x276   : > { %v1654_v11 = vpop.f32.mrf.mxu1  ;;  %v1453_v21 = vpop.f32.mrf.mxu2  ;;  %p3807_p11 = scmp.ne.s32.totalorder %s3805_s27, %s3806_s16  ;;  %p3812_p1 = scmp.lt.s32.totalorder %s3810_s4, %s3806_s16 }
 0x277   : > { %v1782_v57 = vpop.f32.mrf.mxu3  ;;  %v2161_v5 = vadd.f32 %v2160_v15, %v2159_v48 }
 0x278   : > { %v1320_v54 = vpop.f32.mrf.mxu0  ;;  %v4988_v53 = vadd.f32 %v1782_v57, %v1453_v21  ;;  %p3808_p12 = pnand %p3807_p11, %p3913_p5  ;;  %p3813_p2 = por %p3812_p1, %p3811_p0 }
 0x279   : > { %v4978_v7 = vadd.f32 %v1649_v25, %v1320_v54  ;;  %v2163_v26 = vadd.f32 %v2162_v51, %v2161_v5  ;;  %v2170_v5 = vsel %vm2084_vm4, %v4685_v39, 0.0 }
 0x27a   : > { %v1937_v15 = vpack.c.bf16 %v4988_v53, %v4988_v53  ;;  %p3809_p13 = pneg %p3808_p12 }
 0x27b   : > { %5951 = vst [vmem:[#allocation78_spill] sm:$0xff] %v4978_v7  ;;  %v1884_v36 = vpack.c.bf16 %v4978_v7, %v4978_v7  ;;  %v2165_v25 = vadd.f32 %v2164_v42, %v2163_v26 }
 0x27c   : > { %2066 = vst.msk [vmem:[%s4028_s8 + $0x1b8] sm:$0xf] %vm1955_vm3, %v1937_v15  ;;  %p3814_p3 = pnand %p3813_p2, %p3809_p13 }
 0x27d   : > { %2013 = vst.msk [vmem:[%s4028_s8 + $0xe4] sm:$0xf] %vm1955_vm3, %v1884_v36  ;;  %v2167_v48 = vadd.f32 %v2166_v23, %v2165_v25  ;;  %v2172_v36 = vsel %vm2084_vm4, %v4700_v12, 0.0 }
 0x27e   : > { %v1657_v52 = vpop.f32.mrf.mxu1  ;;  %v1455_v51 = vpop.f32.mrf.mxu2 }
 0x27f   : > { %v1784_v21 = vpop.f32.mrf.mxu3  ;;  %v2169_v57 = vadd.f32 %v2168_v9, %v2167_v48  ;;  %v2176_v48 = vsel %vm2084_vm4, %v4734_v37, 0.0 }
 0x280   : > { %v1323_v54 = vpop.f32.mrf.mxu0  ;;  %v5000_v42 = vadd.f32 %v1784_v21, %v1455_v51 }
 0x281   : > { %v4996_v31 = vadd.f32 %v1652_v10, %v1323_v54  ;;  %v2171_v23 = vadd.f32 %v2170_v5, %v2169_v57  ;;  %v2174_v10 = vsel %vm2084_vm4, %v4719_v49, 0.0  ;;  %v2178_v5 = vsel %vm2084_vm4, %v4753_v20, 0.0 }
 0x282   : > { %v1938_v25 = vpack.c.bf16 %v5000_v42, %v5000_v42 }
 0x283   : > { %5952 = vst [vmem:[#allocation79_spill] sm:$0xff] %v4996_v31  ;;  %v1885_v26 = vpack.c.bf16 %v4996_v31, %v4996_v31  ;;  %v2173_v9 = vadd.f32 %v2172_v36, %v2171_v23 }
 0x284   : > { %2067 = vst.msk [vmem:[%s4028_s8 + $0x1bc] sm:$0xf] %vm1955_vm3, %v1938_v25  ;;  %v2182_v25 = vsel %vm2084_vm4, %v4798_v3, 0.0 }
 0x285   : > { %2014 = vst.msk [vmem:[%s4028_s8 + $0xe8] sm:$0xf] %vm1955_vm3, %v1885_v26  ;;  %v2175_v54 = vadd.f32 %v2174_v10, %v2173_v9  ;;  %v2180_v26 = vsel %vm2084_vm4, %v4771_v38, 0.0  ;;  %v2186_v38 = vsel %vm2084_vm4, %v4843_v29, 0.0 }
 0x286   : > { %v1659_v15 = vpop.f32.mrf.mxu1  ;;  %v1458_v21 = vpop.f32.mrf.mxu2 }
 0x287   : > { %v1787_v12 = vpop.f32.mrf.mxu3  ;;  %v2177_v49 = vadd.f32 %v2176_v48, %v2175_v54 }
 0x288   : > { %v1325_v51 = vpop.f32.mrf.mxu0 }
 0x289   : > { %v5018_v57 = vadd.f32 %v1654_v11, %v1325_v51  ;;  %v2179_v23 = vadd.f32 %v2178_v5, %v2177_v49  ;;  %v2184_v11 = vsel %vm2084_vm4, %v4816_v16, 0.0  ;;  %v5034_v49 = vadd.f32 %v1787_v12, %v1458_v21 }
 0x28a   : > { %v2190_v12 = vsel %vm2084_vm4, %v4888_v40, 0.0 }
 0x28b   : > { %5953 = vst [vmem:[#allocation80_spill] sm:$0xff] %v5018_v57  ;;  %v1886_v36 = vpack.c.bf16 %v5018_v57, %v5018_v57  ;;  %v2181_v9 = vadd.f32 %v2180_v26, %v2179_v23  ;;  %v2188_v26 = vsel %vm2084_vm4, %v4861_v46, 0.0 }
 0x28d   : > { %2015 = vst.msk [vmem:[%s4028_s8 + $0xec] sm:$0xf] %vm1955_vm3, %v1886_v36  ;;  %v2183_v51 = vadd.f32 %v2182_v25, %v2181_v9  ;;  %v1939_v25 = vpack.c.bf16 %v5034_v49, %v5034_v49 }
 0x28e   : > { %v1662_v10 = vpop.f32.mrf.mxu1  ;;  %v1460_v54 = vpop.f32.mrf.mxu2 }
 0x28f   : > { %v1789_v5 = vpop.f32.mrf.mxu3  ;;  %v2185_v36 = vadd.f32 %v2184_v11, %v2183_v51  ;;  %2068 = vst.msk [vmem:[%s4028_s8 + $0x1c0] sm:$0xf] %vm1955_vm3, %v1939_v25  ;;  %v2192_v51 = vsel %vm2084_vm4, %v4906_v34, 0.0 }
 0x290   : > { %v1328_v48 = vpop.f32.mrf.mxu0  ;;  %v5036_v3 = vadd.f32 %v1789_v5, %v1460_v54  ;;  %v2194_v5 = vsel %vm2084_vm4, %v4933_v63, 0.0  ;;  %v5956_v63 = vld [vmem:[#allocation12_spill] sm:$0xff] }
 0x291   : > { %v5032_v20 = vadd.f32 %v1657_v52, %v1328_v48  ;;  %v2187_v9 = vadd.f32 %v2186_v38, %v2185_v36 }
 0x292   : > { %v1940_v52 = vpack.c.bf16 %v5036_v3, %v5036_v3 }
 0x293   : > { %5954 = vst [vmem:[#allocation81_spill] sm:$0xff] %v5032_v20  ;;  %v1887_v23 = vpack.c.bf16 %v5032_v20, %v5032_v20  ;;  %v2189_v11 = vadd.f32 %v2188_v26, %v2187_v9  ;;  %v2196_v26 = vsel %vm2084_vm4, %v4951_v41, 0.0 }
 0x294   : > { %2069 = vst.msk [vmem:[%s4028_s8 + $0x1c4] sm:$0xf] %vm1955_vm3, %v1940_v52  ;;  %v2198_v52 = vsel %vm2084_vm4, %v4978_v7, 0.0  ;;  %v2202_v7 = vsel %vm2084_vm4, %v5018_v57, 0.0 }
 0x295   : > { %2016 = vst.msk [vmem:[%s4028_s8 + $0xf0] sm:$0xf] %vm1955_vm3, %v1887_v23  ;;  %v2191_v48 = vadd.f32 %v2190_v12, %v2189_v11 }
 0x296   : > { %v1664_v21 = vpop.f32.mrf.mxu1  ;;  %v1463_v54 = vpop.f32.mrf.mxu2 }
 0x297   : > { %v1792_v40 = vpop.f32.mrf.mxu3  ;;  %v2193_v23 = vadd.f32 %v2192_v51, %v2191_v48  ;;  %v2200_v51 = vsel %vm2084_vm4, %v4996_v31, 0.0 }
 0x298   : > { %v1330_v38 = vpop.f32.mrf.mxu0 }
 0x299   : > { %v5058_v36 = vadd.f32 %v1659_v15, %v1330_v38  ;;  %v2195_v9 = vadd.f32 %v2194_v5, %v2193_v23 }
 0x29b   : > { %5955 = vst [vmem:[#allocation82_spill] sm:$0xff] %v5058_v36  ;;  %v1888_v25 = vpack.c.bf16 %v5058_v36, %v5058_v36  ;;  %v2197_v11 = vadd.f32 %v2196_v26, %v2195_v9  ;;  %v5079_v26 = vadd.f32 %v1792_v40, %v1463_v54  ;;  %v2206_v54 = vsel %vm2084_vm4, %v5058_v36, 0.0 }
 0x29d   : > { %2017 = vst.msk [vmem:[%s4028_s8 + $0xf4] sm:$0xf] %vm1955_vm3, %v1888_v25  ;;  %v2199_v48 = vadd.f32 %v2198_v52, %v2197_v11  ;;  %v2204_v52 = vsel %vm2084_vm4, %v5032_v20, 0.0 }
 0x29e   : > { %v1667_v12 = vpop.f32.mrf.mxu1  ;;  %v1465_v23 = vpop.f32.mrf.mxu2 }
 0x29f   : > { %v5069_v15 = vadd.f32 %v1667_v12, %v5956_v63  ;;  %v1794_v63 = vpop.f32.mrf.mxu3  ;;  %v2201_v25 = vadd.f32 %v2200_v51, %v2199_v48 }
 0x2a0   : > { %v1333_v5 = vpop.f32.mrf.mxu0  ;;  %v5083_v9 = vadd.f32 %v1794_v63, %v1465_v23 }
 0x2a1   : > { %5957 = vst [vmem:[#allocation12_spill] sm:$0xff] %v5069_v15  ;;  %v1891_v38 = vpack.c.bf16 %v5069_v15, %v5069_v15  ;;  %v5077_v41 = vadd.f32 %v1662_v10, %v1333_v5  ;;  %v1941_v10 = vpack.c.bf16 %v5079_v26, %v5079_v26  ;;  %v2203_v11 = vadd.f32 %v2202_v7, %v2201_v25 }
 0x2a2   : > { %v1942_v40 = vpack.c.bf16 %v5083_v9, %v5083_v9 }
 0x2a3   : > { %5958 = vst [vmem:[#allocation83_spill] sm:$0xff] %v5077_v41  ;;  %v1889_v12 = vpack.c.bf16 %v5077_v41, %v5077_v41  ;;  %v2205_v48 = vadd.f32 %v2204_v52, %v2203_v11  ;;  %v2208_v7 = vsel %vm2084_vm4, %v5077_v41, 0.0 }
 0x2a4   : > { %2020 = vst.msk [vmem:[%s4028_s8 + $0x100] sm:$0xf] %vm1955_vm3, %v1891_v38  ;;  %v5959_v38 = vld [vmem:[#allocation14_spill] sm:$0xff] }
 0x2a5   : > { %2018 = vst.msk [vmem:[%s4028_s8 + $0xf8] sm:$0xf] %vm1955_vm3, %v1889_v12  ;;  %v2207_v23 = vadd.f32 %v2206_v54, %v2205_v48 }
 0x2a6   : > { %v1669_v51 = vpop.f32.mrf.mxu1  ;;  %2070 = vst.msk [vmem:[%s4028_s8 + $0x1c8] sm:$0xf] %vm1955_vm3, %v1941_v10  ;;  %v1468_v36 = vpop.f32.mrf.mxu2 }
 0x2a7   : > { %v5098_v5 = vadd.f32 %v1669_v51, %v5959_v38  ;;  %2071 = vst.msk [vmem:[%s4028_s8 + $0x1cc] sm:$0xf] %vm1955_vm3, %v1942_v40  ;;  %v1797_v52 = vpop.f32.mrf.mxu3  ;;  %v2209_v11 = vadd.f32 %v2208_v7, %v2207_v23  ;;  %v2212_v40 = vsel %vm2084_vm4, %v5069_v15, 0.0  ;;  %v5962_v23 = vld [vmem:[#allocation15_spill] sm:$0xff]  ;;  %v5963_v15 = vld [vmem:[#allocation16_spill] sm:$0xff] }
 0x2a8   : > { %v1335_v25 = vpop.f32.mrf.mxu0  ;;  %v2218_v41 = vsel %vm2084_vm4, %v5963_v15, 0.0 }
 0x2a9   : > { %5960 = vst [vmem:[#allocation14_spill] sm:$0xff] %v5098_v5  ;;  %v1892_v63 = vpack.c.bf16 %v5098_v5, %v5098_v5  ;;  %v5108_v12 = vadd.f32 %v1664_v21, %v1335_v25  ;;  %v2214_v21 = vsel %vm2084_vm4, %v5098_v5, 0.0  ;;  %v5124_v25 = vadd.f32 %v1797_v52, %v1468_v36 }
 0x2ab   : > { %5961 = vst [vmem:[#allocation84_spill] sm:$0xff] %v5108_v12  ;;  %v1890_v10 = vpack.c.bf16 %v5108_v12, %v5108_v12  ;;  %v2210_v51 = vsel %vm2084_vm4, %v5108_v12, 0.0 }
 0x2ac   : > { %2021 = vst.msk [vmem:[%s4028_s8 + $0x104] sm:$0xf] %vm1955_vm3, %v1892_v63  ;;  %v2211_v38 = vadd.f32 %v2210_v51, %v2209_v11  ;;  %v2216_v63 = vsel %vm2084_vm4, %v5962_v23, 0.0  ;;  %v5967_v23 = vld [vmem:[#allocation23_spill] sm:$0xff] }
 0x2ad   : > { %2019 = vst.msk [vmem:[%s4028_s8 + $0xfc] sm:$0xf] %vm1955_vm3, %v1890_v10  ;;  %v1943_v10 = vpack.c.bf16 %v5124_v25, %v5124_v25  ;;  %v2226_v5 = vsel %vm2084_vm4, %v5967_v23, 0.0 }
 0x2ae   : > { %v2213_v54 = vadd.f32 %v2212_v40, %v2211_v38  ;;  %v1470_v7 = vpop.f32.mrf.mxu2 }
 0x2af   : > { %v1799_v12 = vpop.f32.mrf.mxu3  ;;  %2072 = vst.msk [vmem:[%s4028_s8 + $0x1d0] sm:$0xf] %vm1955_vm3, %v1943_v10 }
 0x2b0   : > { %v2215_v48 = vadd.f32 %v2214_v21, %v2213_v54  ;;  %v5126_v51 = vadd.f32 %v1799_v12, %v1470_v7  ;;  %v5964_v54 = vld [vmem:[#allocation17_spill] sm:$0xff]  ;;  %v5965_v12 = vld [vmem:[#allocation19_spill] sm:$0xff] }
 0x2b1   : > { %v2220_v21 = vsel %vm2084_vm4, %v5964_v54, 0.0  ;;  %v2222_v52 = vsel %vm2084_vm4, %v5965_v12, 0.0  ;;  %v5968_v54 = vld [vmem:[#allocation25_spill] sm:$0xff]  ;;  %v5970_v12 = vld [vmem:[#allocation27_spill] sm:$0xff] }
 0x2b2   : > { %v2217_v11 = vadd.f32 %v2216_v63, %v2215_v48  ;;  %v1944_v40 = vpack.c.bf16 %v5126_v51, %v5126_v51  ;;  %v5966_v63 = vld [vmem:[#allocation21_spill] sm:$0xff]  ;;  %v2228_v10 = vsel %vm2084_vm4, %v5968_v54, 0.0 }
 0x2b3   : > { %v2224_v15 = vsel %vm2084_vm4, %v5966_v63, 0.0  ;;  %v2232_v63 = vsel %vm2084_vm4, %v5970_v12, 0.0  ;;  %v5975_v12 = vld [vmem:[#allocation35_spill] sm:$0xff] }
 0x2b4   : > { %v2219_v38 = vadd.f32 %v2218_v41, %v2217_v11  ;;  %2073 = vst.msk [vmem:[%s4028_s8 + $0x1d4] sm:$0xf] %vm1955_vm3, %v1944_v40  ;;  %v5969_v40 = vld [vmem:[#allocation26_spill] sm:$0xff]  ;;  %v2242_v54 = vsel %vm2084_vm4, %v5975_v12, 0.0 }
 0x2b6   : > { %v2221_v36 = vadd.f32 %v2220_v21, %v2219_v38  ;;  %v1473_v7 = vpop.f32.mrf.mxu2  ;;  %v2230_v21 = vsel %vm2084_vm4, %v5969_v40, 0.0 }
 0x2b7   : > { %v1802_v41 = vpop.f32.mrf.mxu3 }
 0x2b8   : > { %v2223_v48 = vadd.f32 %v2222_v52, %v2221_v36  ;;  %v5152_v57 = vadd.f32 %v1802_v41, %v1473_v7 }
 0x2ba   : > { %v2225_v11 = vadd.f32 %v2224_v15, %v2223_v48 }
 0x2bc   : > { %v2227_v20 = vadd.f32 %v2226_v5, %v2225_v11  ;;  %v5971_v5 = vld [vmem:[#allocation28_spill] sm:$0xff] }
 0x2bd   : > { %v2234_v11 = vsel %vm2084_vm4, %v5971_v5, 0.0 }
 0x2be   : > { %v2229_v38 = vadd.f32 %v2228_v10, %v2227_v20  ;;  %v1475_v52 = vpop.f32.mrf.mxu2  ;;  %v1945_v20 = vpack.c.bf16 %v5152_v57, %v5152_v57 }
 0x2bf   : > { %v1804_v15 = vpop.f32.mrf.mxu3 }
 0x2c0   : > { %v2231_v36 = vadd.f32 %v2230_v21, %v2229_v38  ;;  %v5154_v23 = vadd.f32 %v1804_v15, %v1475_v52  ;;  %v5972_v21 = vld [vmem:[#allocation29_spill] sm:$0xff]  ;;  %2074 = vst.msk [vmem:[%s4028_s8 + $0x1d8] sm:$0xf] %vm1955_vm3, %v1945_v20 }
 0x2c1   : > { %v2236_v40 = vsel %vm2084_vm4, %v5972_v21, 0.0  ;;  %v5974_v15 = vld [vmem:[#allocation33_spill] sm:$0xff] }
 0x2c2   : > { %v2233_v48 = vadd.f32 %v2232_v63, %v2231_v36  ;;  %v1946_v38 = vpack.c.bf16 %v5154_v23, %v5154_v23  ;;  %v5973_v63 = vld [vmem:[#allocation31_spill] sm:$0xff]  ;;  %v2240_v5 = vsel %vm2084_vm4, %v5974_v15, 0.0  ;;  %v5976_v21 = vld [vmem:[#allocation37_spill] sm:$0xff] }
 0x2c3   : > { %v2238_v41 = vsel %vm2084_vm4, %v5973_v63, 0.0  ;;  %v5978_v63 = vld [vmem:[#allocation39_spill] sm:$0xff] }
 0x2c4   : > { %v2235_v10 = vadd.f32 %v2234_v11, %v2233_v48  ;;  %2075 = vst.msk [vmem:[%s4028_s8 + $0x1dc] sm:$0xf] %vm1955_vm3, %v1946_v38  ;;  %v2248_v15 = vsel %vm2084_vm4, %v5978_v63, 0.0  ;;  %v5983_v63 = vld [vmem:[#allocation47_spill] sm:$0xff] }
 0x2c6   : > { %v2237_v7 = vadd.f32 %v2236_v40, %v2235_v10  ;;  %v1478_v52 = vpop.f32.mrf.mxu2  ;;  %v2244_v40 = vsel %vm2084_vm4, %v5976_v21, 0.0  ;;  %v5977_v10 = vld [vmem:[#allocation38_spill] sm:$0xff]  ;;  %v2258_v21 = vsel %vm2084_vm4, %v5983_v63, 0.0 }
 0x2c7   : > { %v1807_v48 = vpop.f32.mrf.mxu3  ;;  %v2246_v38 = vsel %vm2084_vm4, %v5977_v10, 0.0 }
 0x2c8   : > { %v2239_v36 = vadd.f32 %v2238_v41, %v2237_v7  ;;  %v5180_v34 = vadd.f32 %v1807_v48, %v1478_v52 }
 0x2ca   : > { %v2241_v11 = vadd.f32 %v2240_v5, %v2239_v36 }
 0x2cc   : > { %v2243_v31 = vadd.f32 %v2242_v54, %v2241_v11  ;;  %v5979_v54 = vld [vmem:[#allocation40_spill] sm:$0xff] }
 0x2cd   : > { %v2250_v11 = vsel %vm2084_vm4, %v5979_v54, 0.0 }
 0x2ce   : > { %v2245_v20 = vadd.f32 %v2244_v40, %v2243_v31  ;;  %v1480_v41 = vpop.f32.mrf.mxu2  ;;  %v1947_v31 = vpack.c.bf16 %v5180_v34, %v5180_v34 }
 0x2cf   : > { %v1809_v5 = vpop.f32.mrf.mxu3 }
 0x2d0   : > { %v2247_v7 = vadd.f32 %v2246_v38, %v2245_v20  ;;  %v5182_v12 = vadd.f32 %v1809_v5, %v1480_v41  ;;  %v5980_v38 = vld [vmem:[#allocation41_spill] sm:$0xff]  ;;  %2076 = vst.msk [vmem:[%s4028_s8 + $0x1e0] sm:$0xf] %vm1955_vm3, %v1947_v31 }
 0x2d1   : > { %v2252_v10 = vsel %vm2084_vm4, %v5980_v38, 0.0  ;;  %v5982_v5 = vld [vmem:[#allocation45_spill] sm:$0xff] }
 0x2d2   : > { %v2249_v36 = vadd.f32 %v2248_v15, %v2247_v7  ;;  %v1948_v20 = vpack.c.bf16 %v5182_v12, %v5182_v12  ;;  %v5981_v15 = vld [vmem:[#allocation43_spill] sm:$0xff]  ;;  %v2256_v54 = vsel %vm2084_vm4, %v5982_v5, 0.0  ;;  %v5984_v38 = vld [vmem:[#allocation49_spill] sm:$0xff] }
 0x2d3   : > { %v2254_v48 = vsel %vm2084_vm4, %v5981_v15, 0.0  ;;  %v5986_v15 = vld [vmem:[#allocation51_spill] sm:$0xff] }
 0x2d4   : > { %v2251_v40 = vadd.f32 %v2250_v11, %v2249_v36  ;;  %2077 = vst.msk [vmem:[%s4028_s8 + $0x1e4] sm:$0xf] %vm1955_vm3, %v1948_v20  ;;  %v2264_v5 = vsel %vm2084_vm4, %v5986_v15, 0.0  ;;  %v5993_v15 = vld [vmem:[#allocation57_spill] sm:$0xff] }
 0x2d6   : > { %v2253_v52 = vadd.f32 %v2252_v10, %v2251_v40  ;;  %v1483_v41 = vpop.f32.mrf.mxu2  ;;  %v2260_v10 = vsel %vm2084_vm4, %v5984_v38, 0.0  ;;  %v5985_v40 = vld [vmem:[#allocation50_spill] sm:$0xff]  ;;  %v2274_v38 = vsel %vm2084_vm4, %v5993_v15, 0.0 }
 0x2d7   : > { %v1812_v36 = vpop.f32.mrf.mxu3  ;;  %v2262_v20 = vsel %vm2084_vm4, %v5985_v40, 0.0 }
 0x2d8   : > { %v2255_v7 = vadd.f32 %v2254_v48, %v2253_v52  ;;  %v5208_v29 = vadd.f32 %v1812_v36, %v1483_v41 }
 0x2da   : > { %v2257_v11 = vadd.f32 %v2256_v54, %v2255_v7  ;;  %5987 = vst [vmem:[#allocation85_spill] sm:$0xff] %v5208_v29 }
 0x2dc   : > { %v2259_v46 = vadd.f32 %v2258_v21, %v2257_v11  ;;  %v5989_v21 = vld [vmem:[#allocation52_spill] sm:$0xff] }
 0x2dd   : > { %v2266_v11 = vsel %vm2084_vm4, %v5989_v21, 0.0 }
 0x2de   : > { %v2261_v31 = vadd.f32 %v2260_v10, %v2259_v46  ;;  %v1485_v48 = vpop.f32.mrf.mxu2  ;;  %v1949_v46 = vpack.c.bf16 %v5208_v29, %v5208_v29 }
 0x2df   : > { %v1814_v54 = vpop.f32.mrf.mxu3 }
 0x2e0   : > { %v2263_v52 = vadd.f32 %v2262_v20, %v2261_v31  ;;  %v5210_v63 = vadd.f32 %v1814_v54, %v1485_v48  ;;  %v5990_v20 = vld [vmem:[#allocation53_spill] sm:$0xff]  ;;  %2078 = vst.msk [vmem:[%s4028_s8 + $0x1e8] sm:$0xf] %vm1955_vm3, %v1949_v46  ;;  %v5992_v54 = vld [vmem:[#allocation56_spill] sm:$0xff] }
 0x2e1   : > { %v2268_v40 = vsel %vm2084_vm4, %v5990_v20, 0.0  ;;  %v2272_v21 = vsel %vm2084_vm4, %v5992_v54, 0.0  ;;  %v5994_v20 = vld [vmem:[#allocation58_spill] sm:$0xff] }
 0x2e2   : > { %v2265_v7 = vadd.f32 %v2264_v5, %v2263_v52  ;;  %5988 = vst [vmem:[#allocation86_spill] sm:$0xff] %v5210_v63  ;;  %v1950_v31 = vpack.c.bf16 %v5210_v63, %v5210_v63  ;;  %v5991_v5 = vld [vmem:[#allocation54_spill] sm:$0xff] }
 0x2e3   : > { %v2270_v36 = vsel %vm2084_vm4, %v5991_v5, 0.0  ;;  %v5996_v5 = vld [vmem:[#allocation62_spill] sm:$0xff] }
 0x2e4   : > { %v2267_v10 = vadd.f32 %v2266_v11, %v2265_v7  ;;  %2079 = vst.msk [vmem:[%s4028_s8 + $0x1ec] sm:$0xf] %vm1955_vm3, %v1950_v31  ;;  %v2280_v54 = vsel %vm2084_vm4, %v5996_v5, 0.0 }
 0x2e6   : > { %v2269_v41 = vadd.f32 %v2268_v40, %v2267_v10  ;;  %v1488_v48 = vpop.f32.mrf.mxu2  ;;  %v2276_v40 = vsel %vm2084_vm4, %v5994_v20, 0.0  ;;  %v5995_v10 = vld [vmem:[#allocation60_spill] sm:$0xff] }
 0x2e7   : > { %v1817_v7 = vpop.f32.mrf.mxu3  ;;  %v2278_v31 = vsel %vm2084_vm4, %v5995_v10, 0.0 }
 0x2e8   : > { %v2271_v52 = vadd.f32 %v2270_v36, %v2269_v41  ;;  %v5236_v37 = vadd.f32 %v1817_v7, %v1488_v48 }
 0x2ea   : > { %v2273_v11 = vadd.f32 %v2272_v21, %v2271_v52  ;;  %5997 = vst [vmem:[#allocation58_spill] sm:$0xff] %v5236_v37 }
 0x2ec   : > { %v2275_v16 = vadd.f32 %v2274_v38, %v2273_v11  ;;  %v5999_v38 = vld [vmem:[#allocation64_spill] sm:$0xff] }
 0x2ed   : > { %v2282_v11 = vsel %vm2084_vm4, %v5999_v38, 0.0 }
 0x2ee   : > { %v2277_v46 = vadd.f32 %v2276_v40, %v2275_v16  ;;  %v1490_v36 = vpop.f32.mrf.mxu2  ;;  %v1951_v16 = vpack.c.bf16 %v5236_v37, %v5236_v37 }
 0x2ef   : > { %v1819_v21 = vpop.f32.mrf.mxu3 }
 0x2f0   : > { %v2279_v41 = vadd.f32 %v2278_v31, %v2277_v46  ;;  %v5238_v15 = vadd.f32 %v1819_v21, %v1490_v36  ;;  %v6000_v31 = vld [vmem:[#allocation66_spill] sm:$0xff]  ;;  %2080 = vst.msk [vmem:[%s4028_s8 + $0x1f0] sm:$0xf] %vm1955_vm3, %v1951_v16  ;;  %v2288_v36 = vsel %vm2084_vm4, %v4808_v55, 0.0 }
 0x2f1   : > { %v2284_v10 = vsel %vm2084_vm4, %v6000_v31, 0.0 }
 0x2f2   : > { %v2281_v52 = vadd.f32 %v2280_v54, %v2279_v41  ;;  %5998 = vst [vmem:[#allocation62_spill] sm:$0xff] %v5238_v15  ;;  %v1952_v46 = vpack.c.bf16 %v5238_v15, %v5238_v15  ;;  %v2286_v54 = vsel %vm2084_vm4, %v4775_v28, 0.0 }
 0x2f4   : > { %v2283_v40 = vadd.f32 %v2282_v11, %v2281_v52  ;;  %2081 = vst.msk [vmem:[%s4028_s8 + $0x1f4] sm:$0xf] %vm1955_vm3, %v1952_v46  ;;  %v2290_v11 = vsel %vm2084_vm4, %v4820_v58, 0.0 }
 0x2f6   : > { %v2285_v48 = vadd.f32 %v2284_v10, %v2283_v40  ;;  %v1493_v41 = vpop.f32.mrf.mxu2  ;;  %v2292_v10 = vsel %vm2084_vm4, %v4853_v62, 0.0  ;;  %v2294_v40 = vsel %vm2084_vm4, %v4865_v17, 0.0 }
 0x2f7   : > { %v1822_v21 = vpop.f32.mrf.mxu3 }
 0x2f8   : > { %v2287_v7 = vadd.f32 %v2286_v54, %v2285_v48  ;;  %v2296_v54 = vsel %vm2084_vm4, %v4898_v32, 0.0  ;;  %v5264_v55 = vadd.f32 %v1822_v21, %v1493_v41  ;;  %v2300_v41 = vsel %vm2084_vm4, %v4943_v6, 0.0 }
 0x2fa   : > { %v2289_v52 = vadd.f32 %v2288_v36, %v2287_v7  ;;  %6001 = vst [vmem:[#allocation64_spill] sm:$0xff] %v5264_v55 }
 0x2fc   : > { %v2291_v31 = vadd.f32 %v2290_v11, %v2289_v52  ;;  %v2298_v52 = vsel %vm2084_vm4, %v4910_v33, 0.0 }
 0x2fe   : > { %v2293_v16 = vadd.f32 %v2292_v10, %v2291_v31  ;;  %v1495_v48 = vpop.f32.mrf.mxu2  ;;  %v1953_v31 = vpack.c.bf16 %v5264_v55, %v5264_v55 }
 0x2ff   : > { %v1824_v7 = vpop.f32.mrf.mxu3 }
 0x300   : > { %v2295_v46 = vadd.f32 %v2294_v40, %v2293_v16  ;;  %v5266_v58 = vadd.f32 %v1824_v7, %v1495_v48  ;;  %2082 = vst.msk [vmem:[%s4028_s8 + $0x1f8] sm:$0xf] %vm1955_vm3, %v1953_v31  ;;  %v2302_v16 = vsel %vm2084_vm4, %v4955_v22, 0.0  ;;  %v2310_v31 = vsel %vm2084_vm4, %v5036_v3, 0.0 }
 0x302   : > { %v2297_v36 = vadd.f32 %v2296_v54, %v2295_v46  ;;  %6002 = vst [vmem:[#allocation87_spill] sm:$0xff] %v5266_v58  ;;  %v1954_v10 = vpack.c.bf16 %v5266_v58, %v5266_v58  ;;  %v2304_v46 = vsel %vm2084_vm4, %v4988_v53, 0.0  ;;  %v2306_v54 = vsel %vm2084_vm4, %v5000_v42, 0.0 }
 0x304   : > { %v2299_v11 = vadd.f32 %v2298_v52, %v2297_v36  ;;  %2083 = vst.msk [vmem:[%s4028_s8 + $0x1fc] sm:$0xf] %vm1955_vm3, %v1954_v10  ;;  %v2308_v36 = vsel %vm2084_vm4, %v5034_v49, 0.0  ;;  %v2312_v10 = vsel %vm2084_vm4, %v5079_v26, 0.0 }
 0x306   : > { %v2301_v21 = vadd.f32 %v2300_v41, %v2299_v11 }
 0x308   : > { %v2303_v40 = vadd.f32 %v2302_v16, %v2301_v21  ;;  %v2314_v21 = vsel %vm2084_vm4, %v5083_v9, 0.0 }
 0x30a   : > { %v2305_v48 = vadd.f32 %v2304_v46, %v2303_v40  ;;  %v2316_v40 = vsel %vm2084_vm4, %v5124_v25, 0.0 }
 0x30c   : > { %v2307_v7 = vadd.f32 %v2306_v54, %v2305_v48  ;;  %v2318_v48 = vsel %vm2084_vm4, %v5126_v51, 0.0 }
 0x30e   : > { %v2309_v52 = vadd.f32 %v2308_v36, %v2307_v7  ;;  %v2320_v7 = vsel %vm2084_vm4, %v5152_v57, 0.0 }
 0x310   : > { %v2311_v11 = vadd.f32 %v2310_v31, %v2309_v52  ;;  %v2322_v52 = vsel %vm2084_vm4, %v5154_v23, 0.0 }
 0x312   : > { %v2313_v41 = vadd.f32 %v2312_v10, %v2311_v11  ;;  %v2324_v11 = vsel %vm2084_vm4, %v5180_v34, 0.0 }
 0x314   : > { %v2315_v16 = vadd.f32 %v2314_v21, %v2313_v41  ;;  %v2326_v41 = vsel %vm2084_vm4, %v5182_v12, 0.0 }
 0x316   : > { %v2317_v46 = vadd.f32 %v2316_v40, %v2315_v16  ;;  %v2328_v16 = vsel %vm2084_vm4, %v5208_v29, 0.0 }
 0x318   : > { %v2319_v54 = vadd.f32 %v2318_v48, %v2317_v46  ;;  %v2330_v46 = vsel %vm2084_vm4, %v5210_v63, 0.0 }
 0x31a   : > { %v2321_v36 = vadd.f32 %v2320_v7, %v2319_v54  ;;  %v2332_v54 = vsel %vm2084_vm4, %v5236_v37, 0.0 }
 0x31c   : > { %v2323_v31 = vadd.f32 %v2322_v52, %v2321_v36  ;;  %v2334_v36 = vsel %vm2084_vm4, %v5238_v15, 0.0 }
 0x31e   : > { %v2325_v10 = vadd.f32 %v2324_v11, %v2323_v31  ;;  %v2336_v31 = vsel %vm2084_vm4, %v5264_v55, 0.0 }
 0x320   : > { %v2327_v21 = vadd.f32 %v2326_v41, %v2325_v10  ;;  %v2338_v10 = vsel %vm2084_vm4, %v5266_v58, 0.0 }
 0x322   : > { %v2329_v40 = vadd.f32 %v2328_v16, %v2327_v21 }
 0x324   : > { %v2331_v48 = vadd.f32 %v2330_v46, %v2329_v40 }
 0x326   : > { %v2333_v7 = vadd.f32 %v2332_v54, %v2331_v48  ;;  %v6003_v54 = vld [vmem:[#allocation5_spill] sm:$0xff] }
 0x328   : > { %v2335_v52 = vadd.f32 %v2334_v36, %v2333_v7  ;;  %v6004_v36 = vld [vmem:[#allocation6_spill] sm:$0xff] }
 0x32a   : > { %v2337_v11 = vadd.f32 %v2336_v31, %v2335_v52  ;;  %v6005_v31 = vld [vmem:[#allocation7_spill] sm:$0xff] }
 0x32c   : > { %v2339_v41 = vadd.f32 %v2338_v10, %v2337_v11  ;;  %v6006_v11 = vld [vmem:[#allocation8_spill] sm:$0xff] }
 0x32e   : > { %v2340_v21 = vrot.slane %v2339_v41, 4 }
 0x330   : > { %v2341_v16 = vadd.f32 %v2340_v21, %v2339_v41 }
 0x332   : > { %v2342_v63 = vrot.slane %v2341_v16, 2 }
 0x334   : > { %v2343_v40 = vadd.f32 %v2342_v63, %v2341_v16 }
 0x336   : > { %v2344_v46 = vrot.slane %v2343_v40, 1 }
 0x338   : > { %v5318_v29 = vadd.f32 %v2344_v46, %v2343_v40 }
 0x33a   : > { %v5321_v48 = vmul.f32 0.0009765625, %v5318_v29  ;;  %2476 = vst.msk [vmem:[%s5394_s10] sm:$0x1] %vm2475_vm5, %v5318_v29 }
 0x33c   : > { %v2347_v7 = vsub.f32 %v6003_v54, %v5321_v48  ;;  %v2348_v52 = vsub.f32 %v6004_v36, %v5321_v48  ;;  %v2349_v58 = vsub.f32 %v6005_v31, %v5321_v48  ;;  %v2350_v10 = vsub.f32 %v6006_v11, %v5321_v48 }
 0x33d   : > { %v2351_v21 = vsub.f32 %v4072_v4, %v5321_v48  ;;  %v2352_v40 = vsub.f32 %v4083_v14, %v5321_v48  ;;  %v2353_v31 = vsub.f32 %v4094_v24, %v5321_v48  ;;  %v2354_v4 = vsub.f32 %v4105_v35, %v5321_v48  ;;  %v6008_v24 = vld [vmem:[#allocation10_spill] sm:$0xff]  ;;  %v6009_v35 = vld [vmem:[#allocation11_spill] sm:$0xff] }
 0x33e   : > { %v2477_v41 = vmul.f32 %v2347_v7, %v2347_v7  ;;  %v2478_v63 = vmul.f32 %v2348_v52, %v2348_v52  ;;  %v2479_v16 = vmul.f32 %v2349_v58, %v2349_v58  ;;  %v2480_v46 = vmul.f32 %v2350_v10, %v2350_v10  ;;  %v6007_v10 = vld [vmem:[#allocation9_spill] sm:$0xff] }
 0x33f   : > { %v2481_v15 = vmul.f32 %v2351_v21, %v2351_v21  ;;  %v2482_v58 = vmul.f32 %v2352_v40, %v2352_v40  ;;  %v2483_v37 = vmul.f32 %v2353_v31, %v2353_v31  ;;  %v2356_v21 = vsub.f32 %v6008_v24, %v5321_v48 }
 0x340   : > { %v2605_v54 = vsel %vm2084_vm4, %v2477_v41, 0.0  ;;  %v2606_v36 = vsel %vm2084_vm4, %v2478_v63, 0.0  ;;  %v2608_v7 = vsel %vm2084_vm4, %v2479_v16, 0.0  ;;  %v2610_v11 = vsel %vm2084_vm4, %v2480_v46, 0.0 }
 0x341   : > { %v2607_v55 = vadd.f32 %v2606_v36, %v2605_v54  ;;  %v2355_v41 = vsub.f32 %v6007_v10, %v5321_v48  ;;  %v2612_v63 = vsel %vm2084_vm4, %v2481_v15, 0.0  ;;  %v2484_v36 = vmul.f32 %v2354_v4, %v2354_v4 }
 0x342   : > { %v2357_v40 = vsub.f32 %v6009_v35, %v5321_v48  ;;  %v2616_v46 = vsel %vm2084_vm4, %v2483_v37, 0.0  ;;  %v2486_v10 = vmul.f32 %v2356_v21, %v2356_v21  ;;  %v2359_v4 = vsub.f32 %v4164_v30, %v5321_v48 }
 0x343   : > { %v2609_v52 = vadd.f32 %v2608_v7, %v2607_v55  ;;  %v2614_v55 = vsel %vm2084_vm4, %v2482_v58, 0.0  ;;  %v2485_v7 = vmul.f32 %v2355_v41, %v2355_v41  ;;  %v2618_v15 = vsel %vm2084_vm4, %v2484_v36, 0.0 }
 0x344   : > { %v2360_v41 = vsub.f32 %v4175_v43, %v5321_v48  ;;  %v2622_v37 = vsel %vm2084_vm4, %v2486_v10, 0.0  ;;  %v2361_v21 = vsub.f32 %v4190_v61, %v5321_v48  ;;  %v2362_v30 = vsub.f32 %v4209_v13, %v5321_v48  ;;  %v6011_v43 = vld [vmem:[#allocation18_spill] sm:$0xff]  ;;  %v6012_v61 = vld [vmem:[#allocation20_spill] sm:$0xff] }
 0x345   : > { %v2611_v14 = vadd.f32 %v2610_v11, %v2609_v52  ;;  %v6010_v11 = vld [vmem:[#allocation13_spill] sm:$0xff]  ;;  %v2620_v58 = vsel %vm2084_vm4, %v2485_v7, 0.0 }
 0x346   : > { %v2358_v31 = vsub.f32 %v6010_v11, %v5321_v48  ;;  %v2491_v11 = vmul.f32 %v2361_v21, %v2361_v21 }
 0x347   : > { %v2613_v54 = vadd.f32 %v2612_v63, %v2611_v14  ;;  %v2487_v63 = vmul.f32 %v2357_v40, %v2357_v40  ;;  %v2490_v40 = vmul.f32 %v2360_v41, %v2360_v41 }
 0x348   : > { %v2488_v24 = vmul.f32 %v2358_v31, %v2358_v31  ;;  %v2632_v41 = vsel %vm2084_vm4, %v2491_v11, 0.0 }
 0x349   : > { %v2615_v16 = vadd.f32 %v2614_v55, %v2613_v54  ;;  %v2624_v36 = vsel %vm2084_vm4, %v2487_v63, 0.0  ;;  %v6013_v63 = vld [vmem:[#allocation22_spill] sm:$0xff] }
 0x34a   : > { %v2626_v7 = vsel %vm2084_vm4, %v2488_v24, 0.0 }
 0x34b   : > { %v2617_v52 = vadd.f32 %v2616_v46, %v2615_v16  ;;  %v2489_v16 = vmul.f32 %v2359_v4, %v2359_v4  ;;  %v2630_v4 = vsel %vm2084_vm4, %v2490_v40, 0.0 }
 0x34d   : > { %v2619_v14 = vadd.f32 %v2618_v15, %v2617_v52  ;;  %v2363_v52 = vsub.f32 %v6011_v43, %v5321_v48  ;;  %v2628_v31 = vsel %vm2084_vm4, %v2489_v16, 0.0  ;;  %v2364_v15 = vsub.f32 %v6012_v61, %v5321_v48 }
 0x34f   : > { %v2621_v54 = vadd.f32 %v2620_v58, %v2619_v14  ;;  %v2492_v14 = vmul.f32 %v2362_v30, %v2362_v30  ;;  %v2365_v58 = vsub.f32 %v6013_v63, %v5321_v48  ;;  %v2494_v21 = vmul.f32 %v2364_v15, %v2364_v15 }
 0x350   : > { %v2370_v15 = vsub.f32 %v4345_v2, %v5321_v48  ;;  %v6016_v2 = vld [vmem:[#allocation32_spill] sm:$0xff] }
 0x351   : > { %v2623_v55 = vadd.f32 %v2622_v37, %v2621_v54  ;;  %v2493_v54 = vmul.f32 %v2363_v52, %v2363_v52  ;;  %v6014_v37 = vld [vmem:[#allocation24_spill] sm:$0xff]  ;;  %v2634_v16 = vsel %vm2084_vm4, %v2492_v14, 0.0  ;;  %v2495_v30 = vmul.f32 %v2365_v58, %v2365_v58 }
 0x352   : > { %v2638_v52 = vsel %vm2084_vm4, %v2494_v21, 0.0  ;;  %v6017_v21 = vld [vmem:[#allocation34_spill] sm:$0xff] }
 0x353   : > { %v2625_v35 = vadd.f32 %v2624_v36, %v2623_v55  ;;  %v2366_v55 = vsub.f32 %v6014_v37, %v5321_v48  ;;  %v2636_v40 = vsel %vm2084_vm4, %v2493_v54, 0.0  ;;  %v2640_v61 = vsel %vm2084_vm4, %v2495_v30, 0.0  ;;  %v6018_v30 = vld [vmem:[#allocation36_spill] sm:$0xff] }
 0x355   : > { %v2627_v46 = vadd.f32 %v2626_v7, %v2625_v35  ;;  %v2367_v35 = vsub.f32 %v4292_v56, %v5321_v48  ;;  %v2496_v43 = vmul.f32 %v2366_v55, %v2366_v55 }
 0x357   : > { %v2629_v10 = vadd.f32 %v2628_v31, %v2627_v46  ;;  %v2368_v46 = vsub.f32 %v4311_v19, %v5321_v48  ;;  %v2369_v31 = vsub.f32 %v4326_v44, %v5321_v48  ;;  %v6015_v19 = vld [vmem:[#allocation30_spill] sm:$0xff] }
 0x358   : > { %v2371_v44 = vsub.f32 %v6015_v19, %v5321_v48 }
 0x359   : > { %v2631_v13 = vadd.f32 %v2630_v4, %v2629_v10  ;;  %v2497_v10 = vmul.f32 %v2367_v35, %v2367_v35  ;;  %v2498_v14 = vmul.f32 %v2368_v46, %v2368_v46  ;;  %v2642_v4 = vsel %vm2084_vm4, %v2496_v43, 0.0 }
 0x35a   : > { %v2499_v63 = vmul.f32 %v2369_v31, %v2369_v31 }
 0x35b   : > { %v2633_v24 = vadd.f32 %v2632_v41, %v2631_v13  ;;  %v2644_v58 = vsel %vm2084_vm4, %v2497_v10, 0.0  ;;  %v2372_v41 = vsub.f32 %v6016_v2, %v5321_v48  ;;  %v2646_v37 = vsel %vm2084_vm4, %v2498_v14, 0.0 }
 0x35c   : > { %v2648_v29 = vsel %vm2084_vm4, %v2499_v63, 0.0 }
 0x35d   : > { %v2635_v36 = vadd.f32 %v2634_v16, %v2633_v24  ;;  %v2500_v24 = vmul.f32 %v2370_v15, %v2370_v15  ;;  %v2373_v16 = vsub.f32 %v6017_v21, %v5321_v48 }
 0x35f   : > { %v2637_v7 = vadd.f32 %v2636_v40, %v2635_v36  ;;  %v2501_v36 = vmul.f32 %v2371_v44, %v2371_v44  ;;  %v2374_v40 = vsub.f32 %v6018_v30, %v5321_v48  ;;  %v2650_v46 = vsel %vm2084_vm4, %v2500_v24, 0.0 }
 0x361   : > { %v2639_v11 = vadd.f32 %v2638_v52, %v2637_v7  ;;  %v2502_v7 = vmul.f32 %v2372_v41, %v2372_v41  ;;  %v2375_v52 = vsub.f32 %v4428_v8, %v5321_v48  ;;  %v2652_v31 = vsel %vm2084_vm4, %v2501_v36, 0.0 }
 0x362   : > { %v2378_v8 = vsub.f32 %v4481_v18, %v5321_v48  ;;  %v6021_v18 = vld [vmem:[#allocation46_spill] sm:$0xff] }
 0x363   : > { %v2641_v56 = vadd.f32 %v2640_v61, %v2639_v11  ;;  %v2503_v11 = vmul.f32 %v2373_v16, %v2373_v16  ;;  %v2376_v61 = vsub.f32 %v4447_v1, %v5321_v48  ;;  %v2654_v15 = vsel %vm2084_vm4, %v2502_v7, 0.0  ;;  %v6019_v1 = vld [vmem:[#allocation42_spill] sm:$0xff]  ;;  %v6022_v7 = vld [vmem:[#allocation48_spill] sm:$0xff] }
 0x364   : > { %v2379_v2 = vsub.f32 %v6019_v1, %v5321_v48  ;;  %v2508_v21 = vmul.f32 %v2378_v8, %v2378_v8 }
 0x365   : > { %v2643_v13 = vadd.f32 %v2642_v4, %v2641_v56  ;;  %v2504_v56 = vmul.f32 %v2374_v40, %v2374_v40  ;;  %v2377_v4 = vsub.f32 %v4462_v47, %v5321_v48  ;;  %v2656_v19 = vsel %vm2084_vm4, %v2503_v11, 0.0  ;;  %v6020_v47 = vld [vmem:[#allocation44_spill] sm:$0xff] }
 0x366   : > { %v2506_v63 = vmul.f32 %v2376_v61, %v2376_v61 }
 0x367   : > { %v2645_v54 = vadd.f32 %v2644_v58, %v2643_v13  ;;  %v2505_v13 = vmul.f32 %v2375_v52, %v2375_v52  ;;  %v2658_v58 = vsel %vm2084_vm4, %v2504_v56, 0.0  ;;  %v2507_v41 = vmul.f32 %v2377_v4, %v2377_v4 }
 0x368   : > { %v2662_v16 = vsel %vm2084_vm4, %v2506_v63, 0.0  ;;  %v2666_v52 = vsel %vm2084_vm4, %v2508_v21, 0.0 }
 0x369   : > { %v2647_v55 = vadd.f32 %v2646_v37, %v2645_v54  ;;  %v2660_v24 = vsel %vm2084_vm4, %v2505_v13, 0.0  ;;  %v2664_v30 = vsel %vm2084_vm4, %v2507_v41, 0.0 }
 0x36b   : > { %v2649_v35 = vadd.f32 %v2648_v29, %v2647_v55  ;;  %v2380_v55 = vsub.f32 %v6020_v47, %v5321_v48  ;;  %v2381_v29 = vsub.f32 %v6021_v18, %v5321_v48 }
 0x36d   : > { %v2651_v43 = vadd.f32 %v2650_v46, %v2649_v35  ;;  %v2509_v35 = vmul.f32 %v2379_v2, %v2379_v2  ;;  %v2382_v46 = vsub.f32 %v6022_v7, %v5321_v48 }
 0x36f   : > { %v2653_v10 = vadd.f32 %v2652_v31, %v2651_v43  ;;  %v2510_v43 = vmul.f32 %v2380_v55, %v2380_v55  ;;  %v2383_v31 = vsub.f32 %v4564_v59, %v5321_v48  ;;  %v2668_v61 = vsel %vm2084_vm4, %v2509_v35, 0.0 }
 0x370   : > { %v2386_v59 = vsub.f32 %v4617_v27, %v5321_v48  ;;  %v2389_v27 = vsub.f32 %v4666_v60, %v5321_v48  ;;  %v6025_v60 = vld [vmem:[#allocation61_spill] sm:$0xff] }
 0x371   : > { %v2655_v14 = vadd.f32 %v2654_v15, %v2653_v10  ;;  %v2511_v10 = vmul.f32 %v2381_v29, %v2381_v29  ;;  %v2384_v15 = vsub.f32 %v4583_v0, %v5321_v48  ;;  %v2670_v4 = vsel %vm2084_vm4, %v2510_v43, 0.0 }
 0x372   : > { %v2387_v0 = vsub.f32 %v4632_v50, %v5321_v48  ;;  %v2516_v47 = vmul.f32 %v2386_v59, %v2386_v59  ;;  %v2390_v50 = vsub.f32 %v4685_v39, %v5321_v48  ;;  %v6026_v39 = vld [vmem:[#allocation63_spill] sm:$0xff] }
 0x373   : > { %v2657_v44 = vadd.f32 %v2656_v19, %v2655_v14  ;;  %v2512_v14 = vmul.f32 %v2382_v46, %v2382_v46  ;;  %v2385_v19 = vsub.f32 %v4598_v45, %v5321_v48  ;;  %v2672_v8 = vsel %vm2084_vm4, %v2511_v10, 0.0  ;;  %v6023_v45 = vld [vmem:[#allocation55_spill] sm:$0xff] }
 0x374   : > { %v2682_v35 = vsel %vm2084_vm4, %v2516_v47, 0.0  ;;  %v2519_v46 = vmul.f32 %v2389_v27, %v2389_v27  ;;  %v6028_v59 = vld [vmem:[#allocation67_spill] sm:$0xff]  ;;  %v6030_v47 = vld [vmem:[#allocation70_spill] sm:$0xff] }
 0x375   : > { %v2659_v54 = vadd.f32 %v2658_v58, %v2657_v44  ;;  %v2513_v44 = vmul.f32 %v2383_v31, %v2383_v31  ;;  %v2514_v58 = vmul.f32 %v2384_v15, %v2384_v15  ;;  %v2515_v2 = vmul.f32 %v2385_v19, %v2385_v19 }
 0x376   : > { %v2520_v31 = vmul.f32 %v2390_v50, %v2390_v50 }
 0x377   : > { %v2661_v37 = vadd.f32 %v2660_v24, %v2659_v54  ;;  %v2674_v54 = vsel %vm2084_vm4, %v2512_v14, 0.0  ;;  %v2676_v41 = vsel %vm2084_vm4, %v2513_v44, 0.0  ;;  %v2678_v55 = vsel %vm2084_vm4, %v2514_v58, 0.0 }
 0x378   : > { %v2688_v14 = vsel %vm2084_vm4, %v2519_v46, 0.0  ;;  %v2395_v58 = vsub.f32 %v6028_v59, %v5321_v48 }
 0x379   : > { %v2663_v36 = vadd.f32 %v2662_v16, %v2661_v37  ;;  %v2388_v37 = vsub.f32 %v6023_v45, %v5321_v48  ;;  %v2517_v16 = vmul.f32 %v2387_v0, %v2387_v0 }
 0x37b   : > { %v2665_v40 = vadd.f32 %v2664_v30, %v2663_v36  ;;  %v2680_v36 = vsel %vm2084_vm4, %v2515_v2, 0.0  ;;  %v2518_v29 = vmul.f32 %v2388_v37, %v2388_v37  ;;  %v2684_v43 = vsel %vm2084_vm4, %v2517_v16, 0.0  ;;  %v6029_v2 = vld [vmem:[#allocation68_spill] sm:$0xff] }
 0x37d   : > { %v2667_v11 = vadd.f32 %v2666_v52, %v2665_v40  ;;  %v6024_v40 = vld [vmem:[#allocation59_spill] sm:$0xff]  ;;  %v2686_v10 = vsel %vm2084_vm4, %v2518_v29, 0.0 }
 0x37e   : > { %v2391_v7 = vsub.f32 %v6024_v40, %v5321_v48 }
 0x37f   : > { %v2669_v56 = vadd.f32 %v2668_v61, %v2667_v11  ;;  %v2392_v11 = vsub.f32 %v6025_v60, %v5321_v48 }
 0x380   : > { %v2521_v15 = vmul.f32 %v2391_v7, %v2391_v7 }
 0x381   : > { %v2671_v13 = vadd.f32 %v2670_v4, %v2669_v56  ;;  %v2393_v56 = vsub.f32 %v6026_v39, %v5321_v48  ;;  %v2522_v44 = vmul.f32 %v2392_v11, %v2392_v11 }
 0x383   : > { %v2673_v63 = vadd.f32 %v2672_v8, %v2671_v13  ;;  %v6027_v13 = vld [vmem:[#allocation65_spill] sm:$0xff]  ;;  %v2690_v8 = vsel %vm2084_vm4, %v2520_v31, 0.0  ;;  %v2694_v45 = vsel %vm2084_vm4, %v2522_v44, 0.0 }
 0x384   : > { %v2394_v19 = vsub.f32 %v6027_v13, %v5321_v48 }
 0x385   : > { %v2675_v1 = vadd.f32 %v2674_v54, %v2673_v63  ;;  %v2523_v54 = vmul.f32 %v2393_v56, %v2393_v56 }
 0x387   : > { %v2677_v24 = vadd.f32 %v2676_v41, %v2675_v1  ;;  %v2692_v1 = vsel %vm2084_vm4, %v2521_v15, 0.0  ;;  %v2396_v41 = vsub.f32 %v6029_v2, %v5321_v48  ;;  %v2696_v27 = vsel %vm2084_vm4, %v2523_v54, 0.0 }
 0x389   : > { %v2679_v21 = vadd.f32 %v2678_v55, %v2677_v24  ;;  %v2524_v24 = vmul.f32 %v2394_v19, %v2394_v19  ;;  %v2397_v55 = vsub.f32 %v6030_v47, %v5321_v48  ;;  %v2526_v50 = vmul.f32 %v2396_v41, %v2396_v41 }
 0x38b   : > { %v2681_v18 = vadd.f32 %v2680_v36, %v2679_v21  ;;  %v2525_v21 = vmul.f32 %v2395_v58, %v2395_v58  ;;  %v6031_v36 = vld [vmem:[#allocation72_spill] sm:$0xff]  ;;  %v2698_v29 = vsel %vm2084_vm4, %v2524_v24, 0.0  ;;  %v2527_v7 = vmul.f32 %v2397_v55, %v2397_v55 }
 0x38c   : > { %v2702_v31 = vsel %vm2084_vm4, %v2526_v50, 0.0 }
 0x38d   : > { %v2683_v30 = vadd.f32 %v2682_v35, %v2681_v18  ;;  %v2398_v18 = vsub.f32 %v6031_v36, %v5321_v48  ;;  %v2700_v46 = vsel %vm2084_vm4, %v2525_v21, 0.0  ;;  %v2704_v15 = vsel %vm2084_vm4, %v2527_v7, 0.0 }
 0x38f   : > { %v2685_v52 = vadd.f32 %v2684_v43, %v2683_v30  ;;  %v6032_v30 = vld [vmem:[#allocation73_spill] sm:$0xff]  ;;  %v2528_v11 = vmul.f32 %v2398_v18, %v2398_v18 }
 0x390   : > { %v2399_v40 = vsub.f32 %v6032_v30, %v5321_v48 }
 0x391   : > { %v2687_v61 = vadd.f32 %v2686_v10, %v2685_v52  ;;  %v6033_v52 = vld [vmem:[#allocation74_spill] sm:$0xff]  ;;  %v2706_v44 = vsel %vm2084_vm4, %v2528_v11, 0.0 }
 0x392   : > { %v2400_v60 = vsub.f32 %v6033_v52, %v5321_v48  ;;  %v2529_v56 = vmul.f32 %v2399_v40, %v2399_v40 }
 0x393   : > { %v2689_v4 = vadd.f32 %v2688_v14, %v2687_v61  ;;  %v6034_v61 = vld [vmem:[#allocation75_spill] sm:$0xff] }
 0x394   : > { %v2401_v39 = vsub.f32 %v6034_v61, %v5321_v48  ;;  %v2530_v19 = vmul.f32 %v2400_v60, %v2400_v60  ;;  %v2708_v54 = vsel %vm2084_vm4, %v2529_v56, 0.0 }
 0x395   : > { %v2691_v63 = vadd.f32 %v2690_v8, %v2689_v4  ;;  %v6035_v4 = vld [vmem:[#allocation76_spill] sm:$0xff] }
 0x396   : > { %v2402_v13 = vsub.f32 %v6035_v4, %v5321_v48  ;;  %v2531_v58 = vmul.f32 %v2401_v39, %v2401_v39  ;;  %v2710_v24 = vsel %vm2084_vm4, %v2530_v19, 0.0 }
 0x397   : > { %v2693_v0 = vadd.f32 %v2692_v1, %v2691_v63  ;;  %v6036_v63 = vld [vmem:[#allocation77_spill] sm:$0xff] }
 0x398   : > { %v2403_v59 = vsub.f32 %v6036_v63, %v5321_v48  ;;  %v2532_v41 = vmul.f32 %v2402_v13, %v2402_v13  ;;  %v2712_v21 = vsel %vm2084_vm4, %v2531_v58, 0.0 }
 0x399   : > { %v2695_v37 = vadd.f32 %v2694_v45, %v2693_v0  ;;  %v6037_v0 = vld [vmem:[#allocation78_spill] sm:$0xff] }
 0x39a   : > { %v2404_v2 = vsub.f32 %v6037_v0, %v5321_v48  ;;  %v2533_v55 = vmul.f32 %v2403_v59, %v2403_v59  ;;  %v2714_v50 = vsel %vm2084_vm4, %v2532_v41, 0.0 }
 0x39b   : > { %v2697_v16 = vadd.f32 %v2696_v27, %v2695_v37  ;;  %v6038_v37 = vld [vmem:[#allocation79_spill] sm:$0xff] }
 0x39c   : > { %v2405_v47 = vsub.f32 %v6038_v37, %v5321_v48  ;;  %v2534_v18 = vmul.f32 %v2404_v2, %v2404_v2  ;;  %v2716_v7 = vsel %vm2084_vm4, %v2533_v55, 0.0 }
 0x39d   : > { %v2699_v35 = vadd.f32 %v2698_v29, %v2697_v16  ;;  %v6039_v16 = vld [vmem:[#allocation80_spill] sm:$0xff] }
 0x39e   : > { %v2406_v36 = vsub.f32 %v6039_v16, %v5321_v48  ;;  %v2535_v40 = vmul.f32 %v2405_v47, %v2405_v47  ;;  %v2718_v11 = vsel %vm2084_vm4, %v2534_v18, 0.0 }
 0x39f   : > { %v2701_v43 = vadd.f32 %v2700_v46, %v2699_v35  ;;  %v6040_v35 = vld [vmem:[#allocation81_spill] sm:$0xff] }
 0x3a0   : > { %v2407_v30 = vsub.f32 %v6040_v35, %v5321_v48  ;;  %v2536_v60 = vmul.f32 %v2406_v36, %v2406_v36  ;;  %v2720_v56 = vsel %vm2084_vm4, %v2535_v40, 0.0 }
 0x3a1   : > { %v2703_v10 = vadd.f32 %v2702_v31, %v2701_v43  ;;  %v6041_v43 = vld [vmem:[#allocation82_spill] sm:$0xff] }
 0x3a2   : > { %v2408_v52 = vsub.f32 %v6041_v43, %v5321_v48  ;;  %v2537_v39 = vmul.f32 %v2407_v30, %v2407_v30  ;;  %v2722_v19 = vsel %vm2084_vm4, %v2536_v60, 0.0 }
 0x3a3   : > { %v2705_v14 = vadd.f32 %v2704_v15, %v2703_v10  ;;  %v6042_v10 = vld [vmem:[#allocation83_spill] sm:$0xff] }
 0x3a4   : > { %v2409_v61 = vsub.f32 %v6042_v10, %v5321_v48  ;;  %v2538_v13 = vmul.f32 %v2408_v52, %v2408_v52  ;;  %v2724_v58 = vsel %vm2084_vm4, %v2537_v39, 0.0 }
 0x3a5   : > { %v2707_v8 = vadd.f32 %v2706_v44, %v2705_v14  ;;  %v6043_v14 = vld [vmem:[#allocation84_spill] sm:$0xff] }
 0x3a6   : > { %v2410_v4 = vsub.f32 %v6043_v14, %v5321_v48  ;;  %v2539_v59 = vmul.f32 %v2409_v61, %v2409_v61  ;;  %v2726_v41 = vsel %vm2084_vm4, %v2538_v13, 0.0 }
 0x3a7   : > { %v2709_v1 = vadd.f32 %v2708_v54, %v2707_v8  ;;  %v6044_v8 = vld [vmem:[#allocation12_spill] sm:$0xff] }
 0x3a8   : > { %v2411_v63 = vsub.f32 %v6044_v8, %v5321_v48  ;;  %v2540_v2 = vmul.f32 %v2410_v4, %v2410_v4  ;;  %v2728_v55 = vsel %vm2084_vm4, %v2539_v59, 0.0 }
 0x3a9   : > { %v2711_v45 = vadd.f32 %v2710_v24, %v2709_v1  ;;  %v6045_v1 = vld [vmem:[#allocation14_spill] sm:$0xff] }
 0x3aa   : > { %v2412_v0 = vsub.f32 %v6045_v1, %v5321_v48  ;;  %v2541_v47 = vmul.f32 %v2411_v63, %v2411_v63  ;;  %v2730_v18 = vsel %vm2084_vm4, %v2540_v2, 0.0 }
 0x3ab   : > { %v2713_v27 = vadd.f32 %v2712_v21, %v2711_v45  ;;  %v6046_v45 = vld [vmem:[#allocation15_spill] sm:$0xff] }
 0x3ac   : > { %v2413_v37 = vsub.f32 %v6046_v45, %v5321_v48  ;;  %v2542_v36 = vmul.f32 %v2412_v0, %v2412_v0  ;;  %v2732_v40 = vsel %vm2084_vm4, %v2541_v47, 0.0 }
 0x3ad   : > { %v2715_v29 = vadd.f32 %v2714_v50, %v2713_v27  ;;  %v6047_v27 = vld [vmem:[#allocation16_spill] sm:$0xff] }
 0x3ae   : > { %v2414_v16 = vsub.f32 %v6047_v27, %v5321_v48  ;;  %v2543_v30 = vmul.f32 %v2413_v37, %v2413_v37  ;;  %v2734_v60 = vsel %vm2084_vm4, %v2542_v36, 0.0 }
 0x3af   : > { %v2717_v46 = vadd.f32 %v2716_v7, %v2715_v29  ;;  %v6048_v29 = vld [vmem:[#allocation17_spill] sm:$0xff] }
 0x3b0   : > { %v2415_v35 = vsub.f32 %v6048_v29, %v5321_v48  ;;  %v2544_v52 = vmul.f32 %v2414_v16, %v2414_v16  ;;  %v2736_v39 = vsel %vm2084_vm4, %v2543_v30, 0.0 }
 0x3b1   : > { %v2719_v31 = vadd.f32 %v2718_v11, %v2717_v46  ;;  %v6049_v46 = vld [vmem:[#allocation19_spill] sm:$0xff] }
 0x3b2   : > { %v2416_v43 = vsub.f32 %v6049_v46, %v5321_v48  ;;  %v2545_v61 = vmul.f32 %v2415_v35, %v2415_v35  ;;  %v2738_v13 = vsel %vm2084_vm4, %v2544_v52, 0.0 }
 0x3b3   : > { %v2721_v15 = vadd.f32 %v2720_v56, %v2719_v31  ;;  %v6050_v31 = vld [vmem:[#allocation21_spill] sm:$0xff] }
 0x3b4   : > { %v2417_v10 = vsub.f32 %v6050_v31, %v5321_v48  ;;  %v2546_v4 = vmul.f32 %v2416_v43, %v2416_v43  ;;  %v2740_v59 = vsel %vm2084_vm4, %v2545_v61, 0.0 }
 0x3b5   : > { %v2723_v44 = vadd.f32 %v2722_v19, %v2721_v15  ;;  %v6051_v15 = vld [vmem:[#allocation23_spill] sm:$0xff] }
 0x3b6   : > { %v2418_v14 = vsub.f32 %v6051_v15, %v5321_v48  ;;  %v2547_v63 = vmul.f32 %v2417_v10, %v2417_v10  ;;  %v2742_v2 = vsel %vm2084_vm4, %v2546_v4, 0.0 }
 0x3b7   : > { %v2725_v54 = vadd.f32 %v2724_v58, %v2723_v44  ;;  %v6052_v44 = vld [vmem:[#allocation25_spill] sm:$0xff] }
 0x3b8   : > { %v2419_v8 = vsub.f32 %v6052_v44, %v5321_v48  ;;  %v2548_v0 = vmul.f32 %v2418_v14, %v2418_v14  ;;  %v2744_v47 = vsel %vm2084_vm4, %v2547_v63, 0.0 }
 0x3b9   : > { %v2727_v24 = vadd.f32 %v2726_v41, %v2725_v54  ;;  %v6053_v54 = vld [vmem:[#allocation26_spill] sm:$0xff] }
 0x3ba   : > { %v2420_v1 = vsub.f32 %v6053_v54, %v5321_v48  ;;  %v2549_v37 = vmul.f32 %v2419_v8, %v2419_v8  ;;  %v2746_v36 = vsel %vm2084_vm4, %v2548_v0, 0.0 }
 0x3bb   : > { %v2729_v21 = vadd.f32 %v2728_v55, %v2727_v24  ;;  %v6054_v24 = vld [vmem:[#allocation27_spill] sm:$0xff] }
 0x3bc   : > { %v2421_v45 = vsub.f32 %v6054_v24, %v5321_v48  ;;  %v2550_v16 = vmul.f32 %v2420_v1, %v2420_v1  ;;  %v2748_v30 = vsel %vm2084_vm4, %v2549_v37, 0.0 }
 0x3bd   : > { %v2731_v50 = vadd.f32 %v2730_v18, %v2729_v21  ;;  %v6055_v21 = vld [vmem:[#allocation28_spill] sm:$0xff] }
 0x3be   : > { %v2422_v27 = vsub.f32 %v6055_v21, %v5321_v48  ;;  %v2551_v35 = vmul.f32 %v2421_v45, %v2421_v45  ;;  %v2750_v52 = vsel %vm2084_vm4, %v2550_v16, 0.0 }
 0x3bf   : > { %v2733_v7 = vadd.f32 %v2732_v40, %v2731_v50  ;;  %v6056_v50 = vld [vmem:[#allocation29_spill] sm:$0xff] }
 0x3c0   : > { %v2423_v29 = vsub.f32 %v6056_v50, %v5321_v48  ;;  %v2552_v43 = vmul.f32 %v2422_v27, %v2422_v27  ;;  %v2752_v61 = vsel %vm2084_vm4, %v2551_v35, 0.0 }
 0x3c1   : > { %v2735_v11 = vadd.f32 %v2734_v60, %v2733_v7  ;;  %v6057_v7 = vld [vmem:[#allocation31_spill] sm:$0xff] }
 0x3c2   : > { %v2424_v46 = vsub.f32 %v6057_v7, %v5321_v48  ;;  %v2553_v10 = vmul.f32 %v2423_v29, %v2423_v29  ;;  %v2754_v4 = vsel %vm2084_vm4, %v2552_v43, 0.0 }
 0x3c3   : > { %v2737_v56 = vadd.f32 %v2736_v39, %v2735_v11  ;;  %v6058_v11 = vld [vmem:[#allocation33_spill] sm:$0xff] }
 0x3c4   : > { %v2425_v31 = vsub.f32 %v6058_v11, %v5321_v48  ;;  %v2554_v14 = vmul.f32 %v2424_v46, %v2424_v46  ;;  %v2756_v63 = vsel %vm2084_vm4, %v2553_v10, 0.0 }
 0x3c5   : > { %v2739_v19 = vadd.f32 %v2738_v13, %v2737_v56  ;;  %v6059_v56 = vld [vmem:[#allocation35_spill] sm:$0xff] }
 0x3c6   : > { %v2426_v15 = vsub.f32 %v6059_v56, %v5321_v48  ;;  %v2555_v8 = vmul.f32 %v2425_v31, %v2425_v31  ;;  %v2758_v0 = vsel %vm2084_vm4, %v2554_v14, 0.0 }
 0x3c7   : > { %v2741_v58 = vadd.f32 %v2740_v59, %v2739_v19  ;;  %v6060_v19 = vld [vmem:[#allocation37_spill] sm:$0xff] }
 0x3c8   : > { %v2427_v44 = vsub.f32 %v6060_v19, %v5321_v48  ;;  %v2556_v1 = vmul.f32 %v2426_v15, %v2426_v15  ;;  %v2760_v37 = vsel %vm2084_vm4, %v2555_v8, 0.0 }
 0x3c9   : > { %v2743_v41 = vadd.f32 %v2742_v2, %v2741_v58  ;;  %v6061_v58 = vld [vmem:[#allocation38_spill] sm:$0xff] }
 0x3ca   : > { %v2428_v54 = vsub.f32 %v6061_v58, %v5321_v48  ;;  %v2557_v45 = vmul.f32 %v2427_v44, %v2427_v44  ;;  %v2762_v16 = vsel %vm2084_vm4, %v2556_v1, 0.0 }
 0x3cb   : > { %v2745_v55 = vadd.f32 %v2744_v47, %v2743_v41  ;;  %v6062_v41 = vld [vmem:[#allocation39_spill] sm:$0xff] }
 0x3cc   : > { %v2429_v24 = vsub.f32 %v6062_v41, %v5321_v48  ;;  %v2558_v27 = vmul.f32 %v2428_v54, %v2428_v54  ;;  %v2764_v35 = vsel %vm2084_vm4, %v2557_v45, 0.0 }
 0x3cd   : > { %v2747_v18 = vadd.f32 %v2746_v36, %v2745_v55  ;;  %v6063_v55 = vld [vmem:[#allocation40_spill] sm:$0xff] }
 0x3ce   : > { %v2430_v21 = vsub.f32 %v6063_v55, %v5321_v48  ;;  %v2559_v29 = vmul.f32 %v2429_v24, %v2429_v24  ;;  %v2766_v43 = vsel %vm2084_vm4, %v2558_v27, 0.0 }
 0x3cf   : > { %v2749_v40 = vadd.f32 %v2748_v30, %v2747_v18  ;;  %v6064_v18 = vld [vmem:[#allocation41_spill] sm:$0xff] }
 0x3d0   : > { %v2431_v50 = vsub.f32 %v6064_v18, %v5321_v48  ;;  %v2560_v46 = vmul.f32 %v2430_v21, %v2430_v21  ;;  %v2768_v10 = vsel %vm2084_vm4, %v2559_v29, 0.0 }
 0x3d1   : > { %v2751_v60 = vadd.f32 %v2750_v52, %v2749_v40  ;;  %v6065_v40 = vld [vmem:[#allocation43_spill] sm:$0xff] }
 0x3d2   : > { %v2432_v7 = vsub.f32 %v6065_v40, %v5321_v48  ;;  %v2561_v31 = vmul.f32 %v2431_v50, %v2431_v50  ;;  %v2770_v14 = vsel %vm2084_vm4, %v2560_v46, 0.0 }
 0x3d3   : > { %v2753_v39 = vadd.f32 %v2752_v61, %v2751_v60  ;;  %v6066_v60 = vld [vmem:[#allocation45_spill] sm:$0xff] }
 0x3d4   : > { %v2433_v11 = vsub.f32 %v6066_v60, %v5321_v48  ;;  %v2562_v15 = vmul.f32 %v2432_v7, %v2432_v7  ;;  %v2772_v8 = vsel %vm2084_vm4, %v2561_v31, 0.0 }
 0x3d5   : > { %v2755_v13 = vadd.f32 %v2754_v4, %v2753_v39  ;;  %v6067_v39 = vld [vmem:[#allocation47_spill] sm:$0xff] }
 0x3d6   : > { %v2434_v56 = vsub.f32 %v6067_v39, %v5321_v48  ;;  %v2563_v44 = vmul.f32 %v2433_v11, %v2433_v11  ;;  %v2774_v1 = vsel %vm2084_vm4, %v2562_v15, 0.0 }
 0x3d7   : > { %v2757_v59 = vadd.f32 %v2756_v63, %v2755_v13  ;;  %v6068_v13 = vld [vmem:[#allocation49_spill] sm:$0xff] }
 0x3d8   : > { %v2435_v19 = vsub.f32 %v6068_v13, %v5321_v48  ;;  %v2564_v54 = vmul.f32 %v2434_v56, %v2434_v56  ;;  %v2776_v45 = vsel %vm2084_vm4, %v2563_v44, 0.0 }
 0x3d9   : > { %v2759_v2 = vadd.f32 %v2758_v0, %v2757_v59  ;;  %v6069_v59 = vld [vmem:[#allocation50_spill] sm:$0xff] }
 0x3da   : > { %v2436_v58 = vsub.f32 %v6069_v59, %v5321_v48  ;;  %v2565_v24 = vmul.f32 %v2435_v19, %v2435_v19  ;;  %v2778_v27 = vsel %vm2084_vm4, %v2564_v54, 0.0 }
 0x3db   : > { %v2761_v47 = vadd.f32 %v2760_v37, %v2759_v2  ;;  %v6070_v2 = vld [vmem:[#allocation51_spill] sm:$0xff] }
 0x3dc   : > { %v2437_v41 = vsub.f32 %v6070_v2, %v5321_v48  ;;  %v2566_v21 = vmul.f32 %v2436_v58, %v2436_v58  ;;  %v2780_v29 = vsel %vm2084_vm4, %v2565_v24, 0.0 }
 0x3dd   : > { %v2763_v36 = vadd.f32 %v2762_v16, %v2761_v47  ;;  %v6071_v47 = vld [vmem:[#allocation52_spill] sm:$0xff] }
 0x3de   : > { %v2438_v55 = vsub.f32 %v6071_v47, %v5321_v48  ;;  %v2567_v50 = vmul.f32 %v2437_v41, %v2437_v41  ;;  %v2782_v46 = vsel %vm2084_vm4, %v2566_v21, 0.0  ;;  %v6077_v47 = vld [vmem:[#allocation66_spill] sm:$0xff] }
 0x3df   : > { %v2765_v30 = vadd.f32 %v2764_v35, %v2763_v36  ;;  %v6072_v36 = vld [vmem:[#allocation53_spill] sm:$0xff] }
 0x3e0   : > { %v2439_v18 = vsub.f32 %v6072_v36, %v5321_v48  ;;  %v2568_v7 = vmul.f32 %v2438_v55, %v2438_v55  ;;  %v2784_v31 = vsel %vm2084_vm4, %v2567_v50, 0.0  ;;  %v2447_v55 = vsub.f32 %v6077_v47, %v5321_v48 }
 0x3e1   : > { %v2767_v52 = vadd.f32 %v2766_v43, %v2765_v30  ;;  %v6073_v30 = vld [vmem:[#allocation54_spill] sm:$0xff] }
 0x3e2   : > { %v2440_v40 = vsub.f32 %v6073_v30, %v5321_v48  ;;  %v2569_v11 = vmul.f32 %v2439_v18, %v2439_v18  ;;  %v2786_v15 = vsel %vm2084_vm4, %v2568_v7, 0.0  ;;  %v6079_v7 = vld [vmem:[#allocation71_spill] sm:$0xff] }
 0x3e3   : > { %v2769_v61 = vadd.f32 %v2768_v10, %v2767_v52  ;;  %v6074_v52 = vld [vmem:[#allocation56_spill] sm:$0xff] }
 0x3e4   : > { %v2441_v60 = vsub.f32 %v6074_v52, %v5321_v48  ;;  %v2570_v56 = vmul.f32 %v2440_v40, %v2440_v40  ;;  %v2788_v19 = vsel %vm2084_vm4, %v2569_v11, 0.0 }
 0x3e5   : > { %v2771_v4 = vadd.f32 %v2770_v14, %v2769_v61  ;;  %v6075_v61 = vld [vmem:[#allocation57_spill] sm:$0xff] }
 0x3e6   : > { %v2442_v39 = vsub.f32 %v6075_v61, %v5321_v48  ;;  %v2571_v13 = vmul.f32 %v2441_v60, %v2441_v60  ;;  %v2790_v58 = vsel %vm2084_vm4, %v2570_v56, 0.0  ;;  %v2452_v61 = vsub.f32 %v4865_v17, %v5321_v48 }
 0x3e7   : > { %v2773_v63 = vadd.f32 %v2772_v8, %v2771_v4  ;;  %v2443_v4 = vsub.f32 %v5994_v20, %v5321_v48  ;;  %v6076_v8 = vld [vmem:[#allocation60_spill] sm:$0xff]  ;;  %v2446_v20 = vsub.f32 %v5999_v38, %v5321_v48  ;;  %v6078_v38 = vld [vmem:[#allocation69_spill] sm:$0xff]  ;;  %v2455_v17 = vsub.f32 %v4943_v6, %v5321_v48 }
 0x3e8   : > { %v2572_v59 = vmul.f32 %v2442_v39, %v2442_v39  ;;  %v2792_v2 = vsel %vm2084_vm4, %v2571_v13, 0.0  ;;  %v2458_v6 = vsub.f32 %v5000_v42, %v5321_v48  ;;  %v2461_v42 = vsub.f32 %v5079_v26, %v5321_v48 }
 0x3e9   : > { %v2775_v0 = vadd.f32 %v2774_v1, %v2773_v63  ;;  %v2444_v63 = vsub.f32 %v6076_v8, %v5321_v48  ;;  %v2445_v1 = vsub.f32 %v5996_v5, %v5321_v48  ;;  %v2448_v5 = vsub.f32 %v4775_v28, %v5321_v48 }
 0x3ea   : > { %v2576_v36 = vmul.f32 %v2446_v20, %v2446_v20  ;;  %v2451_v28 = vsub.f32 %v4853_v62, %v5321_v48  ;;  %v2454_v62 = vsub.f32 %v4910_v33, %v5321_v48  ;;  %v2457_v33 = vsub.f32 %v4988_v53, %v5321_v48 }
 0x3eb   : > { %v2777_v37 = vadd.f32 %v2776_v45, %v2775_v0  ;;  %v2573_v0 = vmul.f32 %v2443_v4, %v2443_v4  ;;  %v2574_v24 = vmul.f32 %v2444_v63, %v2444_v63  ;;  %v2794_v45 = vsel %vm2084_vm4, %v2572_v59, 0.0 }
 0x3ec   : > { %v2575_v21 = vmul.f32 %v2445_v1, %v2445_v1  ;;  %v2802_v52 = vsel %vm2084_vm4, %v2576_v36, 0.0  ;;  %v2581_v4 = vmul.f32 %v2451_v28, %v2451_v28  ;;  %v2584_v1 = vmul.f32 %v2454_v62, %v2454_v62 }
 0x3ed   : > { %v2779_v16 = vadd.f32 %v2778_v27, %v2777_v37  ;;  %v2796_v27 = vsel %vm2084_vm4, %v2573_v0, 0.0  ;;  %v2798_v18 = vsel %vm2084_vm4, %v2574_v24, 0.0  ;;  %v2460_v53 = vsub.f32 %v5036_v3, %v5321_v48 }
 0x3ee   : > { %v2800_v30 = vsel %vm2084_vm4, %v2575_v21, 0.0  ;;  %v2463_v3 = vsub.f32 %v5124_v25, %v5321_v48  ;;  %v2464_v26 = vsub.f32 %v5126_v51, %v5321_v48  ;;  %v2466_v25 = vsub.f32 %v5154_v23, %v5321_v48  ;;  %v6080_v23 = vld [vmem:[#allocation85_spill] sm:$0xff] }
 0x3ef   : > { %v2781_v35 = vadd.f32 %v2780_v29, %v2779_v16  ;;  %v2449_v29 = vsub.f32 %v6078_v38, %v5321_v48  ;;  %v2467_v51 = vsub.f32 %v5180_v34, %v5321_v48  ;;  %v2469_v62 = vsub.f32 %v6080_v23, %v5321_v48  ;;  %v6081_v34 = vld [vmem:[#allocation86_spill] sm:$0xff] }
 0x3f0   : > { %v2593_v28 = vmul.f32 %v2463_v3, %v2463_v3 }
 0x3f1   : > { %v2783_v43 = vadd.f32 %v2782_v46, %v2781_v35  ;;  %v2577_v35 = vmul.f32 %v2447_v55, %v2447_v55  ;;  %v2450_v46 = vsub.f32 %v6079_v7, %v5321_v48  ;;  %v2579_v11 = vmul.f32 %v2449_v29, %v2449_v29 }
 0x3f2   : > { %v2587_v55 = vmul.f32 %v2457_v33, %v2457_v33  ;;  %v2590_v29 = vmul.f32 %v2460_v53, %v2460_v53  ;;  %v6083_v33 = vld [vmem:[#allocation62_spill] sm:$0xff] }
 0x3f3   : > { %v2785_v10 = vadd.f32 %v2784_v31, %v2783_v43  ;;  %v2578_v43 = vmul.f32 %v2448_v5, %v2448_v5  ;;  %v2804_v31 = vsel %vm2084_vm4, %v2577_v35, 0.0  ;;  %v2580_v39 = vmul.f32 %v2450_v46, %v2450_v46 }
 0x3f4   : > { %v2808_v13 = vsel %vm2084_vm4, %v2579_v11, 0.0 }
 0x3f5   : > { %v2787_v14 = vadd.f32 %v2786_v15, %v2785_v10  ;;  %v2806_v56 = vsel %vm2084_vm4, %v2578_v43, 0.0  ;;  %v2810_v8 = vsel %vm2084_vm4, %v2580_v39, 0.0 }
 0x3f7   : > { %v2789_v44 = vadd.f32 %v2788_v19, %v2787_v14  ;;  %v2453_v14 = vsub.f32 %v4898_v32, %v5321_v48  ;;  %v2456_v32 = vsub.f32 %v4955_v22, %v5321_v48  ;;  %v2459_v22 = vsub.f32 %v5034_v49, %v5321_v48 }
 0x3f8   : > { %v2462_v49 = vsub.f32 %v5083_v9, %v5321_v48  ;;  %v2465_v9 = vsub.f32 %v5152_v57, %v5321_v48  ;;  %v2468_v57 = vsub.f32 %v5182_v12, %v5321_v48  ;;  %v6082_v12 = vld [vmem:[#allocation58_spill] sm:$0xff] }
 0x3f9   : > { %v2791_v54 = vadd.f32 %v2790_v58, %v2789_v44  ;;  %v2582_v44 = vmul.f32 %v2452_v61, %v2452_v61  ;;  %v2583_v59 = vmul.f32 %v2453_v14, %v2453_v14  ;;  %v2812_v58 = vsel %vm2084_vm4, %v2581_v4, 0.0 }
 0x3fa   : > { %v2592_v43 = vmul.f32 %v2462_v49, %v2462_v49  ;;  %v2596_v4 = vmul.f32 %v2466_v25, %v2466_v25 }
 0x3fb   : > { %v2793_v41 = vadd.f32 %v2792_v2, %v2791_v54  ;;  %v2814_v0 = vsel %vm2084_vm4, %v2582_v44, 0.0  ;;  %v2816_v20 = vsel %vm2084_vm4, %v2583_v59, 0.0  ;;  %v2597_v44 = vmul.f32 %v2467_v51, %v2467_v51 }
 0x3fc   : > { %v2834_v61 = vsel %vm2084_vm4, %v2592_v43, 0.0  ;;  %v2598_v59 = vmul.f32 %v2468_v57, %v2468_v57 }
 0x3fd   : > { %v2795_v37 = vadd.f32 %v2794_v45, %v2793_v41  ;;  %v2585_v41 = vmul.f32 %v2455_v17, %v2455_v17  ;;  %v2586_v45 = vmul.f32 %v2456_v32, %v2456_v32  ;;  %v2470_v17 = vsub.f32 %v6081_v34, %v5321_v48 }
 0x3fe   : > { %v2471_v32 = vsub.f32 %v6082_v12, %v5321_v48 }
 0x3ff   : > { %v2797_v16 = vadd.f32 %v2796_v27, %v2795_v37  ;;  %v2818_v37 = vsel %vm2084_vm4, %v2584_v1, 0.0  ;;  %v2820_v21 = vsel %vm2084_vm4, %v2585_v41, 0.0  ;;  %v2822_v5 = vsel %vm2084_vm4, %v2586_v45, 0.0  ;;  %v6084_v45 = vld [vmem:[#allocation64_spill] sm:$0xff] }
 0x400   : > { %v2599_v1 = vmul.f32 %v2469_v62, %v2469_v62  ;;  %v2472_v41 = vsub.f32 %v6083_v33, %v5321_v48 }
 0x401   : > { %v2799_v50 = vadd.f32 %v2798_v18, %v2797_v16  ;;  %v2588_v16 = vmul.f32 %v2458_v6, %v2458_v6  ;;  %v2589_v18 = vmul.f32 %v2459_v22, %v2459_v22 }
 0x402   : > { %v2848_v22 = vsel %vm2084_vm4, %v2599_v1, 0.0  ;;  %v2602_v53 = vmul.f32 %v2472_v41, %v2472_v41 }
 0x403   : > { %v2801_v40 = vadd.f32 %v2800_v30, %v2799_v50  ;;  %v2824_v50 = vsel %vm2084_vm4, %v2587_v55, 0.0  ;;  %v2826_v35 = vsel %vm2084_vm4, %v2588_v16, 0.0  ;;  %v2828_v7 = vsel %vm2084_vm4, %v2589_v18, 0.0 }
 0x405   : > { %v2803_v60 = vadd.f32 %v2802_v52, %v2801_v40  ;;  %v2591_v40 = vmul.f32 %v2461_v42, %v2461_v42  ;;  %v2830_v52 = vsel %vm2084_vm4, %v2590_v29, 0.0 }
 0x407   : > { %v2805_v10 = vadd.f32 %v2804_v31, %v2803_v60  ;;  %v2832_v11 = vsel %vm2084_vm4, %v2591_v40, 0.0 }
 0x409   : > { %v2807_v15 = vadd.f32 %v2806_v56, %v2805_v10  ;;  %v2594_v10 = vmul.f32 %v2464_v26, %v2464_v26  ;;  %v2595_v56 = vmul.f32 %v2465_v9, %v2465_v9 }
 0x40b   : > { %v2809_v19 = vadd.f32 %v2808_v13, %v2807_v15  ;;  %v2836_v15 = vsel %vm2084_vm4, %v2593_v28, 0.0  ;;  %v2838_v13 = vsel %vm2084_vm4, %v2594_v10, 0.0 }
 0x40d   : > { %v2811_v63 = vadd.f32 %v2810_v8, %v2809_v19  ;;  %v2840_v8 = vsel %vm2084_vm4, %v2595_v56, 0.0 }
 0x40f   : > { %v2813_v54 = vadd.f32 %v2812_v58, %v2811_v63  ;;  %v2842_v58 = vsel %vm2084_vm4, %v2596_v4, 0.0 }
 0x411   : > { %v2815_v2 = vadd.f32 %v2814_v0, %v2813_v54  ;;  %v2844_v0 = vsel %vm2084_vm4, %v2597_v44, 0.0 }
 0x413   : > { %v2817_v24 = vadd.f32 %v2816_v20, %v2815_v2  ;;  %v2600_v20 = vmul.f32 %v2470_v17, %v2470_v17 }
 0x415   : > { %v2819_v47 = vadd.f32 %v2818_v37, %v2817_v24  ;;  %v2846_v24 = vsel %vm2084_vm4, %v2598_v59, 0.0  ;;  %v2473_v37 = vsub.f32 %v6084_v45, %v5321_v48  ;;  %v2850_v16 = vsel %vm2084_vm4, %v2600_v20, 0.0 }
 0x417   : > { %v2821_v27 = vadd.f32 %v2820_v21, %v2819_v47  ;;  %v2601_v47 = vmul.f32 %v2471_v32, %v2471_v32  ;;  %v6085_v21 = vld [vmem:[#allocation87_spill] sm:$0xff] }
 0x419   : > { %v2823_v36 = vadd.f32 %v2822_v5, %v2821_v27  ;;  %v2474_v27 = vsub.f32 %v6085_v21, %v5321_v48  ;;  %v2852_v42 = vsel %vm2084_vm4, %v2601_v47, 0.0 }
 0x41b   : > { %v2825_v38 = vadd.f32 %v2824_v50, %v2823_v36  ;;  %v2603_v36 = vmul.f32 %v2473_v37, %v2473_v37  ;;  %v2604_v50 = vmul.f32 %v2474_v27, %v2474_v27 }
 0x41d   : > { %v2827_v30 = vadd.f32 %v2826_v35, %v2825_v38  ;;  %v2854_v38 = vsel %vm2084_vm4, %v2602_v53, 0.0  ;;  %v2856_v29 = vsel %vm2084_vm4, %v2603_v36, 0.0  ;;  %v2858_v48 = vsel %vm2084_vm4, %v2604_v50, 0.0 }
 0x41f   : > { %v2829_v46 = vadd.f32 %v2828_v7, %v2827_v30 }
 0x421   : > { %v2831_v60 = vadd.f32 %v2830_v52, %v2829_v46 }
 0x423   : > { %v2833_v31 = vadd.f32 %v2832_v11, %v2831_v60 }
 0x425   : > { %v2835_v39 = vadd.f32 %v2834_v61, %v2833_v31 }
 0x427   : > { %v2837_v14 = vadd.f32 %v2836_v15, %v2835_v39 }
 0x429   : > { %v2839_v19 = vadd.f32 %v2838_v13, %v2837_v14 }
 0x42b   : > { %v2841_v63 = vadd.f32 %v2840_v8, %v2839_v19 }
 0x42d   : > { %v2843_v54 = vadd.f32 %v2842_v58, %v2841_v63 }
 0x42f   : > { %v2845_v2 = vadd.f32 %v2844_v0, %v2843_v54 }
 0x431   : > { %v2847_v6 = vadd.f32 %v2846_v24, %v2845_v2 }
 0x433   : > { %v2849_v55 = vadd.f32 %v2848_v22, %v2847_v6 }
 0x435   : > { %v2851_v5 = vadd.f32 %v2850_v16, %v2849_v55 }
 0x437   : > { %v2853_v18 = vadd.f32 %v2852_v42, %v2851_v5 }
 0x439   : > { %v2855_v49 = vadd.f32 %v2854_v38, %v2853_v18 }
 0x43b   : > { %v2857_v35 = vadd.f32 %v2856_v29, %v2855_v49 }
 0x43d   : > { %v2859_v30 = vadd.f32 %v2858_v48, %v2857_v35 }
 0x43f   : > { %v2860_v3 = vrot.slane %v2859_v30, 4 }
 0x441   : > { %v2861_v40 = vadd.f32 %v2860_v3, %v2859_v30 }
 0x443   : > { %v2862_v7 = vrot.slane %v2861_v40, 2 }
 0x445   : > { %v2863_v46 = vadd.f32 %v2862_v7, %v2861_v40 }
 0x447   : > { %v2864_v26 = vrot.slane %v2863_v46, 1 }
 0x449   : > { %v2865_v43 = vadd.f32 %v2864_v26, %v2863_v46 }
 0x44b   : > { %2866 = vst.msk [vmem:[%s5394_s10 + $0x1] sm:$0x1] %vm2475_vm5, %v2865_v43 }
 0x44c   : > { %3817 = shalt.err (!%p3814_p3)
}
 0x44d   : > { %3750 = dma.vmem_to_hbm [thread:$0]  (%p3913_p5), %s2890_s24, 32, %s2892_s25, %s2873_s26  }
 0x44e PF: > { %p3756_p4 = scmp.ge.s32.totalorder %s3852_s15, 2  ;;  %s2911_s7 = sand.u32 1, %s3840_s12  }
 0x44f   : > { %s2912_s8 = scalar_lea.sflag [#allocation3], %s2911_s7 }
 0x450   : > { %p3753_p7 = pnand %p3756_p4, %p3917_p6 }
 0x452   : > { %p3754_p8 = pneg %p3753_p7 }
 0x454   : > { %3835 = dma.done.wait (%p3754_p8), %s2912_s8, 32  }
 0x455   : > { %3837 = vsyncadd (%p3754_p8), %s2912_s8, 4294967264  ;;  %p14_p9 = scmp.ge.s32.totalorder %s3900_s18, 4   ;;  %s6086_s12 = smov %s3844_s13 }
 0x456   : > { %s6087_s13 = smov %s3848_s14  ;;  %s6088_s14 = smov %s3911_s21 }
 0x457   : > { %s6089_s15 = smov %s3900_s18  ;;  %16 = sbr.rel (!%p14_p9) target bundleno = 3 (0x3), region = 75 }
 0x45c   :  { %2918 = vsyncpa [#allocation3], 1 }
 0x45d   :  { %2920 = vsyncpa [#allocation3 + $0x1], 1 }

</bundles_post_ra>
